<compile_context>
chip_gen: v6e
topology: v6e:2x2x1
jax: 0.10.0
libtpu: 0.0.40
codegen_flags: <defaults>
</compile_context>

<pallas_src>
import functools

import numpy as np

import jax
import jax.numpy as jnp
from jax.experimental import pallas as pl
from jax.experimental.pallas import tpu as pltpu


# ---------------------------------------------------------------------------
# Fused whole-forward kernel (one batch block per grid step)
# ---------------------------------------------------------------------------
def _encoder_fused_kernel(x_ref, mc0, mc1, mc2, mc3, b1, b2, b3, wfc, bfc,
                          out_ref, *, seg):
    """conv0..conv3 (+ folded BN, LeakyReLU(0.2)) and both fc heads, all in VMEM.

    x_ref : (NB*seg, 128)          f32   embedded input slab (seg = 23 rows / element)
    mc{l} : (4*W*Cin, Wo*Cout)     bf16  K-concatenated banded conv matrix (BN folded)
    b{l}  : (1, Wo*Cout)           f32   folded BN shift (broadcast over rows)
    wfc   : (11*8*C3, 128)         bf16  [fc_z1 | fc_z2], h K-concatenated, lane-padded
    bfc   : (1, 128)               f32
    out   : (NB, 128)              f32   [mu | sigma | zero-pad]

    Valid rows of each seg-row batch segment shrink 23->20->17->14->11; the tail
    rows (cross-batch "contamination") are never read.
    """
    nb = out_ref.shape[0]

    def conv_block(a, m_ref, b_ref):
        rows = a.shape[0] - 3                          # kernel height 4, stride 1
        a16 = a.astype(jnp.bfloat16)                   # cast once, then slice
        xk = jnp.concatenate([a16[kh:kh + rows, :] for kh in range(4)], axis=1)
        acc = jnp.dot(xk, m_ref[...], preferred_element_type=jnp.float32)
        if b_ref is not None:
            acc = acc + b_ref[...]                     # folded BN shift
        return jnp.where(acc >= 0.0, acc, 0.2 * acc)   # LeakyReLU(0.2), f32

    a = x_ref[...]                                     # (NB*seg, 128) f32
    a = conv_block(a, mc0, None)                       # conv0 has no BN / bias
    a = conv_block(a, mc1, b1)
    a = conv_block(a, mc2, b2)
    a = conv_block(a, mc3, b3)                         # h3 slab: rows n*seg+h valid, h<11

    rows = a.shape[0] - 10                             # 11 h-taps -> fc
    a16 = a.astype(jnp.bfloat16)
    xk = jnp.concatenate([a16[hh:hh + rows, :] for hh in range(11)], axis=1)
    r = jnp.dot(xk, wfc[...], preferred_element_type=jnp.float32) + bfc[...]
    for n in range(nb):                                # row n*seg = batch n's fc output
        out_ref[n:n + 1, :] = r[n * seg:n * seg + 1, :]


# ---------------------------------------------------------------------------
# One-time (host-side) weight preparation
# ---------------------------------------------------------------------------
def _expand_conv(weight_oihw, scale, w_in):
    """Banded matrices M_kh with
       M_kh[w*C_in + c, wo*C_out + co] = w[co, c, kh, kw] * scale[co],
       kw = w - 2*wo + 1 (stride 2, pad 1 along W), zero outside [0, 4)."""
    w = np.asarray(weight_oihw, np.float32) * np.asarray(scale, np.float32)[:, None, None, None]
    c_out, c_in, kh_sz, kw_sz = w.shape
    wo = w_in // 2
    w_idx = np.arange(w_in)[:, None]                          # (w_in, 1)
    wo_idx = np.arange(wo)[None, :]                           # (1, wo)
    kw = w_idx - 2 * wo_idx + 1                               # (w_in, wo)
    valid = ((kw >= 0) & (kw < kw_sz)).astype(np.float32)
    kw_c = np.clip(kw, 0, kw_sz - 1)
    mats = []
    for kh in range(kh_sz):
        wk = w[:, :, kh, :]                                   # (c_out, c_in, kw_sz)
        m4 = wk[:, :, kw_c] * valid[None, None, :, :]         # (c_out, c_in, w_in, wo)
        m4 = np.transpose(m4, (2, 1, 3, 0))                   # (w_in, c_in, wo, c_out)
        mats.append(m4.reshape(w_in * c_in, wo * c_out))
    return np.stack(mats)                                     # (4, w_in*c_in, wo*c_out)


def prepare_params(params, z_dim, df_dim, hidden_dim, seq_len):
    """Fold eval-mode BN, expand convs into K-concatenated banded GEMM matrices,
    merge + NCHW-permute + lane-pad the two fc heads."""
    eps = 1e-5

    def bn_fold(c):
        # Eval-mode BN with fresh running stats (mean=0, var=1, gamma=1, beta=0).
        # TODO(synk): training-mode BN (batch statistics) / trained running stats
        # are not reproduced here.
        gamma = np.ones(c, np.float32)
        beta = np.zeros(c, np.float32)
        mean = np.zeros(c, np.float32)
        var = np.ones(c, np.float32)
        scale = gamma / np.sqrt(var + eps)
        bias = beta - mean * scale
        return scale, bias

    prep = {"embedding": jnp.asarray(params["embedding"], jnp.float32)}

    w_in, h = hidden_dim, seq_len
    conv_ws = [params["conv0_w"], params["conv1_w"], params["conv2_w"], params["conv3_w"]]
    for l, wt in enumerate(conv_ws):
        c_out, c_in = int(wt.shape[0]), int(wt.shape[1])
        if l == 0:                                            # conv0: no BN, no bias
            scale = np.ones(c_out, np.float32)
            bias = np.zeros(c_out, np.float32)
        else:
            scale, bias = bn_fold(c_out)
        mats = _expand_conv(np.asarray(wt, np.float32), scale, w_in)
        wo = w_in // 2
        # K-concatenate the 4 kh taps along rows -> single-dot operand per layer.
        prep[f"mc{l}"] = jnp.asarray(mats.reshape(4 * w_in * c_in, wo * c_out), jnp.bfloat16)
        if l > 0:
            prep[f"b{l}"] = jnp.asarray(np.tile(bias, wo)[None, :], jnp.float32)
        w_in, h = wo, h - 3

    # Final spatial must be (11, 8) to match fc in_features = df_dim*8*11*8.
    assert (h, w_in) == (11, 8), (h, w_in)
    c3 = df_dim * 8
    two_z = 2 * z_dim
    w1 = np.asarray(params["fc_z1_w"], np.float32)            # (z, c3*11*8) NCHW flatten
    w2 = np.asarray(params["fc_z2_w"], np.float32)
    wcat = np.concatenate([w1, w2], axis=0).reshape(two_z, c3, h, w_in)     # (2z, c, ho, wo)
    # row index = ho*(wo*c3) + wo*c3_idx ... matches the kernel's (h outer,
    # lane = wo*C3 + co) K-concatenation order of the h3 slab.
    wfc = np.transpose(wcat, (2, 3, 1, 0)).reshape(h * w_in * c3, two_z)
    bfc = np.concatenate([np.asarray(params["fc_z1_b"], np.float32),
                          np.asarray(params["fc_z2_b"], np.float32)])[None, :]
    # Lane-pad the tiny 2*z_dim output dim to a multiple of 128 -> unmasked stores.
    out_lanes = max(128, ((two_z + 127) // 128) * 128)
    wfc_p = np.zeros((wfc.shape[0], out_lanes), np.float32)
    wfc_p[:, :two_z] = wfc
    bfc_p = np.zeros((1, out_lanes), np.float32)
    bfc_p[:, :two_z] = bfc
    prep["wfc"] = jnp.asarray(wfc_p, jnp.bfloat16)
    prep["bfc"] = jnp.asarray(bfc_p, jnp.float32)
    return prep


# ---------------------------------------------------------------------------
# Parameters (torch-like init) + forward + pure-JAX reference
# ---------------------------------------------------------------------------
def init_params(key, z_dim, c_dim, df_dim, hidden_dim):
    ks = jax.random.split(key, 9)
    in_feat = df_dim * 8 * 11 * 8
    bound = 1.0 / (in_feat ** 0.5)
    return {
        "embedding": jax.random.normal(ks[0], (25, hidden_dim), jnp.float32),
        "conv0_w": 0.02 * jax.random.normal(ks[1], (df_dim, c_dim, 4, 4), jnp.float32),
        "conv1_w": 0.02 * jax.random.normal(ks[2], (df_dim * 2, df_dim, 4, 4), jnp.float32),
        "conv2_w": 0.02 * jax.random.normal(ks[3], (df_dim * 4, df_dim * 2, 4, 4), jnp.float32),
        "conv3_w": 0.02 * jax.random.normal(ks[4], (df_dim * 8, df_dim * 4, 4, 4), jnp.float32),
        "fc_z1_w": jax.random.uniform(ks[5], (z_dim, in_feat), jnp.float32, -bound, bound),
        # Small fc biases so the correctness check remains sensitive to the conv path.
        "fc_z1_b": 1e-4 * jax.random.normal(ks[6], (z_dim,), jnp.float32),
        "fc_z2_w": jax.random.uniform(ks[7], (z_dim, in_feat), jnp.float32, -bound, bound),
        "fc_z2_b": 1e-4 * jax.random.normal(ks[8], (z_dim,), jnp.float32),
    }


def encoder_forward(prep, idx, *, z_dim, batch_block=8):
    # Embedding gather stays in XLA: its result is also a module output (input_e).
    emb = jnp.take(prep["embedding"], idx, axis=0)            # (N, 23, 128) f32
    input_e = emb[:, None, :, :]                              # NCHW, C=1 (returned)
    n, seq, hid = emb.shape
    out_lanes = prep["bfc"].shape[1]

    # Batch-block size: whole batch in one step if small, otherwise a multiple
    # of 8 so the (nb*seq, 128) / (nb, 128) blocks stay (8,128)-aligned.
    if n <= batch_block:
        nb, n_pad = n, n
    else:
        nb = max(8, (batch_block // 8) * 8)
        n_pad = ((n + nb - 1) // nb) * nb

    x2d = emb.reshape(n * seq, hid)                           # (N*23, 128)
    if n_pad != n:
        x2d = jnp.pad(x2d, ((0, (n_pad - n) * seq), (0, 0)))

    def full(arr):                                            # weights: constant block
        return pl.BlockSpec(arr.shape, lambda b: (0,) * arr.ndim)

    out = pl.pallas_call(
        functools.partial(_encoder_fused_kernel, seg=seq),
        out_shape=jax.ShapeDtypeStruct((n_pad, out_lanes), jnp.float32),
        grid=(n_pad // nb,),
        in_specs=[pl.BlockSpec((nb * seq, hid), lambda b: (b, 0)),
                  full(prep["mc0"]), full(prep["mc1"]),
                  full(prep["mc2"]), full(prep["mc3"]),
                  full(prep["b1"]), full(prep["b2"]), full(prep["b3"]),
                  full(prep["wfc"]), full(prep["bfc"])],
        out_specs=pl.BlockSpec((nb, out_lanes), lambda b: (b, 0)),
        compiler_params=pltpu.CompilerParams(
            dimension_semantics=("parallel",),
            vmem_limit_bytes=32 * 1024 * 1024),
    )(x2d, prep["mc0"], prep["mc1"], prep["mc2"], prep["mc3"],
      prep["b1"], prep["b2"], prep["b3"], prep["wfc"], prep["bfc"])

    return out[:n, :z_dim], out[:n, z_dim:2 * z_dim], input_e


def encoder_reference(params, idx):
    """Pure-JAX f32 reference (PyTorch eval() semantics with fresh BN stats)."""
    eps = 1e-5
    emb = jnp.take(params["embedding"], idx, axis=0)
    x = emb[:, None, :, :]

    def conv(h, w):
        return jax.lax.conv_general_dilated(
            h, w, window_strides=(1, 2), padding=((0, 0), (1, 1)),
            dimension_numbers=("NCHW", "OIHW", "NCHW"),
            precision=jax.lax.Precision.HIGHEST)

    def lrelu(h):
        return jnp.where(h > 0, h, 0.2 * h)

    h = lrelu(conv(x, params["conv0_w"]))
    for l in (1, 2, 3):
        h = conv(h, params[f"conv{l}_w"]) / jnp.sqrt(1.0 + eps)   # eval-mode BN
        h = lrelu(h)
    hf = h.reshape(h.shape[0], -1)
    hp = jax.lax.Precision.HIGHEST
    mu = jnp.dot(hf, params["fc_z1_w"].T, precision=hp) + params["fc_z1_b"]
    sigma = jnp.dot(hf, params["fc_z2_w"].T, precision=hp) + params["fc_z2_b"]
    return mu, sigma, x


# ---------------------------------------------------------------------------
if __name__ == "__main__":
    # Sizes forced by the module: hidden_dim=128, seq length 23, c_dim=1.
    z_dim, c_dim, df_dim, hidden_dim = 8, 1, 4, 128
    batch, seq_len = 2, 23

    key = jax.random.PRNGKey(0)
    pkey, dkey = jax.random.split(key)
    params = init_params(pkey, z_dim, c_dim, df_dim, hidden_dim)
    prep = prepare_params(params, z_dim, df_dim, hidden_dim, seq_len)   # one-time
    idx = jax.random.randint(dkey, (batch, seq_len), 0, 25, dtype=jnp.int32)

    fwd = jax.jit(lambda p, i: encoder_forward(p, i, z_dim=z_dim))
    mu, sigma, input_e = fwd(prep, idx)
    jax.block_until_ready((mu, sigma, input_e))

    assert mu.shape == (batch, z_dim)
    assert sigma.shape == (batch, z_dim)
    assert input_e.shape == (batch, 1, seq_len, hidden_dim)

    # Tolerance-asserted pure-JAX f32 reference (kernel matmuls are bf16 / f32 acc).
    ref = jax.jit(encoder_reference)
    mu_r, sigma_r, input_e_r = ref(params, idx)

    def _close(got, want):
        got = np.asarray(got, np.float32)
        want = np.asarray(want, np.float32)
        tol = 0.08 * float(np.max(np.abs(want))) + 1e-7
        err = float(np.max(np.abs(got - want)))
        assert err <= tol, (err, tol)

    _close(mu, mu_r)
    _close(sigma, sigma_r)
    np.testing.assert_allclose(np.asarray(input_e), np.asarray(input_e_r), atol=1e-6)

    # Also exercise the multi-step batch grid (nb=8, padded batch, 2 grid steps).
    idx_big = jax.random.randint(jax.random.PRNGKey(1), (10, seq_len), 0, 25,
                                 dtype=jnp.int32)
    mu_b, sigma_b, _ = fwd(prep, idx_big)
    jax.block_until_ready((mu_b, sigma_b))
    mu_br, sigma_br, _ = ref(params, idx_big)
    _close(mu_b, mu_br)
    _close(sigma_b, sigma_br)

    print("KERNEL_OK")
</pallas_src>

<mosaic_0001>
module attributes {stable_mosaic.version = 11 : i64} {
  func.func @_encoder_fused_kernel(%arg0: i32, %arg1: memref<46x128xf32, #tpu.memory_space<vmem>>, %arg2: memref<512x256xbf16, #tpu.memory_space<vmem>>, %arg3: memref<1024x256xbf16, #tpu.memory_space<vmem>>, %arg4: memref<1024x256xbf16, #tpu.memory_space<vmem>>, %arg5: memref<1024x256xbf16, #tpu.memory_space<vmem>>, %arg6: memref<1x256xf32, #tpu.memory_space<vmem>>, %arg7: memref<1x256xf32, #tpu.memory_space<vmem>>, %arg8: memref<1x256xf32, #tpu.memory_space<vmem>>, %arg9: memref<2816x128xbf16, #tpu.memory_space<vmem>>, %arg10: memref<1x128xf32, #tpu.memory_space<vmem>>, %arg11: memref<2x128xf32, #tpu.memory_space<vmem>>) attributes {dimension_semantics = [#tpu.dimension_semantics<parallel>], iteration_bounds = array<i64: 1>, scalar_prefetch = 0 : i64, scratch_operands = 0 : i64, tpu.core_type = #tpu.core_type<tc>, window_params = [{transform_indices = @transform_0, window_bounds = array<i64: 46, 128>}, {pipeline_mode = #tpu.pipeline_mode<synchronous>, transform_indices = @transform_1, window_bounds = array<i64: 512, 256>}, {pipeline_mode = #tpu.pipeline_mode<synchronous>, transform_indices = @transform_2, window_bounds = array<i64: 1024, 256>}, {pipeline_mode = #tpu.pipeline_mode<synchronous>, transform_indices = @transform_3, window_bounds = array<i64: 1024, 256>}, {pipeline_mode = #tpu.pipeline_mode<synchronous>, transform_indices = @transform_4, window_bounds = array<i64: 1024, 256>}, {pipeline_mode = #tpu.pipeline_mode<synchronous>, transform_indices = @transform_5, window_bounds = array<i64: 1, 256>}, {pipeline_mode = #tpu.pipeline_mode<synchronous>, transform_indices = @transform_6, window_bounds = array<i64: 1, 256>}, {pipeline_mode = #tpu.pipeline_mode<synchronous>, transform_indices = @transform_7, window_bounds = array<i64: 1, 256>}, {pipeline_mode = #tpu.pipeline_mode<synchronous>, transform_indices = @transform_8, window_bounds = array<i64: 2816, 128>}, {pipeline_mode = #tpu.pipeline_mode<synchronous>, transform_indices = @transform_9, window_bounds = array<i64: 1, 128>}, {transform_indices = @transform_10, window_bounds = array<i64: 2, 128>}]} {
    %c0 = arith.constant 0 : index
    %c0_0 = arith.constant 0 : index
    %0 = vector.load %arg1[%c0, %c0_0] : memref<46x128xf32, #tpu.memory_space<vmem>>, vector<46x128xf32>
    %1 = arith.truncf %0 : vector<46x128xf32> to vector<46x128xbf16>
    %2 = vector.extract_strided_slice %1 {offsets = [0, 0], sizes = [43, 128], strides = [1, 1]} : vector<46x128xbf16> to vector<43x128xbf16>
    %3 = vector.extract_strided_slice %1 {offsets = [1, 0], sizes = [43, 128], strides = [1, 1]} : vector<46x128xbf16> to vector<43x128xbf16>
    %4 = vector.extract_strided_slice %1 {offsets = [2, 0], sizes = [43, 128], strides = [1, 1]} : vector<46x128xbf16> to vector<43x128xbf16>
    %5 = vector.extract_strided_slice %1 {offsets = [3, 0], sizes = [43, 128], strides = [1, 1]} : vector<46x128xbf16> to vector<43x128xbf16>
    %6 = tpu.concatenate %2, %3, %4, %5 in 1 : vector<43x128xbf16>, vector<43x128xbf16>, vector<43x128xbf16>, vector<43x128xbf16> -> vector<43x512xbf16>
    %c0_1 = arith.constant 0 : index
    %c0_2 = arith.constant 0 : index
    %7 = vector.load %arg2[%c0_1, %c0_2] : memref<512x256xbf16, #tpu.memory_space<vmem>>, vector<512x256xbf16>
    %cst = arith.constant dense<0.000000e+00> : vector<43x256xf32>
    %8 = tpu.matmul %6, %7, %cst {dimension_numbers = #tpu.dot_dimension_numbers<[1], [0], [0], [1], [0, 0, 1, 1], [], []>} : vector<43x512xbf16>, vector<512x256xbf16>, vector<43x256xf32> -> vector<43x256xf32>
    %cst_3 = arith.constant 0.000000e+00 : f32
    %9 = vector.broadcast %cst_3 : f32 to vector<43x256xf32>
    %10 = arith.cmpf oge, %8, %9 : vector<43x256xf32>
    %cst_4 = arith.constant 2.000000e-01 : f32
    %11 = vector.broadcast %cst_4 : f32 to vector<43x256xf32>
    %12 = arith.mulf %11, %8 : vector<43x256xf32>
    %13 = arith.select %10, %8, %12 : vector<43x256xi1>, vector<43x256xf32>
    %14 = arith.truncf %13 : vector<43x256xf32> to vector<43x256xbf16>
    %15 = vector.extract_strided_slice %14 {offsets = [0, 0], sizes = [40, 256], strides = [1, 1]} : vector<43x256xbf16> to vector<40x256xbf16>
    %16 = vector.extract_strided_slice %14 {offsets = [1, 0], sizes = [40, 256], strides = [1, 1]} : vector<43x256xbf16> to vector<40x256xbf16>
    %17 = vector.extract_strided_slice %14 {offsets = [2, 0], sizes = [40, 256], strides = [1, 1]} : vector<43x256xbf16> to vector<40x256xbf16>
    %18 = vector.extract_strided_slice %14 {offsets = [3, 0], sizes = [40, 256], strides = [1, 1]} : vector<43x256xbf16> to vector<40x256xbf16>
    %19 = tpu.concatenate %15, %16, %17, %18 in 1 : vector<40x256xbf16>, vector<40x256xbf16>, vector<40x256xbf16>, vector<40x256xbf16> -> vector<40x1024xbf16>
    %c0_5 = arith.constant 0 : index
    %c0_6 = arith.constant 0 : index
    %20 = vector.load %arg3[%c0_5, %c0_6] : memref<1024x256xbf16, #tpu.memory_space<vmem>>, vector<1024x256xbf16>
    %cst_7 = arith.constant dense<0.000000e+00> : vector<40x256xf32>
    %21 = tpu.matmul %19, %20, %cst_7 {dimension_numbers = #tpu.dot_dimension_numbers<[1], [0], [0], [1], [0, 0, 1, 1], [], []>} : vector<40x1024xbf16>, vector<1024x256xbf16>, vector<40x256xf32> -> vector<40x256xf32>
    %c0_8 = arith.constant 0 : index
    %c0_9 = arith.constant 0 : index
    %22 = vector.load %arg6[%c0_8, %c0_9] : memref<1x256xf32, #tpu.memory_space<vmem>>, vector<1x256xf32>
    %23 = vector.broadcast %22 : vector<1x256xf32> to vector<40x256xf32>
    %24 = arith.addf %21, %23 : vector<40x256xf32>
    %cst_10 = arith.constant 0.000000e+00 : f32
    %25 = vector.broadcast %cst_10 : f32 to vector<40x256xf32>
    %26 = arith.cmpf oge, %24, %25 : vector<40x256xf32>
    %cst_11 = arith.constant 2.000000e-01 : f32
    %27 = vector.broadcast %cst_11 : f32 to vector<40x256xf32>
    %28 = arith.mulf %27, %24 : vector<40x256xf32>
    %29 = arith.select %26, %24, %28 : vector<40x256xi1>, vector<40x256xf32>
    %30 = arith.truncf %29 : vector<40x256xf32> to vector<40x256xbf16>
    %31 = vector.extract_strided_slice %30 {offsets = [0, 0], sizes = [37, 256], strides = [1, 1]} : vector<40x256xbf16> to vector<37x256xbf16>
    %32 = vector.extract_strided_slice %30 {offsets = [1, 0], sizes = [37, 256], strides = [1, 1]} : vector<40x256xbf16> to vector<37x256xbf16>
    %33 = vector.extract_strided_slice %30 {offsets = [2, 0], sizes = [37, 256], strides = [1, 1]} : vector<40x256xbf16> to vector<37x256xbf16>
    %34 = vector.extract_strided_slice %30 {offsets = [3, 0], sizes = [37, 256], strides = [1, 1]} : vector<40x256xbf16> to vector<37x256xbf16>
    %35 = tpu.concatenate %31, %32, %33, %34 in 1 : vector<37x256xbf16>, vector<37x256xbf16>, vector<37x256xbf16>, vector<37x256xbf16> -> vector<37x1024xbf16>
    %c0_12 = arith.constant 0 : index
    %c0_13 = arith.constant 0 : index
    %36 = vector.load %arg4[%c0_12, %c0_13] : memref<1024x256xbf16, #tpu.memory_space<vmem>>, vector<1024x256xbf16>
    %cst_14 = arith.constant dense<0.000000e+00> : vector<37x256xf32>
    %37 = tpu.matmul %35, %36, %cst_14 {dimension_numbers = #tpu.dot_dimension_numbers<[1], [0], [0], [1], [0, 0, 1, 1], [], []>} : vector<37x1024xbf16>, vector<1024x256xbf16>, vector<37x256xf32> -> vector<37x256xf32>
    %c0_15 = arith.constant 0 : index
    %c0_16 = arith.constant 0 : index
    %38 = vector.load %arg7[%c0_15, %c0_16] : memref<1x256xf32, #tpu.memory_space<vmem>>, vector<1x256xf32>
    %39 = vector.broadcast %38 : vector<1x256xf32> to vector<37x256xf32>
    %40 = arith.addf %37, %39 : vector<37x256xf32>
    %cst_17 = arith.constant 0.000000e+00 : f32
    %41 = vector.broadcast %cst_17 : f32 to vector<37x256xf32>
    %42 = arith.cmpf oge, %40, %41 : vector<37x256xf32>
    %cst_18 = arith.constant 2.000000e-01 : f32
    %43 = vector.broadcast %cst_18 : f32 to vector<37x256xf32>
    %44 = arith.mulf %43, %40 : vector<37x256xf32>
    %45 = arith.select %42, %40, %44 : vector<37x256xi1>, vector<37x256xf32>
    %46 = arith.truncf %45 : vector<37x256xf32> to vector<37x256xbf16>
    %47 = vector.extract_strided_slice %46 {offsets = [0, 0], sizes = [34, 256], strides = [1, 1]} : vector<37x256xbf16> to vector<34x256xbf16>
    %48 = vector.extract_strided_slice %46 {offsets = [1, 0], sizes = [34, 256], strides = [1, 1]} : vector<37x256xbf16> to vector<34x256xbf16>
    %49 = vector.extract_strided_slice %46 {offsets = [2, 0], sizes = [34, 256], strides = [1, 1]} : vector<37x256xbf16> to vector<34x256xbf16>
    %50 = vector.extract_strided_slice %46 {offsets = [3, 0], sizes = [34, 256], strides = [1, 1]} : vector<37x256xbf16> to vector<34x256xbf16>
    %51 = tpu.concatenate %47, %48, %49, %50 in 1 : vector<34x256xbf16>, vector<34x256xbf16>, vector<34x256xbf16>, vector<34x256xbf16> -> vector<34x1024xbf16>
    %c0_19 = arith.constant 0 : index
    %c0_20 = arith.constant 0 : index
    %52 = vector.load %arg5[%c0_19, %c0_20] : memref<1024x256xbf16, #tpu.memory_space<vmem>>, vector<1024x256xbf16>
    %cst_21 = arith.constant dense<0.000000e+00> : vector<34x256xf32>
    %53 = tpu.matmul %51, %52, %cst_21 {dimension_numbers = #tpu.dot_dimension_numbers<[1], [0], [0], [1], [0, 0, 1, 1], [], []>} : vector<34x1024xbf16>, vector<1024x256xbf16>, vector<34x256xf32> -> vector<34x256xf32>
    %c0_22 = arith.constant 0 : index
    %c0_23 = arith.constant 0 : index
    %54 = vector.load %arg8[%c0_22, %c0_23] : memref<1x256xf32, #tpu.memory_space<vmem>>, vector<1x256xf32>
    %55 = vector.broadcast %54 : vector<1x256xf32> to vector<34x256xf32>
    %56 = arith.addf %53, %55 : vector<34x256xf32>
    %cst_24 = arith.constant 0.000000e+00 : f32
    %57 = vector.broadcast %cst_24 : f32 to vector<34x256xf32>
    %58 = arith.cmpf oge, %56, %57 : vector<34x256xf32>
    %cst_25 = arith.constant 2.000000e-01 : f32
    %59 = vector.broadcast %cst_25 : f32 to vector<34x256xf32>
    %60 = arith.mulf %59, %56 : vector<34x256xf32>
    %61 = arith.select %58, %56, %60 : vector<34x256xi1>, vector<34x256xf32>
    %62 = arith.truncf %61 : vector<34x256xf32> to vector<34x256xbf16>
    %63 = vector.extract_strided_slice %62 {offsets = [0, 0], sizes = [24, 256], strides = [1, 1]} : vector<34x256xbf16> to vector<24x256xbf16>
    %64 = vector.extract_strided_slice %62 {offsets = [1, 0], sizes = [24, 256], strides = [1, 1]} : vector<34x256xbf16> to vector<24x256xbf16>
    %65 = vector.extract_strided_slice %62 {offsets = [2, 0], sizes = [24, 256], strides = [1, 1]} : vector<34x256xbf16> to vector<24x256xbf16>
    %66 = vector.extract_strided_slice %62 {offsets = [3, 0], sizes = [24, 256], strides = [1, 1]} : vector<34x256xbf16> to vector<24x256xbf16>
    %67 = vector.extract_strided_slice %62 {offsets = [4, 0], sizes = [24, 256], strides = [1, 1]} : vector<34x256xbf16> to vector<24x256xbf16>
    %68 = vector.extract_strided_slice %62 {offsets = [5, 0], sizes = [24, 256], strides = [1, 1]} : vector<34x256xbf16> to vector<24x256xbf16>
    %69 = vector.extract_strided_slice %62 {offsets = [6, 0], sizes = [24, 256], strides = [1, 1]} : vector<34x256xbf16> to vector<24x256xbf16>
    %70 = vector.extract_strided_slice %62 {offsets = [7, 0], sizes = [24, 256], strides = [1, 1]} : vector<34x256xbf16> to vector<24x256xbf16>
    %71 = vector.extract_strided_slice %62 {offsets = [8, 0], sizes = [24, 256], strides = [1, 1]} : vector<34x256xbf16> to vector<24x256xbf16>
    %72 = vector.extract_strided_slice %62 {offsets = [9, 0], sizes = [24, 256], strides = [1, 1]} : vector<34x256xbf16> to vector<24x256xbf16>
    %73 = vector.extract_strided_slice %62 {offsets = [10, 0], sizes = [24, 256], strides = [1, 1]} : vector<34x256xbf16> to vector<24x256xbf16>
    %74 = tpu.concatenate %63, %64, %65, %66, %67, %68, %69, %70, %71, %72, %73 in 1 : vector<24x256xbf16>, vector<24x256xbf16>, vector<24x256xbf16>, vector<24x256xbf16>, vector<24x256xbf16>, vector<24x256xbf16>, vector<24x256xbf16>, vector<24x256xbf16>, vector<24x256xbf16>, vector<24x256xbf16>, vector<24x256xbf16> -> vector<24x2816xbf16>
    %c0_26 = arith.constant 0 : index
    %c0_27 = arith.constant 0 : index
    %75 = vector.load %arg9[%c0_26, %c0_27] : memref<2816x128xbf16, #tpu.memory_space<vmem>>, vector<2816x128xbf16>
    %cst_28 = arith.constant dense<0.000000e+00> : vector<24x128xf32>
    %76 = tpu.matmul %74, %75, %cst_28 {dimension_numbers = #tpu.dot_dimension_numbers<[1], [0], [0], [1], [0, 0, 1, 1], [], []>} : vector<24x2816xbf16>, vector<2816x128xbf16>, vector<24x128xf32> -> vector<24x128xf32>
    %c0_29 = arith.constant 0 : index
    %c0_30 = arith.constant 0 : index
    %77 = vector.load %arg10[%c0_29, %c0_30] : memref<1x128xf32, #tpu.memory_space<vmem>>, vector<1x128xf32>
    %78 = vector.broadcast %77 : vector<1x128xf32> to vector<24x128xf32>
    %79 = arith.addf %76, %78 : vector<24x128xf32>
    %80 = vector.extract_strided_slice %79 {offsets = [0, 0], sizes = [1, 128], strides = [1, 1]} : vector<24x128xf32> to vector<1x128xf32>
    %c0_31 = arith.constant 0 : index
    %c0_32 = arith.constant 0 : index
    %81 = vector.load %arg11[%c0_31, %c0_32] : memref<2x128xf32, #tpu.memory_space<vmem>>, vector<1x128xf32>
    tpu.vector_store %arg11[%c0_31, %c0_32], %80 {strides = array<i32>} : memref<2x128xf32, #tpu.memory_space<vmem>>, vector<1x128xf32>,
    %82 = vector.extract_strided_slice %79 {offsets = [23, 0], sizes = [1, 128], strides = [1, 1]} : vector<24x128xf32> to vector<1x128xf32>
    %c1 = arith.constant 1 : index
    %c0_33 = arith.constant 0 : index
    %83 = vector.load %arg11[%c1, %c0_33] : memref<2x128xf32, #tpu.memory_space<vmem>>, vector<1x128xf32>
    tpu.vector_store %arg11[%c1, %c0_33], %82 {strides = array<i32>} : memref<2x128xf32, #tpu.memory_space<vmem>>, vector<1x128xf32>,
    return
  }
  func.func @transform_0(%arg0: i32) -> (i32, i32) {
    %c0_i32 = arith.constant 0 : i32
    %c0_i32_0 = arith.constant 0 : i32
    return %arg0, %c0_i32 : i32, i32
  }
  func.func @transform_1(%arg0: i32) -> (i32, i32) {
    %c0_i32 = arith.constant 0 : i32
    %c0_i32_0 = arith.constant 0 : i32
    %c0_i32_1 = arith.constant 0 : i32
    return %c0_i32, %c0_i32_0 : i32, i32
  }
  func.func @transform_2(%arg0: i32) -> (i32, i32) {
    %c0_i32 = arith.constant 0 : i32
    %c0_i32_0 = arith.constant 0 : i32
    %c0_i32_1 = arith.constant 0 : i32
    return %c0_i32, %c0_i32_0 : i32, i32
  }
  func.func @transform_3(%arg0: i32) -> (i32, i32) {
    %c0_i32 = arith.constant 0 : i32
    %c0_i32_0 = arith.constant 0 : i32
    %c0_i32_1 = arith.constant 0 : i32
    return %c0_i32, %c0_i32_0 : i32, i32
  }
  func.func @transform_4(%arg0: i32) -> (i32, i32) {
    %c0_i32 = arith.constant 0 : i32
    %c0_i32_0 = arith.constant 0 : i32
    %c0_i32_1 = arith.constant 0 : i32
    return %c0_i32, %c0_i32_0 : i32, i32
  }
  func.func @transform_5(%arg0: i32) -> (i32, i32) {
    %c0_i32 = arith.constant 0 : i32
    %c0_i32_0 = arith.constant 0 : i32
    %c0_i32_1 = arith.constant 0 : i32
    return %c0_i32, %c0_i32_0 : i32, i32
  }
  func.func @transform_6(%arg0: i32) -> (i32, i32) {
    %c0_i32 = arith.constant 0 : i32
    %c0_i32_0 = arith.constant 0 : i32
    %c0_i32_1 = arith.constant 0 : i32
    return %c0_i32, %c0_i32_0 : i32, i32
  }
  func.func @transform_7(%arg0: i32) -> (i32, i32) {
    %c0_i32 = arith.constant 0 : i32
    %c0_i32_0 = arith.constant 0 : i32
    %c0_i32_1 = arith.constant 0 : i32
    return %c0_i32, %c0_i32_0 : i32, i32
  }
  func.func @transform_8(%arg0: i32) -> (i32, i32) {
    %c0_i32 = arith.constant 0 : i32
    %c0_i32_0 = arith.constant 0 : i32
    %c0_i32_1 = arith.constant 0 : i32
    return %c0_i32, %c0_i32_0 : i32, i32
  }
  func.func @transform_9(%arg0: i32) -> (i32, i32) {
    %c0_i32 = arith.constant 0 : i32
    %c0_i32_0 = arith.constant 0 : i32
    %c0_i32_1 = arith.constant 0 : i32
    return %c0_i32, %c0_i32_0 : i32, i32
  }
  func.func @transform_10(%arg0: i32) -> (i32, i32) {
    %c0_i32 = arith.constant 0 : i32
    %c0_i32_0 = arith.constant 0 : i32
    return %arg0, %c0_i32 : i32, i32
  }
}

</mosaic_0001>

<bundles_post_ra>
// kernel: _lambda_.1
= control target key start
LH: loop header
LB: loop body
LE: loop exit
PB: predicated region body
PF: predicated region fallthrough
CT: control target
= control target key end

     0   :  { %15 = vsyncpa [#allocation3], 0  ;;  %s9137_s0 = inlined_call_operand.vmem [shape: f32[46,128], index: 0, kind: input, shape index: {}]   ;;  %s9138_s1 = inlined_call_operand.vmem [shape: bf16[512,256], index: 1, kind: input, shape index: {}]   ;;  %s9139_s2 = inlined_call_operand.hbm [shape: bf16[1024,256], index: 2, kind: input, shape index: {}]   ;;  %s9140_s3 = inlined_call_operand.hbm [shape: bf16[1024,256], index: 3, kind: input, shape index: {}]   ;;  %s9141_s4 = inlined_call_operand.hbm [shape: bf16[1024,256], index: 4, kind: input, shape index: {}]   ;;  %s9142_s5 = inlined_call_operand.vmem [shape: f32[1,256], index: 5, kind: input, shape index: {}]   ;;  %s9143_s6 = inlined_call_operand.vmem [shape: f32[1,256], index: 6, kind: input, shape index: {}]   ;;  %s9144_s7 = inlined_call_operand.vmem [shape: f32[1,256], index: 7, kind: input, shape index: {}]   ;;  %s9145_s8 = inlined_call_operand.hbm [shape: bf16[2816,128], index: 8, kind: input, shape index: {}]   ;;  %s9146_s9 = inlined_call_operand.vmem [shape: f32[1,128], index: 9, kind: input, shape index: {}]   ;;  %s9147_s10 = inlined_call_operand.vmem [shape: f32[2,128], index: 10, kind: output, shape index: {}]  }
   0x1   :  { %16 = vsyncpa [#allocation5], 0 }
   0x2   :  { %17 = vsyncpa [#allocation8], 0  ;;  %s8207_s13 = smov [#allocation4]   ;;  %s8208_s15 = smov [#allocation2]  }
   0x3   :  { %s39_s14 = sshll.u32 %s8207_s13, 4  ;;  %s27_s16 = sshll.u32 %s8208_s15, 4  ;;  %s40_s14 = int_to_ptr.vmem [resolvable:$true] %s39_s14  ;;  %s28_s16 = int_to_ptr.vmem [resolvable:$true] %s27_s16 }
   0x4   :  { %s8129_s17 = scalar_lea.vmem %s40_s14, 16384  ;;  %p8134_p1 = scmp.lt.s32.totalorder %s40_s14, %s40_s14 }
   0x5   :  { %p8130_p0 = scmp.ne.s32.totalorder %s40_s14, %s8129_s17  ;;  %p8135_p2 = scmp.lt.s32.totalorder %s8129_s17, %s8129_s17 }
   0x7   :  { %p8136_p3 = por %p8135_p2, %p8134_p1 }
   0x9   :  { %p8137_p4 = pnand %p8136_p3, %p8130_p0 }
   0xb   :  { %8140 = shalt.err (!%p8137_p4)
}
   0xc   :  { %s8209_s18 = smov 128   ;;  %s8210_s19 = smov 8  }
   0xd   :  { %45 = dma.hbm_to_vmem [thread:$0]  %s9140_s3, 16384, %s40_s14, [#allocation5], %s8209_s18, %s8209_s18, %s8210_s19  }
   0xe   :  { %s8149_s22 = scalar_lea.vmem %s28_s16, 16384  ;;  %p8154_p6 = scmp.lt.s32.totalorder %s28_s16, %s28_s16 }
   0xf   :  { %p8150_p5 = scmp.ne.s32.totalorder %s28_s16, %s8149_s22  ;;  %p8155_p7 = scmp.lt.s32.totalorder %s8149_s22, %s8149_s22 }
  0x11   :  { %p8156_p8 = por %p8155_p7, %p8154_p6 }
  0x13   :  { %p8157_p9 = pnand %p8156_p8, %p8150_p5 }
  0x15   :  { %8160 = shalt.err (!%p8157_p9)
}
  0x16   :  { %33 = dma.hbm_to_vmem [thread:$0]  %s9139_s2, 16384, %s28_s16, [#allocation3], %s8209_s18, %s8209_s18, %s8210_s19  }
  0x17   :  { %s8211_s25 = smov [#allocation6]   ;;  %s8212_s27 = smov [#allocation7]  }
  0x18   :  { %s51_s26 = sshll.u32 %s8211_s25, 4  ;;  %s69_s28 = sshll.u32 %s8212_s27, 4  ;;  %s52_s26 = int_to_ptr.vmem [resolvable:$true] %s51_s26  ;;  %s70_s28 = int_to_ptr.vmem [resolvable:$true] %s69_s28 }
  0x19   :  { %s8169_s29 = scalar_lea.vmem %s52_s26, 16384  ;;  %p8174_p11 = scmp.lt.s32.totalorder %s52_s26, %s52_s26 }
  0x1a   :  { %p8170_p10 = scmp.ne.s32.totalorder %s52_s26, %s8169_s29  ;;  %p8175_p12 = scmp.lt.s32.totalorder %s8169_s29, %s8169_s29 }
  0x1c   :  { %p8176_p13 = por %p8175_p12, %p8174_p11 }
  0x1e   :  { %p8177_p0 = pnand %p8176_p13, %p8170_p10 }
  0x20   :  { %8180 = shalt.err (!%p8177_p0)
}
  0x21   :  { %57 = dma.hbm_to_vmem [thread:$0]  %s9141_s4, 16384, %s52_s26, [#allocation5], %s8209_s18, %s8209_s18, %s8210_s19  }
  0x22   :  { %s8189_s11 = scalar_lea.vmem %s70_s28, 22528  ;;  %p8194_p2 = scmp.lt.s32.totalorder %s70_s28, %s70_s28 }
  0x23   :  { %p8190_p1 = scmp.ne.s32.totalorder %s70_s28, %s8189_s11  ;;  %p8195_p3 = scmp.lt.s32.totalorder %s8189_s11, %s8189_s11 }
  0x25   :  { %p8196_p4 = por %p8195_p3, %p8194_p2 }
  0x27   :  { %p8197_p5 = pnand %p8196_p4, %p8190_p1 }
  0x29   :  { %8200 = shalt.err (!%p8197_p5)
}
  0x2a   :  { %s8213_s2 = smov 64   ;;  %s8214_s12 = smov 4  }
  0x2b   :  { %75 = dma.hbm_to_vmem [thread:$0]  %s9145_s8, 22528, %s70_s28, [#allocation8], %s8213_s2, %s8213_s2, %s8214_s12  }
  0x2c   :  { %8201 = dma.done.wait [#allocation3], 16384  }
  0x2d   :  { %8202 = vsyncadd [#allocation3], 4294950912 }
  0x2e   :  { %8203 = dma.done.wait [#allocation5], 32768  }
  0x2f   :  { %8204 = vsyncadd [#allocation5], 4294934528 }
  0x30   :  { %8205 = dma.done.wait [#allocation8], 22528  }
  0x31   :  { %8206 = vsyncadd [#allocation8], 4294944768  ;;  %v7273_v0 = vld [vmem:[%s9138_s1 + $0x74] ss:$8 sps:$4 sm:$0xff]   ;;  %v7277_v2 = vld [vmem:[%s9138_s1 + $0x70] ss:$8 sps:$4 sm:$0xff]  }
  0x32   :  { %v7275_v1 = vld [vmem:[%s9138_s1 + $0x174] ss:$8 sps:$4 sm:$0xff]   ;;  %538 = vmatprep.subr.bf16.mxu0 %v7273_v0  ;;  %v7278_v3 = vld [vmem:[%s9138_s1 + $0x170] ss:$8 sps:$4 sm:$0xff]   ;;  %v7279_v4 = vld [vmem:[%s9138_s1 + $0x64] ss:$8 sps:$4 sm:$0xff]  }
  0x33   :  { %601 = vmatprep.subr.bf16.mxu1 %v7275_v1  ;;  %539 = vmatpush1.bf16.msra.mxu0 %v7277_v2  ;;  %v7281_v5 = vld [vmem:[%s9138_s1 + $0x164] ss:$8 sps:$4 sm:$0xff]   ;;  %v7283_v6 = vld [vmem:[%s9138_s1 + $0x60] ss:$8 sps:$4 sm:$0xff]   ;;  %v7285_v8 = vld [vmem:[%s9138_s1 + $0x54] ss:$8 sps:$4 sm:$0xff]  }
  0x34   :  { %602 = vmatpush1.bf16.msra.mxu1 %v7278_v3  ;;  %540 = vmatprep.subr.bf16.mxu0 %v7279_v4  ;;  %v7284_v7 = vld [vmem:[%s9138_s1 + $0x160] ss:$8 sps:$4 sm:$0xff]   ;;  %v7287_v9 = vld [vmem:[%s9138_s1 + $0x154] ss:$8 sps:$4 sm:$0xff]   ;;  %v7289_v10 = vld [vmem:[%s9138_s1 + $0x50] ss:$8 sps:$4 sm:$0xff]  }
  0x35   :  { %603 = vmatprep.subr.bf16.mxu1 %v7281_v5  ;;  %v7290_v11 = vld [vmem:[%s9138_s1 + $0x150] ss:$8 sps:$4 sm:$0xff]   ;;  %v7291_v12 = vld [vmem:[%s9138_s1 + $0x44] ss:$8 sps:$4 sm:$0xff]   ;;  %v7295_v14 = vld [vmem:[%s9138_s1 + $0x40] ss:$8 sps:$4 sm:$0xff]  }
  0x36   :  { %v7293_v13 = vld [vmem:[%s9138_s1 + $0x144] ss:$8 sps:$4 sm:$0xff]   ;;  %v7296_v15 = vld [vmem:[%s9138_s1 + $0x140] ss:$8 sps:$4 sm:$0xff]   ;;  %v7297_v16 = vld [vmem:[%s9138_s1 + $0x34] ss:$8 sps:$4 sm:$0xff]  }
  0x37   :  { %541 = vmatpush1.bf16.msra.mxu0 %v7283_v6  ;;  %v7299_v17 = vld [vmem:[%s9138_s1 + $0x134] ss:$8 sps:$4 sm:$0xff]   ;;  %v7301_v18 = vld [vmem:[%s9138_s1 + $0x30] ss:$8 sps:$4 sm:$0xff]   ;;  %v7303_v20 = vld [vmem:[%s9138_s1 + $0x24] ss:$8 sps:$4 sm:$0xff]  }
  0x38   :  { %604 = vmatpush1.bf16.msra.mxu1 %v7284_v7  ;;  %542 = vmatprep.subr.bf16.mxu0 %v7285_v8  ;;  %v7302_v19 = vld [vmem:[%s9138_s1 + $0x130] ss:$8 sps:$4 sm:$0xff]   ;;  %v7305_v21 = vld [vmem:[%s9138_s1 + $0x124] ss:$8 sps:$4 sm:$0xff]   ;;  %v7307_v22 = vld [vmem:[%s9138_s1 + $0x20] ss:$8 sps:$4 sm:$0xff]  }
  0x39   :  { %605 = vmatprep.subr.bf16.mxu1 %v7287_v9  ;;  %v7308_v23 = vld [vmem:[%s9138_s1 + $0x120] ss:$8 sps:$4 sm:$0xff]   ;;  %v7309_v24 = vld [vmem:[%s9138_s1 + $0x14] ss:$8 sps:$4 sm:$0xff]   ;;  %v7313_v26 = vld [vmem:[%s9138_s1 + $0x10] ss:$8 sps:$4 sm:$0xff]  }
  0x3a   :  { %v7311_v25 = vld [vmem:[%s9138_s1 + $0x114] ss:$8 sps:$4 sm:$0xff]   ;;  %v7314_v27 = vld [vmem:[%s9138_s1 + $0x110] ss:$8 sps:$4 sm:$0xff]   ;;  %v7315_v28 = vld [vmem:[%s9138_s1 + $0x4] ss:$8 sps:$4 sm:$0xff]  }
  0x3b   :  { %543 = vmatpush1.bf16.msra.mxu0 %v7289_v10  ;;  %v7317_v29 = vld [vmem:[%s9138_s1 + $0x104] ss:$8 sps:$4 sm:$0xff]   ;;  %v7319_v30 = vld [vmem:[%s9138_s1] ss:$8 sps:$4 sm:$0xff]   ;;  %v7321_v32 = vld [vmem:[%s9138_s1 + $0xf4] ss:$8 sps:$4 sm:$0xff]  }
  0x3c   :  { %606 = vmatpush1.bf16.msra.mxu1 %v7290_v11  ;;  %544 = vmatprep.subr.bf16.mxu0 %v7291_v12  ;;  %v7320_v31 = vld [vmem:[%s9138_s1 + $0x100] ss:$8 sps:$4 sm:$0xff]   ;;  %v7323_v33 = vld [vmem:[%s9138_s1 + $0x1f4] ss:$8 sps:$4 sm:$0xff]   ;;  %v7325_v34 = vld [vmem:[%s9138_s1 + $0xf0] ss:$8 sps:$4 sm:$0xff]  }
  0x3d   :  { %607 = vmatprep.subr.bf16.mxu1 %v7293_v13  ;;  %v7326_v35 = vld [vmem:[%s9138_s1 + $0x1f0] ss:$8 sps:$4 sm:$0xff]   ;;  %v7327_v36 = vld [vmem:[%s9138_s1 + $0xe4] ss:$8 sps:$4 sm:$0xff]   ;;  %v7331_v38 = vld [vmem:[%s9138_s1 + $0xe0] ss:$8 sps:$4 sm:$0xff]  }
  0x3e   :  { %v7329_v37 = vld [vmem:[%s9138_s1 + $0x1e4] ss:$8 sps:$4 sm:$0xff]   ;;  %v7332_v39 = vld [vmem:[%s9138_s1 + $0x1e0] ss:$8 sps:$4 sm:$0xff]   ;;  %v7333_v40 = vld [vmem:[%s9138_s1 + $0xd4] ss:$8 sps:$4 sm:$0xff]  }
  0x3f   :  { %545 = vmatpush1.bf16.msra.mxu0 %v7295_v14  ;;  %v7335_v41 = vld [vmem:[%s9138_s1 + $0x1d4] ss:$8 sps:$4 sm:$0xff]   ;;  %v7337_v42 = vld [vmem:[%s9138_s1 + $0xd0] ss:$8 sps:$4 sm:$0xff]   ;;  %v7339_v44 = vld [vmem:[%s9138_s1 + $0xc4] ss:$8 sps:$4 sm:$0xff]  }
  0x40   :  { %608 = vmatpush1.bf16.msra.mxu1 %v7296_v15  ;;  %546 = vmatprep.subr.bf16.mxu0 %v7297_v16  ;;  %v7338_v43 = vld [vmem:[%s9138_s1 + $0x1d0] ss:$8 sps:$4 sm:$0xff]   ;;  %v7341_v45 = vld [vmem:[%s9138_s1 + $0x1c4] ss:$8 sps:$4 sm:$0xff]   ;;  %v7343_v46 = vld [vmem:[%s9138_s1 + $0xc0] ss:$8 sps:$4 sm:$0xff]  }
  0x41   :  { %609 = vmatprep.subr.bf16.mxu1 %v7299_v17  ;;  %v7344_v47 = vld [vmem:[%s9138_s1 + $0x1c0] ss:$8 sps:$4 sm:$0xff]   ;;  %v93_v50 = vld [vmem:[%s9137_s0 + $0x10] sm:$0xff]  ;;  %v94_v51 = vld [vmem:[%s9137_s0 + $0x18] sm:$0xff]  ;;  %vm100_vm0 = vsmask.f32 7424 }
  0x42   :  { %v91_v48 = vld [vmem:[%s9137_s0] sm:$0xff]  ;;  %v92_v49 = vld [vmem:[%s9137_s0 + $0x8] sm:$0xff]  ;;  %v7345_v52 = vld [vmem:[%s9138_s1 + $0xb4] ss:$8 sps:$4 sm:$0xff]   ;;  %v8446_v55 = vpack.c.bf16 %v94_v51, %v93_v50  ;;  %vm139_vm1 = vsmask.f32 6400 }
  0x43   :  { %547 = vmatpush1.bf16.msra.mxu0 %v7301_v18  ;;  %v7347_v53 = vld [vmem:[%s9138_s1 + $0x1b4] ss:$8 sps:$4 sm:$0xff]   ;;  %v8444_v54 = vpack.c.bf16 %v92_v49, %v91_v48  ;;  %v95_v56 = vld [vmem:[%s9137_s0 + $0x20] sm:$0xff]  ;;  %v96_v57 = vld [vmem:[%s9137_s0 + $0x28] sm:$0x3f]  ;;  %vm130_vm2 = vcmask 1046528  }
  0x44   :  { %610 = vmatpush1.bf16.msra.mxu1 %v7302_v19  ;;  %548 = vmatprep.subr.bf16.mxu0 %v7303_v20  ;;  %v109_v60 = vshll.u32 %v8446_v55, 16  ;;  %v113_v61 = vshrl.u32 %v8446_v55, 16  ;;  %v7349_v62 = vld [vmem:[%s9138_s1 + $0xb0] ss:$8 sps:$4 sm:$0xff]   ;;  %v7351_v0 = vld [vmem:[%s9138_s1 + $0xa4] ss:$8 sps:$4 sm:$0xff]   ;;  %v8470_v8 = vpack.c.bf16 %v96_v57, %v95_v56 }
  0x45   :  { %611 = vmatprep.subr.bf16.mxu1 %v7305_v21  ;;  %v102_v58 = vshrl.u32 %v8444_v54, 16  ;;  %v104_v59 = vshll.u32 %v8444_v54, 16  ;;  %v7350_v63 = vld [vmem:[%s9138_s1 + $0x1b0] ss:$8 sps:$4 sm:$0xff]   ;;  %v7353_v1 = vld [vmem:[%s9138_s1 + $0x1a4] ss:$8 sps:$4 sm:$0xff]  }
  0x46   :  { %v111_v3 = vrot.slane %v109_v60, 1  ;;  %v143_v6 = vrot.slane %v113_v61, 1  ;;  %v144_v7 = vrot.slane %v109_v60, 2  ;;  %v7355_v11 = vld [vmem:[%s9138_s1 + $0xa0] ss:$8 sps:$4 sm:$0xff]   ;;  %v117_v18 = vshll.u32 %v8470_v8, 16 }
  0x47   :  { %549 = vmatpush1.bf16.msra.mxu0 %v7307_v22  ;;  %v106_v2 = vrot.slane %v104_v59, 1  ;;  %v140_v4 = vrot.slane %v102_v58, 1  ;;  %v141_v5 = vrot.slane %v104_v59, 2  ;;  %v7356_v12 = vld [vmem:[%s9138_s1 + $0x1a0] ss:$8 sps:$4 sm:$0xff]   ;;  %v121_v19 = vshrl.u32 %v8470_v8, 16 }
  0x48   :  { %612 = vmatpush1.bf16.msra.mxu1 %v7308_v23  ;;  %550 = vmatprep.subr.bf16.mxu0 %v7309_v24  ;;  %v145_v13 = vor.u32 %v144_v7, %v143_v6  ;;  %v7357_v14 = vld [vmem:[%s9138_s1 + $0x94] ss:$8 sps:$4 sm:$0xff]   ;;  %v7361_v20 = vld [vmem:[%s9138_s1 + $0x90] ss:$8 sps:$4 sm:$0xff]   ;;  %v7363_v22 = vld [vmem:[%s9138_s1 + $0x84] ss:$8 sps:$4 sm:$0xff]  }
  0x49   :  { %613 = vmatprep.subr.bf16.mxu1 %v7311_v25  ;;  %v107_v9 = vor.u32 %v106_v2, %v102_v58  ;;  %v142_v10 = vor.u32 %v141_v5, %v140_v4  ;;  %v7359_v16 = vld [vmem:[%s9138_s1 + $0x194] ss:$8 sps:$4 sm:$0xff]   ;;  %v7362_v21 = vld [vmem:[%s9138_s1 + $0x190] ss:$8 sps:$4 sm:$0xff]   ;;  %v7365_v23 = vld [vmem:[%s9138_s1 + $0x184] ss:$8 sps:$4 sm:$0xff]  }
  0x4a   :  { %v147_v24 = vrot.slane %v121_v19, 1  ;;  %v148_v25 = vrot.slane %v117_v18, 2  ;;  %v7375_v49 = vld [vmem:[#allocation2 + $0x50] ss:$8 sps:$4 sm:$0xff]   ;;  %v7380_v51 = vld [vmem:[#allocation2 + $0x44] ss:$8 sps:$4 sm:$0xff]  }
  0x4b   :  { %551 = vmatpush1.bf16.msra.mxu0 %v7313_v26  ;;  %v112_v15 = vsel %vm100_vm0, %v107_v9, %v111_v3  ;;  %v146_v17 = vsel %vm139_vm1, %v142_v10, %v145_v13  ;;  %v7367_v26 = vld [vmem:[%s9138_s1 + $0x80] ss:$8 sps:$4 sm:$0xff]   ;;  %v7393_v50 = vld [vmem:[#allocation2 + $0x150] ss:$8 sps:$4 sm:$0xff]   ;;  %v7407_v57 = vld [vmem:[#allocation2 + $0x134] ss:$8 sps:$4 sm:$0xff]  }
  0x4c   :  { %614 = vmatpush1.bf16.msra.mxu1 %v7314_v27  ;;  %552 = vmatprep.subr.bf16.mxu0 %v7315_v28  ;;  %v7368_v27 = vld [vmem:[%s9138_s1 + $0x180] ss:$8 sps:$4 sm:$0xff]   ;;  %v131_v28 = vrot.slane %v8444_v54, 1  ;;  %v7384_v58 = vld [vmem:[#allocation2 + $0x30] ss:$8 sps:$4 sm:$0xff]  }
  0x4d   :  { %615 = vmatprep.subr.bf16.mxu1 %v7317_v29  ;;  %570 = vmatprep.mubr.bf16.mxu0 %v112_v15  ;;  %v132_v29 = vrot.slane %v8446_v55, 1  ;;  %v7399_v56 = vld [vmem:[#allocation2 + $0x140] ss:$8 sps:$4 sm:$0xff]   ;;  %v7405_v59 = vld [vmem:[#allocation2 + $0x130] ss:$8 sps:$4 sm:$0xff]  }
  0x4e   :  { %633 = vmatprep.mubr.bf16.mxu1 %v146_v17  ;;  %v7392_v60 = vld [vmem:[#allocation2 + $0x24] ss:$8 sps:$4 sm:$0xff]   ;;  %v7417_v2 = vld [vmem:[#allocation2 + $0x110] ss:$8 sps:$4 sm:$0xff]   ;;  %v7402_v5 = vld [vmem:[#allocation2] ss:$8 sps:$4 sm:$0xff]  }
  0x4f   :  { %553 = vmatpush1.bf16.msra.mxu0 %v7319_v30  ;;  %v7371_v30 = vld [vmem:[#allocation2 + $0x74] ss:$8 sps:$4 sm:$0xff]   ;;  %v7425_v4 = vld [vmem:[#allocation2 + $0x104] ss:$8 sps:$4 sm:$0xff]   ;;  %v7423_v6 = vld [vmem:[#allocation2 + $0x100] ss:$8 sps:$4 sm:$0xff]  }
  0x50   :  { %616 = vmatpush1.bf16.msra.mxu1 %v7320_v31  ;;  %554 = vmatprep.subr.bf16.mxu0 %v7321_v32  ;;  %v115_v31 = vor.u32 %v113_v61, %v111_v3  ;;  %v119_v32 = vrot.slane %v117_v18, 1  ;;  %v7413_v61 = vld [vmem:[#allocation2 + $0x124] ss:$8 sps:$4 sm:$0xff]   ;;  %v7410_v7 = vld [vmem:[#allocation2 + $0xf4] ss:$8 sps:$4 sm:$0xff]  }
  0x51   :  { %617 = vmatprep.subr.bf16.mxu1 %v7323_v33  ;;  %v149_v33 = vor.u32 %v148_v25, %v147_v24  ;;  %v7404_v3 = vld [vmem:[#allocation2 + $0x4] ss:$8 sps:$4 sm:$0xff]   ;;  %v7408_v9 = vld [vmem:[#allocation2 + $0xf0] ss:$8 sps:$4 sm:$0xff]   ;;  %v7422_v15 = vld [vmem:[#allocation2 + $0xd4] ss:$8 sps:$4 sm:$0xff]  }
  0x52   :  { %v123_v48 = vor.u32 %v121_v19, %v119_v32  ;;  %v7429_v10 = vld [vmem:[#allocation2 + $0x1f0] ss:$8 sps:$4 sm:$0xff]   ;;  %v7428_v17 = vld [vmem:[#allocation2 + $0xc4] ss:$8 sps:$4 sm:$0xff]   ;;  %v7426_v18 = vld [vmem:[#allocation2 + $0xc0] ss:$8 sps:$4 sm:$0xff]  }
  0x53   :  { %555 = vmatpush2.bf16.msra.mxu0 %v7325_v34  ;;  %v7383_v34 = vld [vmem:[#allocation2 + $0x174] ss:$8 sps:$4 sm:$0xff]   ;;  %v7441_v24 = vld [vmem:[#allocation2 + $0x1d0] ss:$8 sps:$4 sm:$0xff]  }
  0x54   :  { %618 = vmatpush2.bf16.msra.mxu1 %v7326_v35  ;;  %556 = vmatprep.subr.bf16.mxu0 %v7327_v36  ;;  %v133_v35 = vsel %vm130_vm2, %v131_v28, %v132_v29  ;;  %v7369_v36 = vld [vmem:[#allocation2 + $0x70] ss:$8 sps:$4 sm:$0xff]   ;;  %v7434_v19 = vld [vmem:[#allocation2 + $0xb4] ss:$8 sps:$4 sm:$0xff]   ;;  %v7447_v28 = vld [vmem:[#allocation2 + $0x1c0] ss:$8 sps:$4 sm:$0xff]  }
  0x55   :  { %619 = vmatprep.subr.bf16.mxu1 %v7329_v37  ;;  %v120_v37 = vsel %vm100_vm0, %v115_v31, %v119_v32  ;;  %v7446_v25 = vld [vmem:[#allocation2 + $0x94] ss:$8 sps:$4 sm:$0xff]   ;;  %v7453_v32 = vld [vmem:[#allocation2 + $0x1b0] ss:$8 sps:$4 sm:$0xff]  }
  0x56   :  { %v7455_v31 = vld [vmem:[#allocation2 + $0x1b4] ss:$8 sps:$4 sm:$0xff]  }
  0x57   :  { %557 = vmatpush2.bf16.msra.mxu0 %v7331_v38  ;;  %v150_v38 = vsel %vm139_vm1, %v145_v13, %v149_v33  ;;  %v7414_v13 = vld [vmem:[#allocation2 + $0xe0] ss:$8 sps:$4 sm:$0xff]  }
  0x58   :  { %620 = vmatpush2.bf16.msra.mxu1 %v7332_v39  ;;  %558 = vmatprep.subr.bf16.mxu0 %v7333_v40  ;;  %v7381_v39 = vld [vmem:[#allocation2 + $0x170] ss:$8 sps:$4 sm:$0xff]   ;;  %v7374_v40 = vld [vmem:[#allocation2 + $0x64] ss:$8 sps:$4 sm:$0xff]  }
  0x59   :  { %621 = vmatprep.subr.bf16.mxu1 %v7335_v41  ;;  %v7389_v41 = vld [vmem:[#allocation2 + $0x164] ss:$8 sps:$4 sm:$0xff]  }
  0x5b   :  { %559 = vmatpush2.bf16.msra.mxu0 %v7337_v42  ;;  %v134_v42 = vrot.slane %v8470_v8, 1 }
  0x5c   :  { %622 = vmatpush2.bf16.msra.mxu1 %v7338_v43  ;;  %560 = vmatprep.subr.bf16.mxu0 %v7339_v44  ;;  %v7372_v43 = vld [vmem:[#allocation2 + $0x60] ss:$8 sps:$4 sm:$0xff]  }
  0x5d   :  { %623 = vmatprep.subr.bf16.mxu1 %v7341_v45  ;;  %v7387_v44 = vld [vmem:[#allocation2 + $0x160] ss:$8 sps:$4 sm:$0xff]   ;;  %v7377_v45 = vld [vmem:[#allocation2 + $0x54] ss:$8 sps:$4 sm:$0xff]  }
  0x5f   :  { %561 = vmatpush2.bf16.msra.mxu0 %v7343_v46  ;;  %v7395_v46 = vld [vmem:[#allocation2 + $0x154] ss:$8 sps:$4 sm:$0xff]  }
  0x60   :  { %624 = vmatpush2.bf16.msra.mxu1 %v7344_v47  ;;  %562 = vmatprep.subr.bf16.mxu0 %v7345_v52  ;;  %v135_v47 = vsel %vm130_vm2, %v132_v29, %v134_v42  ;;  %v7401_v52 = vld [vmem:[#allocation2 + $0x144] ss:$8 sps:$4 sm:$0xff]  }
  0x61   :  { %625 = vmatprep.subr.bf16.mxu1 %v7347_v53  ;;  %v7378_v53 = vld [vmem:[#allocation2 + $0x40] ss:$8 sps:$4 sm:$0xff]   ;;  %v7452_v29 = vld [vmem:[#allocation2 + $0x84] ss:$8 sps:$4 sm:$0xff]  }
  0x63   :  { %563 = vmatpush2.bf16.msra.mxu0 %v7349_v62  ;;  %v7411_v62 = vld [vmem:[#allocation2 + $0x120] ss:$8 sps:$4 sm:$0xff]  }
  0x64   :  { %626 = vmatpush2.bf16.msra.mxu1 %v7350_v63  ;;  %564 = vmatprep.subr.bf16.mxu0 %v7351_v0  ;;  %v7398_v63 = vld [vmem:[#allocation2 + $0x14] ss:$8 sps:$4 sm:$0xff]  }
  0x65   :  { %627 = vmatprep.subr.bf16.mxu1 %v7353_v1  ;;  %v7419_v0 = vld [vmem:[#allocation2 + $0x114] ss:$8 sps:$4 sm:$0xff]   ;;  %v7396_v1 = vld [vmem:[#allocation2 + $0x10] ss:$8 sps:$4 sm:$0xff]  }
  0x67   :  { %565 = vmatpush2.bf16.msra.mxu0 %v7355_v11  ;;  %v7416_v11 = vld [vmem:[#allocation2 + $0xe4] ss:$8 sps:$4 sm:$0xff]  }
  0x68   :  { %628 = vmatpush2.bf16.msra.mxu1 %v7356_v12  ;;  %566 = vmatprep.subr.bf16.mxu0 %v7357_v14  ;;  %v7437_v12 = vld [vmem:[#allocation2 + $0x1e4] ss:$8 sps:$4 sm:$0xff]   ;;  %v7435_v14 = vld [vmem:[#allocation2 + $0x1e0] ss:$8 sps:$4 sm:$0xff]  }
  0x69   :  { %629 = vmatprep.subr.bf16.mxu1 %v7359_v16  ;;  %v7420_v16 = vld [vmem:[#allocation2 + $0xd0] ss:$8 sps:$4 sm:$0xff]  }
  0x6b   :  { %567 = vmatpush2.bf16.msra.mxu0 %v7361_v20  ;;  %v7432_v20 = vld [vmem:[#allocation2 + $0xb0] ss:$8 sps:$4 sm:$0xff]  }
  0x6c   :  { %630 = vmatpush2.bf16.msra.mxu1 %v7362_v21  ;;  %568 = vmatprep.subr.bf16.mxu0 %v7363_v22  ;;  %v7440_v21 = vld [vmem:[#allocation2 + $0xa4] ss:$8 sps:$4 sm:$0xff]   ;;  %v7438_v22 = vld [vmem:[#allocation2 + $0xa0] ss:$8 sps:$4 sm:$0xff]  }
  0x6d   :  { %631 = vmatprep.subr.bf16.mxu1 %v7365_v23  ;;  %v7443_v23 = vld [vmem:[#allocation2 + $0x1d4] ss:$8 sps:$4 sm:$0xff]  }
  0x6f   :  { %569 = vmatpush2.bf16.msra.mxu0 %v7367_v26  ;;  %v7444_v26 = vld [vmem:[#allocation2 + $0x90] ss:$8 sps:$4 sm:$0xff]  }
  0x70   :  { %632 = vmatpush2.bf16.msra.mxu1 %v7368_v27  ;;  %1588 = vmatprep.subr.bf16.mxu0 %v7371_v30  ;;  %v7449_v27 = vld [vmem:[#allocation2 + $0x1c4] ss:$8 sps:$4 sm:$0xff]   ;;  %v7450_v30 = vld [vmem:[#allocation2 + $0x80] ss:$8 sps:$4 sm:$0xff]  }
  0x71   :  { %1649 = vmatprep.subr.bf16.mxu1 %v7383_v34  ;;  %v7461_v34 = vld [vmem:[#allocation2 + $0x1a4] ss:$8 sps:$4 sm:$0xff]  }
  0x72   :  { %571 = vmatmul.mubr.bf16.vlgmr.msra.gmra.mxu0 %v8444_v54  ;;  %v7386_v54 = vld [vmem:[#allocation2 + $0x34] ss:$8 sps:$4 sm:$0xff]  }
  0x73   :  { %634 = vmatmul.mubr.bf16.vlgmr.msra.gmra.mxu1 %v133_v35  ;;  %580 = vmatprep.mubr.bf16.mxu0 %v120_v37  ;;  %v7459_v35 = vld [vmem:[#allocation2 + $0x1a0] ss:$8 sps:$4 sm:$0xff]   ;;  %v7465_v37 = vld [vmem:[#allocation2 + $0x190] ss:$8 sps:$4 sm:$0xff]  }
  0x74   :  { %643 = vmatprep.mubr.bf16.mxu1 %v150_v38  ;;  %1589 = vmatpush1.bf16.msra.mxu0 %v7369_v36  ;;  %v7467_v36 = vld [vmem:[#allocation2 + $0x194] ss:$8 sps:$4 sm:$0xff]   ;;  %v7473_v38 = vld [vmem:[#allocation2 + $0x184] ss:$8 sps:$4 sm:$0xff]  }
  0x75   :  { %1650 = vmatpush1.bf16.msra.mxu1 %v7381_v39  ;;  %1590 = vmatprep.subr.bf16.mxu0 %v7374_v40  ;;  %v7471_v39 = vld [vmem:[#allocation2 + $0x180] ss:$8 sps:$4 sm:$0xff]   ;;  %v7479_v40 = vld [vmem:[#allocation2 + $0x374] ss:$8 sps:$4 sm:$0xff]  }
  0x76   :  { %1651 = vmatprep.subr.bf16.mxu1 %v7389_v41 }
  0x78   :  { %1591 = vmatpush1.bf16.msra.mxu0 %v7372_v43 }
  0x79   :  { %1652 = vmatpush1.bf16.msra.mxu1 %v7387_v44  ;;  %1592 = vmatprep.subr.bf16.mxu0 %v7377_v45 }
  0x7a   :  { %1653 = vmatprep.subr.bf16.mxu1 %v7395_v46  ;;  %581 = vmatmul.mubr.bf16.gmra.mxu0 %v8446_v55  ;;  %v7390_v55 = vld [vmem:[#allocation2 + $0x20] ss:$8 sps:$4 sm:$0xff]  }
  0x7b   :  { %644 = vmatmul.mubr.bf16.gmra.mxu1 %v135_v47  ;;  %590 = vmatprep.mubr.bf16.mxu0 %v123_v48 }
  0x7c   :  { %653 = vmatprep.mubr.bf16.mxu1 %v149_v33  ;;  %1593 = vmatpush1.bf16.msra.mxu0 %v7375_v49  ;;  %v7458_v33 = vld [vmem:[#allocation2 + $0x274] ss:$8 sps:$4 sm:$0xff]  }
  0x7d   :  { %1654 = vmatpush1.bf16.msra.mxu1 %v7393_v50  ;;  %1594 = vmatprep.subr.bf16.mxu0 %v7380_v51 }
  0x7e   :  { %1655 = vmatprep.subr.bf16.mxu1 %v7401_v52 }
  0x80   :  { %1595 = vmatpush1.bf16.msra.mxu0 %v7378_v53 }
  0x81   :  { %1656 = vmatpush1.bf16.msra.mxu1 %v7399_v56  ;;  %1596 = vmatprep.subr.bf16.mxu0 %v7386_v54 }
  0x82   :  { %1657 = vmatprep.subr.bf16.mxu1 %v7407_v57  ;;  %591 = vmatmul.mubr.bf16.gmra.mxu0 %v8470_v8  ;;  %v7431_v8 = vld [vmem:[#allocation2 + $0x1f4] ss:$8 sps:$4 sm:$0xff]  }
  0x83   :  { %654 = vmatmul.mubr.bf16.gmra.mxu1 %v134_v42 }
  0x84   :  { %1597 = vmatpush1.bf16.msra.mxu0 %v7384_v58 }
  0x85   :  { %1658 = vmatpush1.bf16.msra.mxu1 %v7405_v59  ;;  %1598 = vmatprep.subr.bf16.mxu0 %v7392_v60 }
  0x86   :  { %1659 = vmatprep.subr.bf16.mxu1 %v7413_v61 }
  0x88   :  { %1599 = vmatpush1.bf16.msra.mxu0 %v7390_v55 }
  0x89   :  { %1660 = vmatpush1.bf16.msra.mxu1 %v7411_v62  ;;  %1600 = vmatprep.subr.bf16.mxu0 %v7398_v63 }
  0x8a   :  { %1661 = vmatprep.subr.bf16.mxu1 %v7419_v0 }
  0x8c   :  { %1601 = vmatpush1.bf16.msra.mxu0 %v7396_v1 }
  0x8d   :  { %1662 = vmatpush1.bf16.msra.mxu1 %v7417_v2  ;;  %1602 = vmatprep.subr.bf16.mxu0 %v7404_v3 }
  0x8e   :  { %1663 = vmatprep.subr.bf16.mxu1 %v7425_v4 }
  0x90   :  { %1603 = vmatpush1.bf16.msra.mxu0 %v7402_v5 }
  0x91   :  { %1664 = vmatpush1.bf16.msra.mxu1 %v7423_v6  ;;  %1604 = vmatprep.subr.bf16.mxu0 %v7410_v7 }
  0x92   :  { %1665 = vmatprep.subr.bf16.mxu1 %v7431_v8  ;;  %v7456_v8 = vld [vmem:[#allocation2 + $0x270] ss:$8 sps:$4 sm:$0xff]  }
  0x94   :  { %1605 = vmatpush2.bf16.msra.mxu0 %v7408_v9 }
  0x95   :  { %1666 = vmatpush2.bf16.msra.mxu1 %v7429_v10  ;;  %1606 = vmatprep.subr.bf16.mxu0 %v7416_v11  ;;  %v7464_v10 = vld [vmem:[#allocation2 + $0x264] ss:$8 sps:$4 sm:$0xff]  }
  0x96   :  { %1667 = vmatprep.subr.bf16.mxu1 %v7437_v12 }
  0x98   :  { %1607 = vmatpush2.bf16.msra.mxu0 %v7414_v13 }
  0x99   :  { %1668 = vmatpush2.bf16.msra.mxu1 %v7435_v14  ;;  %1608 = vmatprep.subr.bf16.mxu0 %v7422_v15  ;;  %v7462_v14 = vld [vmem:[#allocation2 + $0x260] ss:$8 sps:$4 sm:$0xff]  }
  0x9a   :  { %1669 = vmatprep.subr.bf16.mxu1 %v7443_v23 }
  0x9c   :  { %1609 = vmatpush2.bf16.msra.mxu0 %v7420_v16 }
  0x9d   :  { %1610 = vmatprep.subr.bf16.mxu0 %v7428_v17  ;;  %1670 = vmatpush2.bf16.msra.mxu1 %v7441_v24  ;;  %v7470_v17 = vld [vmem:[#allocation2 + $0x254] ss:$8 sps:$4 sm:$0xff]  }
  0x9e   :  { %1671 = vmatprep.subr.bf16.mxu1 %v7449_v27 }
  0xa0   :  { %1611 = vmatpush2.bf16.msra.mxu0 %v7426_v18 }
  0xa1   :  { %1612 = vmatprep.subr.bf16.mxu0 %v7434_v19  ;;  %1672 = vmatpush2.bf16.msra.mxu1 %v7447_v28 }
  0xa2   :  { %1673 = vmatprep.subr.bf16.mxu1 %v7455_v31  ;;  %v7468_v31 = vld [vmem:[#allocation2 + $0x250] ss:$8 sps:$4 sm:$0xff]  }
  0xa4   :  { %1613 = vmatpush2.bf16.msra.mxu0 %v7432_v20 }
  0xa5   :  { %1614 = vmatprep.subr.bf16.mxu0 %v7440_v21  ;;  %1674 = vmatpush2.bf16.msra.mxu1 %v7453_v32 }
  0xa6   :  { %1675 = vmatprep.subr.bf16.mxu1 %v7461_v34 }
  0xa8   :  { %1615 = vmatpush2.bf16.msra.mxu0 %v7438_v22 }
  0xa9   :  { %1616 = vmatprep.subr.bf16.mxu0 %v7446_v25  ;;  %1676 = vmatpush2.bf16.msra.mxu1 %v7459_v35 }
  0xaa   :  { %1677 = vmatprep.subr.bf16.mxu1 %v7467_v36 }
  0xac   :  { %1617 = vmatpush2.bf16.msra.mxu0 %v7444_v26 }
  0xad   :  { %1618 = vmatprep.subr.bf16.mxu0 %v7452_v29  ;;  %1678 = vmatpush2.bf16.msra.mxu1 %v7465_v37  ;;  %v7476_v37 = vld [vmem:[#allocation2 + $0x244] ss:$8 sps:$4 sm:$0xff]  }
  0xae   :  { %1679 = vmatprep.subr.bf16.mxu1 %v7473_v38 }
  0xb0   :  { %1619 = vmatpush2.bf16.msra.mxu0 %v7450_v30 }
  0xb1   :  { %1710 = vmatprep.subr.bf16.mxu0 %v7458_v33  ;;  %1680 = vmatpush2.bf16.msra.mxu1 %v7471_v39 }
  0xb2   :  { %1771 = vmatprep.subr.bf16.mxu1 %v7479_v40 }
 0x132   :  { %v572_v41 = vpop.f32.mrf.mxu0 }
 0x133   :  { %v635_v42 = vpop.f32.mrf.mxu1 }
 0x134   :  { %v636_v43 = vadd.f32 %v635_v42, %v572_v41  ;;  %v574_v44 = vpop.f32.mrf.mxu0 }
 0x135   :  { %v637_v45 = vpop.f32.mrf.mxu1 }
 0x136   :  { %vm664_vm3 = vcmp.ge.f32.partialorder %v636_v43, 0.0  ;;  %v638_v46 = vadd.f32 %v637_v45, %v574_v44  ;;  %v576_v47 = vpop.f32.mrf.mxu0  ;;  %v676_v49 = vmul.f32 0.2, %v636_v43 }
 0x137   :  { %v639_v48 = vpop.f32.mrf.mxu1 }
 0x138   :  { %v677_v50 = vmul.f32 0.2, %v638_v46  ;;  %v640_v51 = vadd.f32 %v639_v48, %v576_v47  ;;  %v578_v52 = vpop.f32.mrf.mxu0  ;;  %vm665_vm4 = vcmp.ge.f32.partialorder %v638_v46, 0.0  ;;  %v688_v63 = vsel %vm664_vm3, %v636_v43, %v676_v49 }
 0x139   :  { %v641_v53 = vpop.f32.mrf.mxu1 }
 0x13a   :  { %vm666_vm5 = vcmp.ge.f32.partialorder %v640_v51, 0.0  ;;  %v678_v54 = vmul.f32 0.2, %v640_v51  ;;  %v642_v56 = vadd.f32 %v641_v53, %v578_v52  ;;  %v582_v57 = vpop.f32.mrf.mxu0  ;;  %v689_v0 = vsel %vm665_vm4, %v638_v46, %v677_v50 }
 0x13b   :  { %v645_v58 = vpop.f32.mrf.mxu1 }
 0x13c   :  { %v690_v59 = vsel %vm666_vm5, %v640_v51, %v678_v54  ;;  %vm667_vm6 = vcmp.ge.f32.partialorder %v642_v56, 0.0  ;;  %v679_v60 = vmul.f32 0.2, %v642_v56  ;;  %v646_v61 = vadd.f32 %v645_v58, %v582_v57  ;;  %v584_v55 = vpop.f32.mrf.mxu0  ;;  %v7474_v51 = vld [vmem:[#allocation2 + $0x240] ss:$8 sps:$4 sm:$0xff]  }
 0x13d   :  { %v647_v62 = vpop.f32.mrf.mxu1  ;;  %v8517_v3 = vpack.c.bf16 %v690_v59, %v688_v63  ;;  %v7477_v57 = vld [vmem:[#allocation2 + $0x370] ss:$8 sps:$4 sm:$0xff]   ;;  %v7482_v59 = vld [vmem:[#allocation2 + $0x234] ss:$8 sps:$4 sm:$0xff]  }
 0x13e   :  { %v691_v1 = vsel %vm667_vm6, %v642_v56, %v679_v60  ;;  %v648_v2 = vadd.f32 %v647_v62, %v584_v55  ;;  %v680_v5 = vmul.f32 0.2, %v646_v61  ;;  %v586_v6 = vpop.f32.mrf.mxu0  ;;  %vm668_vm7 = vcmp.ge.f32.partialorder %v646_v61, 0.0  ;;  %v7485_v62 = vld [vmem:[#allocation2 + $0x364] ss:$8 sps:$4 sm:$0xff]  }
 0x13f   :  { %v8519_v4 = vpack.c.bf16 %v691_v1, %v689_v0  ;;  %v649_v7 = vpop.f32.mrf.mxu1  ;;  %v709_v18 = vshll.u32 %v8517_v3, 16  ;;  %v707_v32 = vshrl.u32 %v8517_v3, 16  ;;  %v764_v33 = vrot.slane %v8517_v3, 1 }
 0x140   :  { %v650_v9 = vadd.f32 %v649_v7, %v586_v6  ;;  %v681_v11 = vmul.f32 0.2, %v648_v2  ;;  %v588_v12 = vpop.f32.mrf.mxu0  ;;  %vm669_vm8 = vcmp.ge.f32.partialorder %v648_v2, 0.0  ;;  %v692_v19 = vsel %vm668_vm7, %v646_v61, %v680_v5  ;;  %v7480_v6 = vld [vmem:[#allocation2 + $0x230] ss:$8 sps:$4 sm:$0xff]  }
 0x141   :  { %v651_v13 = vpop.f32.mrf.mxu1  ;;  %1620 = vmatprep.mubr.bf16.mxu0 %v8519_v4  ;;  %v719_v22 = vshrl.u32 %v8519_v4, 16  ;;  %v721_v23 = vshll.u32 %v8519_v4, 16  ;;  %v711_v42 = vrot.slane %v709_v18, 1  ;;  %v767_v46 = vrot.slane %v8519_v4, 1 }
 0x142   :  { %vm670_vm9 = vcmp.ge.f32.partialorder %v650_v9, 0.0  ;;  %v682_v15 = vmul.f32 0.2, %v650_v9  ;;  %v652_v16 = vadd.f32 %v651_v13, %v588_v12  ;;  %1621 = vmatmul.mubr.bf16.vlgmr.msra.gmra.mxu0 %v8517_v3  ;;  %v592_v20 = vpop.f32.mrf.mxu0  ;;  %v693_v27 = vsel %vm669_vm8, %v648_v2, %v681_v11  ;;  %v7483_v11 = vld [vmem:[#allocation2 + $0x360] ss:$8 sps:$4 sm:$0xff]  }
 0x143   :  { %1711 = vmatpush1.bf16.msra.mxu0 %v7456_v8  ;;  %v655_v21 = vpop.f32.mrf.mxu1  ;;  %v723_v41 = vrot.slane %v721_v23, 1  ;;  %v8537_v47 = vrot.slane %v719_v22, 1  ;;  %v712_v55 = vor.u32 %v711_v42, %v707_v32  ;;  %v8551_v7 = vrot.slane %v721_v23, 2  ;;  %v7488_v13 = vld [vmem:[#allocation2 + $0x224] ss:$8 sps:$4 sm:$0xff]  }
 0x144   :  { %v694_v24 = vsel %vm670_vm9, %v650_v9, %v682_v15  ;;  %vm671_vm10 = vcmp.ge.f32.partialorder %v652_v16, 0.0  ;;  %v683_v25 = vmul.f32 0.2, %v652_v16  ;;  %v656_v26 = vadd.f32 %v655_v21, %v592_v20  ;;  %1712 = vmatprep.subr.bf16.mxu0 %v7464_v10  ;;  %v594_v29 = vpop.f32.mrf.mxu0  ;;  %v7486_v23 = vld [vmem:[#allocation2 + $0x220] ss:$8 sps:$4 sm:$0xff]  }
 0x145   :  { %v8527_v28 = vpack.c.bf16 %v694_v24, %v692_v19  ;;  %v657_v30 = vpop.f32.mrf.mxu1  ;;  %v724_v60 = vor.u32 %v723_v41, %v719_v22  ;;  %v8553_v8 = vrot.slane %v707_v32, 1  ;;  %v7494_v32 = vld [vmem:[#allocation2 + $0x214] ss:$8 sps:$4 sm:$0xff]   ;;  %v7558_v3 = vld [vmem:[#allocation2 + $0x380] ss:$8 sps:$4 sm:$0xff]  }
 0x146   :  { %v695_v34 = vsel %vm671_vm10, %v652_v16, %v683_v25  ;;  %vm672_vm11 = vcmp.ge.f32.partialorder %v656_v26, 0.0  ;;  %v684_v35 = vmul.f32 0.2, %v656_v26  ;;  %v658_v36 = vadd.f32 %v657_v30, %v594_v29  ;;  %v596_v39 = vpop.f32.mrf.mxu0  ;;  %v7491_v16 = vld [vmem:[#allocation2 + $0x354] ss:$8 sps:$4 sm:$0xff]  }
 0x147   :  { %v8531_v38 = vpack.c.bf16 %v695_v34, %v693_v27  ;;  %1713 = vmatpush1.bf16.msra.mxu0 %v7462_v14  ;;  %v659_v40 = vpop.f32.mrf.mxu1  ;;  %v714_v43 = vshll.u32 %v8527_v28, 16  ;;  %v730_v53 = vshrl.u32 %v8527_v28, 16  ;;  %v765_v14 = vrot.slane %v8527_v28, 1  ;;  %v7489_v30 = vld [vmem:[#allocation2 + $0x350] ss:$8 sps:$4 sm:$0xff]  }
 0x148   :  { %v685_v44 = vmul.f32 0.2, %v658_v36  ;;  %v660_v45 = vadd.f32 %v659_v40, %v596_v39  ;;  %1714 = vmatprep.subr.bf16.mxu0 %v7470_v17  ;;  %v696_v48 = vsel %vm672_vm11, %v656_v26, %v684_v35  ;;  %vm673_vm12 = vcmp.ge.f32.partialorder %v658_v36, 0.0  ;;  %v598_v49 = vpop.f32.mrf.mxu0 }
 0x149   :  { %v661_v50 = vpop.f32.mrf.mxu1  ;;  %1630 = vmatprep.mubr.bf16.mxu0 %v8531_v38  ;;  %v726_v52 = vshll.u32 %v8531_v38, 16  ;;  %v716_v58 = vrot.slane %v714_v43, 1  ;;  %v738_v63 = vshrl.u32 %v8531_v38, 16  ;;  %v768_v12 = vrot.slane %v8531_v38, 1 }
 0x14a   :  { %vm674_vm13 = vcmp.ge.f32.partialorder %v660_v45, 0.0  ;;  %v686_v54 = vmul.f32 0.2, %v660_v45  ;;  %v662_v56 = vadd.f32 %v661_v50, %v598_v49  ;;  %1631 = vmatmul.mubr.bf16.gmra.mxu0 %v8527_v28  ;;  %v697_v0 = vsel %vm673_vm12, %v658_v36, %v685_v44  ;;  %v7497_v36 = vld [vmem:[#allocation2 + $0x344] ss:$8 sps:$4 sm:$0xff]  }
 0x14b   :  { %1715 = vmatpush1.bf16.msra.mxu0 %v7468_v31  ;;  %v728_v61 = vrot.slane %v726_v52, 1  ;;  %v717_v10 = vsel %vm100_vm0, %v712_v55, %v716_v58  ;;  %v8563_v19 = vrot.slane %v730_v53, 1  ;;  %v790_v21 = vrot.slane %v738_v63, 1  ;;  %v7503_v49 = vld [vmem:[#allocation2 + $0x334] ss:$8 sps:$4 sm:$0xff]  }
 0x14c   :  { %v698_v1 = vsel %vm674_vm13, %v660_v45, %v686_v54  ;;  %vm675_vm14 = vcmp.ge.f32.partialorder %v662_v56, 0.0  ;;  %v687_v2 = vmul.f32 0.2, %v662_v56  ;;  %1716 = vmatprep.subr.bf16.mxu0 %v7476_v37  ;;  %v791_v22 = vrot.slane %v726_v52, 2  ;;  %v7498_v50 = vld [vmem:[#allocation2 + $0x200] ss:$8 sps:$4 sm:$0xff]  }
 0x14d   :  { %v8548_v4 = vpack.c.bf16 %v698_v1, %v696_v48  ;;  %v729_v5 = vsel %vm100_vm0, %v724_v60, %v728_v61  ;;  %v8572_v27 = vrot.slane %v709_v18, 2  ;;  %v769_v29 = vsel %vm130_vm2, %v767_v46, %v768_v12  ;;  %v7495_v46 = vld [vmem:[#allocation2 + $0x340] ss:$8 sps:$4 sm:$0xff]   ;;  %v7500_v48 = vld [vmem:[#allocation2 + $0x204] ss:$8 sps:$4 sm:$0xff]  }
 0x14e   :  { %v699_v9 = vsel %vm675_vm14, %v662_v56, %v687_v2  ;;  %1681 = vmatprep.mubr.bf16.mxu1 %v729_v5  ;;  %v8582_v34 = vrot.slane %v714_v43, 2  ;;  %v740_v35 = vor.u32 %v738_v63, %v728_v61  ;;  %v732_v39 = vor.u32 %v730_v53, %v716_v58  ;;  %v7492_v43 = vld [vmem:[#allocation2 + $0x210] ss:$8 sps:$4 sm:$0xff]   ;;  %v7506_v54 = vld [vmem:[#allocation2 + $0x2f4] ss:$8 sps:$4 sm:$0xff]  }
 0x14f   :  { %v8558_v15 = vpack.c.bf16 %v699_v9, %v697_v0  ;;  %1717 = vmatpush1.bf16.msra.mxu0 %v7474_v51  ;;  %1682 = vmatmul.mubr.bf16.vlgmr.msra.gmra.mxu1 %v717_v10  ;;  %v734_v17 = vshll.u32 %v8548_v4, 16  ;;  %v746_v20 = vshrl.u32 %v8548_v4, 16  ;;  %v770_v26 = vrot.slane %v8548_v4, 1  ;;  %v7501_v51 = vld [vmem:[#allocation2 + $0x330] ss:$8 sps:$4 sm:$0xff]  }
 0x150   :  { %1772 = vmatpush1.bf16.msra.mxu1 %v7477_v57  ;;  %1718 = vmatprep.subr.bf16.mxu0 %v7482_v59  ;;  %v8595_v53 = vor.u32 %v791_v22, %v790_v21  ;;  %v7509_v56 = vld [vmem:[#allocation2 + $0x324] ss:$8 sps:$4 sm:$0xff]   ;;  %v789_v57 = vor.u32 %v8551_v7, %v8537_v47  ;;  %v7504_v58 = vld [vmem:[#allocation2 + $0x2f0] ss:$8 sps:$4 sm:$0xff]   ;;  %v7507_v59 = vld [vmem:[#allocation2 + $0x320] ss:$8 sps:$4 sm:$0xff]   ;;  %v785_v38 = vor.u32 %v8582_v34, %v8563_v19 }
 0x151   :  { %1640 = vmatprep.mubr.bf16.mxu0 %v8558_v15  ;;  %1773 = vmatprep.subr.bf16.mxu1 %v7485_v62  ;;  %v742_v24 = vshll.u32 %v8558_v15, 16  ;;  %v749_v25 = vshrl.u32 %v8558_v15, 16  ;;  %v736_v31 = vrot.slane %v734_v17, 1  ;;  %v8586_v37 = vrot.slane %v746_v20, 1  ;;  %v7512_v60 = vld [vmem:[#allocation2 + $0x2e4] ss:$8 sps:$4 sm:$0xff]  }
 0x152   :  { %1641 = vmatmul.mubr.bf16.gmra.mxu0 %v8548_v4  ;;  %v772_v41 = vrot.slane %v8558_v15, 1  ;;  %v793_v61 = vsel %vm139_vm1, %v789_v57, %v8595_v53  ;;  %v7515_v55 = vld [vmem:[#allocation2 + $0x314] ss:$8 sps:$4 sm:$0xff]   ;;  %v7510_v62 = vld [vmem:[#allocation2 + $0x2e0] ss:$8 sps:$4 sm:$0xff]  }
 0x153   :  { %1719 = vmatpush1.bf16.msra.mxu0 %v7480_v6  ;;  %1742 = vmatprep.mubr.bf16.mxu0 %v769_v29  ;;  %v744_v18 = vrot.slane %v742_v24, 1  ;;  %v8590_v40 = vrot.slane %v749_v25, 1  ;;  %v737_v45 = vsel %vm100_vm0, %v732_v39, %v736_v31  ;;  %v748_v52 = vor.u32 %v746_v20, %v736_v31  ;;  %v7513_v63 = vld [vmem:[#allocation2 + $0x310] ss:$8 sps:$4 sm:$0xff]   ;;  %v7518_v0 = vld [vmem:[#allocation2 + $0x2d4] ss:$8 sps:$4 sm:$0xff]  }
 0x154   :  { %1774 = vmatpush1.bf16.msra.mxu1 %v7483_v11  ;;  %1720 = vmatprep.subr.bf16.mxu0 %v7488_v13  ;;  %v7521_v1 = vld [vmem:[#allocation2 + $0x304] ss:$8 sps:$4 sm:$0xff]   ;;  %v7516_v47 = vld [vmem:[#allocation2 + $0x2d0] ss:$8 sps:$4 sm:$0xff]   ;;  %v7519_v2 = vld [vmem:[#allocation2 + $0x300] ss:$8 sps:$4 sm:$0xff]  }
 0x155   :  { %v745_v42 = vsel %vm100_vm0, %v740_v35, %v744_v18  ;;  %1775 = vmatprep.subr.bf16.mxu1 %v7491_v16  ;;  %v751_v44 = vor.u32 %v749_v25, %v744_v18  ;;  %v7524_v5 = vld [vmem:[#allocation2 + $0x2c4] ss:$8 sps:$4 sm:$0xff]   ;;  %v7527_v6 = vld [vmem:[#allocation2 + $0x3f4] ss:$8 sps:$4 sm:$0xff]   ;;  %v7522_v7 = vld [vmem:[#allocation2 + $0x2c0] ss:$8 sps:$4 sm:$0xff]  }
 0x156   :  { %1691 = vmatprep.mubr.bf16.mxu1 %v745_v42  ;;  %v7525_v9 = vld [vmem:[#allocation2 + $0x3f0] ss:$8 sps:$4 sm:$0xff]   ;;  %v7530_v10 = vld [vmem:[#allocation2 + $0x2b4] ss:$8 sps:$4 sm:$0xff]   ;;  %v7533_v11 = vld [vmem:[#allocation2 + $0x3e4] ss:$8 sps:$4 sm:$0xff]  }
 0x157   :  { %1721 = vmatpush1.bf16.msra.mxu0 %v7486_v23  ;;  %1692 = vmatmul.mubr.bf16.gmra.mxu1 %v737_v45  ;;  %v7528_v13 = vld [vmem:[#allocation2 + $0x2b0] ss:$8 sps:$4 sm:$0xff]   ;;  %v7531_v16 = vld [vmem:[#allocation2 + $0x3e0] ss:$8 sps:$4 sm:$0xff]   ;;  %v7536_v20 = vld [vmem:[#allocation2 + $0x2a4] ss:$8 sps:$4 sm:$0xff]   ;;  %v773_v45 = vsel %vm130_vm2, %v768_v12, %v772_v41 }
 0x158   :  { %1776 = vmatpush1.bf16.msra.mxu1 %v7489_v30  ;;  %1722 = vmatprep.subr.bf16.mxu0 %v7494_v32  ;;  %v7539_v21 = vld [vmem:[#allocation2 + $0x3d4] ss:$8 sps:$4 sm:$0xff]   ;;  %v7534_v22 = vld [vmem:[#allocation2 + $0x2a0] ss:$8 sps:$4 sm:$0xff]   ;;  %v7537_v23 = vld [vmem:[#allocation2 + $0x3d0] ss:$8 sps:$4 sm:$0xff]  }
 0x159   :  { %1777 = vmatprep.subr.bf16.mxu1 %v7497_v36  ;;  %1701 = vmatprep.mubr.bf16.mxu1 %v751_v44  ;;  %v7542_v25 = vld [vmem:[#allocation2 + $0x294] ss:$8 sps:$4 sm:$0xff]   ;;  %v7545_v29 = vld [vmem:[#allocation2 + $0x3c4] ss:$8 sps:$4 sm:$0xff]   ;;  %v7540_v30 = vld [vmem:[#allocation2 + $0x290] ss:$8 sps:$4 sm:$0xff]   ;;  %v766_v44 = vsel %vm130_vm2, %v764_v33, %v765_v14  ;;  %v771_v33 = vsel %vm130_vm2, %v765_v14, %v770_v26 }
 0x15a   :  { %v7543_v31 = vld [vmem:[#allocation2 + $0x3c0] ss:$8 sps:$4 sm:$0xff]   ;;  %v7548_v32 = vld [vmem:[#allocation2 + $0x284] ss:$8 sps:$4 sm:$0xff]   ;;  %v7551_v35 = vld [vmem:[#allocation2 + $0x3b4] ss:$8 sps:$4 sm:$0xff]  }
 0x15b   :  { %1723 = vmatpush1.bf16.msra.mxu0 %v7492_v43  ;;  %v7546_v18 = vld [vmem:[#allocation2 + $0x280] ss:$8 sps:$4 sm:$0xff]   ;;  %v7549_v36 = vld [vmem:[#allocation2 + $0x3b0] ss:$8 sps:$4 sm:$0xff]   ;;  %v7554_v39 = vld [vmem:[#allocation2 + $0x3a4] ss:$8 sps:$4 sm:$0xff]  }
 0x15c   :  { %1778 = vmatpush1.bf16.msra.mxu1 %v7495_v46  ;;  %1724 = vmatprep.subr.bf16.mxu0 %v7500_v48  ;;  %v7552_v42 = vld [vmem:[#allocation2 + $0x3a0] ss:$8 sps:$4 sm:$0xff]   ;;  %v7557_v43 = vld [vmem:[#allocation2 + $0x394] ss:$8 sps:$4 sm:$0xff]   ;;  %v7555_v46 = vld [vmem:[#allocation2 + $0x390] ss:$8 sps:$4 sm:$0xff]  }
 0x15d   :  { %1779 = vmatprep.subr.bf16.mxu1 %v7503_v49  ;;  %v7560_v48 = vld [vmem:[#allocation2 + $0x384] ss:$8 sps:$4 sm:$0xff]   ;;  %v799_v49 = vrot.slane %v742_v24, 2  ;;  %v7561_v19 = vld [vmem:[#allocation4 + $0x70] ss:$8 sps:$4 sm:$0xff]  }
 0x15e   :  { %v7563_v34 = vld [vmem:[#allocation4 + $0x74] ss:$8 sps:$4 sm:$0xff]   ;;  %v7567_v4 = vld [vmem:[#allocation4 + $0x50] ss:$8 sps:$4 sm:$0xff]  }
 0x15f   :  { %1725 = vmatpush1.bf16.msra.mxu0 %v7498_v50  ;;  %1702 = vmatmul.mubr.bf16.gmra.mxu1 %v748_v52  ;;  %v795_v50 = vrot.slane %v734_v17, 2  ;;  %v800_v12 = vor.u32 %v799_v49, %v8590_v40  ;;  %v782_v17 = vor.u32 %v8572_v27, %v8553_v8  ;;  %v7566_v8 = vld [vmem:[#allocation4 + $0x64] ss:$8 sps:$4 sm:$0xff]   ;;  %v7564_v27 = vld [vmem:[#allocation4 + $0x60] ss:$8 sps:$4 sm:$0xff]  }
 0x160   :  { %1780 = vmatpush1.bf16.msra.mxu1 %v7501_v51  ;;  %1803 = vmatprep.mubr.bf16.mxu1 %v793_v61  ;;  %v7569_v40 = vld [vmem:[#allocation4 + $0x54] ss:$8 sps:$4 sm:$0xff]   ;;  %v7581_v52 = vld [vmem:[#allocation4 + $0x164] ss:$8 sps:$4 sm:$0xff]  }
 0x161   :  { %1726 = vmatprep.subr.bf16.mxu0 %v7506_v54  ;;  %1781 = vmatprep.subr.bf16.mxu1 %v7509_v56  ;;  %v786_v24 = vsel %vm139_vm1, %v782_v17, %v785_v38  ;;  %v801_v28 = vsel %vm139_vm1, %v8595_v53, %v800_v12  ;;  %v796_v14 = vor.u32 %v795_v50, %v8586_v37  ;;  %v7575_v51 = vld [vmem:[#allocation4 + $0x174] ss:$8 sps:$4 sm:$0xff]   ;;  %v7572_v37 = vld [vmem:[#allocation4 + $0x44] ss:$8 sps:$4 sm:$0xff]   ;;  %v7570_v54 = vld [vmem:[#allocation4 + $0x40] ss:$8 sps:$4 sm:$0xff]  }
 0x162   :  { %v7587_v53 = vld [vmem:[#allocation4 + $0x154] ss:$8 sps:$4 sm:$0xff]   ;;  %v7585_v56 = vld [vmem:[#allocation4 + $0x150] ss:$8 sps:$4 sm:$0xff]   ;;  %v7584_v61 = vld [vmem:[#allocation4 + $0x24] ss:$8 sps:$4 sm:$0xff]  }
 0x163   :  { %1727 = vmatpush2.bf16.msra.mxu0 %v7504_v58  ;;  %v797_v15 = vsel %vm139_vm1, %v785_v38, %v796_v14  ;;  %v7578_v57 = vld [vmem:[#allocation4 + $0x34] ss:$8 sps:$4 sm:$0xff]   ;;  %v7593_v58 = vld [vmem:[#allocation4 + $0x144] ss:$8 sps:$4 sm:$0xff]   ;;  %v7642_v50 = vld [vmem:[#allocation4 + $0x80] ss:$8 sps:$4 sm:$0xff]  }
 0x164   :  { %1782 = vmatpush1.bf16.msra.mxu1 %v7507_v59  ;;  %1728 = vmatprep.subr.bf16.mxu0 %v7512_v60  ;;  %v7576_v59 = vld [vmem:[#allocation4 + $0x30] ss:$8 sps:$4 sm:$0xff]   ;;  %v7591_v60 = vld [vmem:[#allocation4 + $0x140] ss:$8 sps:$4 sm:$0xff]   ;;  %v7641_v49 = vld [vmem:[#allocation4 + $0x1c4] ss:$8 sps:$4 sm:$0xff]  }
 0x165   :  { %1783 = vmatprep.subr.bf16.mxu1 %v7515_v55  ;;  %v7599_v55 = vld [vmem:[#allocation4 + $0x134] ss:$8 sps:$4 sm:$0xff]   ;;  %v7651_v17 = vld [vmem:[#allocation4 + $0x1a0] ss:$8 sps:$4 sm:$0xff]  }
 0x166   :  { %v7647_v38 = vld [vmem:[#allocation4 + $0x1b4] ss:$8 sps:$4 sm:$0xff]  }
 0x167   :  { %1729 = vmatpush2.bf16.msra.mxu0 %v7510_v62  ;;  %v7582_v62 = vld [vmem:[#allocation4 + $0x20] ss:$8 sps:$4 sm:$0xff]  }
 0x168   :  { %1784 = vmatpush1.bf16.msra.mxu1 %v7513_v63  ;;  %1730 = vmatprep.subr.bf16.mxu0 %v7518_v0  ;;  %v7597_v63 = vld [vmem:[#allocation4 + $0x130] ss:$8 sps:$4 sm:$0xff]   ;;  %v7590_v0 = vld [vmem:[#allocation4 + $0x14] ss:$8 sps:$4 sm:$0xff]  }
 0x169   :  { %1785 = vmatprep.subr.bf16.mxu1 %v7521_v1  ;;  %v7605_v1 = vld [vmem:[#allocation4 + $0x124] ss:$8 sps:$4 sm:$0xff]  }
 0x16b   :  { %1731 = vmatpush2.bf16.msra.mxu0 %v7516_v47  ;;  %v7588_v47 = vld [vmem:[#allocation4 + $0x10] ss:$8 sps:$4 sm:$0xff]  }
 0x16c   :  { %1786 = vmatpush1.bf16.msra.mxu1 %v7519_v2  ;;  %1732 = vmatprep.subr.bf16.mxu0 %v7524_v5  ;;  %v7603_v2 = vld [vmem:[#allocation4 + $0x120] ss:$8 sps:$4 sm:$0xff]   ;;  %v7596_v5 = vld [vmem:[#allocation4 + $0x4] ss:$8 sps:$4 sm:$0xff]  }
 0x16d   :  { %1787 = vmatprep.subr.bf16.mxu1 %v7527_v6  ;;  %v7594_v6 = vld [vmem:[#allocation4] ss:$8 sps:$4 sm:$0xff]  }
 0x16f   :  { %1733 = vmatpush2.bf16.msra.mxu0 %v7522_v7  ;;  %v7602_v7 = vld [vmem:[#allocation4 + $0xf4] ss:$8 sps:$4 sm:$0xff]  }
 0x170   :  { %1788 = vmatpush2.bf16.msra.mxu1 %v7525_v9  ;;  %1734 = vmatprep.subr.bf16.mxu0 %v7530_v10  ;;  %v7600_v9 = vld [vmem:[#allocation4 + $0xf0] ss:$8 sps:$4 sm:$0xff]   ;;  %v7608_v10 = vld [vmem:[#allocation4 + $0xe4] ss:$8 sps:$4 sm:$0xff]  }
 0x171   :  { %1789 = vmatprep.subr.bf16.mxu1 %v7533_v11  ;;  %v7606_v11 = vld [vmem:[#allocation4 + $0xe0] ss:$8 sps:$4 sm:$0xff]  }
 0x173   :  { %1735 = vmatpush2.bf16.msra.mxu0 %v7528_v13  ;;  %v7609_v13 = vld [vmem:[#allocation4 + $0x110] ss:$8 sps:$4 sm:$0xff]  }
 0x174   :  { %1790 = vmatpush2.bf16.msra.mxu1 %v7531_v16  ;;  %1736 = vmatprep.subr.bf16.mxu0 %v7536_v20  ;;  %v7611_v16 = vld [vmem:[#allocation4 + $0x114] ss:$8 sps:$4 sm:$0xff]   ;;  %v7612_v20 = vld [vmem:[#allocation4 + $0xd0] ss:$8 sps:$4 sm:$0xff]  }
 0x175   :  { %1791 = vmatprep.subr.bf16.mxu1 %v7539_v21  ;;  %v7614_v21 = vld [vmem:[#allocation4 + $0xd4] ss:$8 sps:$4 sm:$0xff]  }
 0x177   :  { %1737 = vmatpush2.bf16.msra.mxu0 %v7534_v22  ;;  %v7615_v22 = vld [vmem:[#allocation4 + $0x100] ss:$8 sps:$4 sm:$0xff]  }
 0x178   :  { %1792 = vmatpush2.bf16.msra.mxu1 %v7537_v23  ;;  %1738 = vmatprep.subr.bf16.mxu0 %v7542_v25  ;;  %v7617_v23 = vld [vmem:[#allocation4 + $0x104] ss:$8 sps:$4 sm:$0xff]   ;;  %v7618_v25 = vld [vmem:[#allocation4 + $0xc0] ss:$8 sps:$4 sm:$0xff]  }
 0x179   :  { %1793 = vmatprep.subr.bf16.mxu1 %v7545_v29  ;;  %v7620_v29 = vld [vmem:[#allocation4 + $0xc4] ss:$8 sps:$4 sm:$0xff]  }
 0x17b   :  { %1739 = vmatpush2.bf16.msra.mxu0 %v7540_v30  ;;  %v7621_v30 = vld [vmem:[#allocation4 + $0x1f0] ss:$8 sps:$4 sm:$0xff]  }
 0x17c   :  { %1794 = vmatpush2.bf16.msra.mxu1 %v7543_v31  ;;  %1740 = vmatprep.subr.bf16.mxu0 %v7548_v32  ;;  %v7623_v31 = vld [vmem:[#allocation4 + $0x1f4] ss:$8 sps:$4 sm:$0xff]   ;;  %v7624_v32 = vld [vmem:[#allocation4 + $0xb0] ss:$8 sps:$4 sm:$0xff]  }
 0x17d   :  { %1795 = vmatprep.subr.bf16.mxu1 %v7551_v35  ;;  %v7626_v35 = vld [vmem:[#allocation4 + $0xb4] ss:$8 sps:$4 sm:$0xff]  }
 0x17f   :  { %1741 = vmatpush2.bf16.msra.mxu0 %v7546_v18  ;;  %v7627_v18 = vld [vmem:[#allocation4 + $0x1e0] ss:$8 sps:$4 sm:$0xff]  }
 0x180   :  { %1796 = vmatpush2.bf16.msra.mxu1 %v7549_v36  ;;  %2750 = vmatprep.subr.bf16.mxu0 %v7563_v34  ;;  %v7629_v36 = vld [vmem:[#allocation4 + $0x1e4] ss:$8 sps:$4 sm:$0xff]   ;;  %v7671_v34 = vld [vmem:[#allocation4 + $0x374] ss:$8 sps:$4 sm:$0xff]  }
 0x181   :  { %1797 = vmatprep.subr.bf16.mxu1 %v7554_v39  ;;  %v7630_v39 = vld [vmem:[#allocation4 + $0xa0] ss:$8 sps:$4 sm:$0xff]  }
 0x182   :  { %1743 = vmatmul.mubr.bf16.vlgmr.msra.gmra.mxu0 %v766_v44  ;;  %v7635_v44 = vld [vmem:[#allocation4 + $0x1d4] ss:$8 sps:$4 sm:$0xff]  }
 0x183   :  { %1752 = vmatprep.mubr.bf16.mxu0 %v773_v45  ;;  %2751 = vmatpush1.bf16.msra.mxu0 %v7561_v19  ;;  %v7636_v45 = vld [vmem:[#allocation4 + $0x90] ss:$8 sps:$4 sm:$0xff]   ;;  %v7663_v19 = vld [vmem:[#allocation4 + $0x180] ss:$8 sps:$4 sm:$0xff]  }
 0x184   :  { %1798 = vmatpush2.bf16.msra.mxu1 %v7552_v42  ;;  %2752 = vmatprep.subr.bf16.mxu0 %v7566_v8  ;;  %v7632_v42 = vld [vmem:[#allocation4 + $0xa4] ss:$8 sps:$4 sm:$0xff]   ;;  %v938_v8 = vlaneseq }
 0x185   :  { %1799 = vmatprep.subr.bf16.mxu1 %v7557_v43  ;;  %v7633_v43 = vld [vmem:[#allocation4 + $0x1d0] ss:$8 sps:$4 sm:$0xff]  }
 0x187   :  { %2753 = vmatpush1.bf16.msra.mxu0 %v7564_v27  ;;  %v939_v27 = vshrl.u32 %v938_v8, 7 }
 0x188   :  { %1800 = vmatpush2.bf16.msra.mxu1 %v7555_v46  ;;  %2754 = vmatprep.subr.bf16.mxu0 %v7569_v40  ;;  %v7638_v46 = vld [vmem:[#allocation4 + $0x94] ss:$8 sps:$4 sm:$0xff]  }
 0x189   :  { %1801 = vmatprep.subr.bf16.mxu1 %v7560_v48  ;;  %v7639_v48 = vld [vmem:[#allocation4 + $0x1c0] ss:$8 sps:$4 sm:$0xff]  }
 0x18a   :  { %1753 = vmatmul.mubr.bf16.gmra.mxu0 %v771_v33  ;;  %v7645_v33 = vld [vmem:[#allocation4 + $0x1b0] ss:$8 sps:$4 sm:$0xff]  }
 0x18b   :  { %1762 = vmatprep.mubr.bf16.mxu0 %v772_v41  ;;  %v7573_v41 = vld [vmem:[#allocation4 + $0x170] ss:$8 sps:$4 sm:$0xff]   ;;  %2755 = vmatpush1.bf16.msra.mxu0 %v7567_v4  ;;  %v936_v4 = vld [vmem:[%s9142_s5] sm:$0x3] }
 0x18c   :  { %1802 = vmatpush2.bf16.msra.mxu1 %v7558_v3  ;;  %2756 = vmatprep.subr.bf16.mxu0 %v7572_v37  ;;  %v7644_v3 = vld [vmem:[#allocation4 + $0x84] ss:$8 sps:$4 sm:$0xff]  }
 0x18d   :  { %2811 = vmatprep.subr.bf16.mxu1 %v7575_v51  ;;  %v8634_v51 = vsub.s32 0, %v939_v27 }
 0x18f   :  { %1804 = vmatmul.mubr.bf16.vlgmr.msra.gmra.mxu1 %v786_v24  ;;  %2757 = vmatpush1.bf16.msra.mxu0 %v7570_v54  ;;  %v7653_v24 = vld [vmem:[#allocation4 + $0x1a4] ss:$8 sps:$4 sm:$0xff]  }
 0x190   :  { %1813 = vmatprep.mubr.bf16.mxu1 %v801_v28  ;;  %2812 = vmatpush1.bf16.msra.mxu1 %v7573_v41  ;;  %v7657_v28 = vld [vmem:[#allocation4 + $0x190] ss:$8 sps:$4 sm:$0xff]  }
 0x191   :  { %2813 = vmatprep.subr.bf16.mxu1 %v7581_v52  ;;  %2758 = vmatprep.subr.bf16.mxu0 %v7578_v57 }
 0x192   :  { %1763 = vmatmul.mubr.bf16.gmra.mxu0 %v770_v26  ;;  %v7579_v26 = vld [vmem:[#allocation4 + $0x160] ss:$8 sps:$4 sm:$0xff]  }
 0x193   :  { %2759 = vmatpush1.bf16.msra.mxu0 %v7576_v59 }
 0x194   :  { %2814 = vmatpush1.bf16.msra.mxu1 %v7579_v26  ;;  %2760 = vmatprep.subr.bf16.mxu0 %v7584_v61  ;;  %v8639_v26 = vsub.s32 1, %v939_v27 }
 0x195   :  { %2815 = vmatprep.subr.bf16.mxu1 %v7587_v53  ;;  %v941_v53 = vrot.slane %v936_v4, %v8634_v51 }
 0x197   :  { %1814 = vmatmul.mubr.bf16.gmra.mxu1 %v797_v15  ;;  %2761 = vmatpush1.bf16.msra.mxu0 %v7582_v62  ;;  %v7665_v15 = vld [vmem:[#allocation4 + $0x184] ss:$8 sps:$4 sm:$0xff]  }
 0x198   :  { %1823 = vmatprep.mubr.bf16.mxu1 %v800_v12  ;;  %2816 = vmatpush1.bf16.msra.mxu1 %v7585_v56  ;;  %v7650_v12 = vld [vmem:[#allocation4 + $0x274] ss:$8 sps:$4 sm:$0xff]   ;;  %v945_v56 = vrot.slane %v936_v4, %v8639_v26 }
 0x199   :  { %2817 = vmatprep.subr.bf16.mxu1 %v7593_v58  ;;  %2762 = vmatprep.subr.bf16.mxu0 %v7590_v0 }
 0x19b   :  { %2763 = vmatpush1.bf16.msra.mxu0 %v7588_v47 }
 0x19c   :  { %2818 = vmatpush1.bf16.msra.mxu1 %v7591_v60  ;;  %2764 = vmatprep.subr.bf16.mxu0 %v7596_v5 }
 0x19d   :  { %2819 = vmatprep.subr.bf16.mxu1 %v7599_v55 }
 0x19f   :  { %1824 = vmatmul.mubr.bf16.gmra.mxu1 %v796_v14  ;;  %2765 = vmatpush1.bf16.msra.mxu0 %v7594_v6  ;;  %v7659_v14 = vld [vmem:[#allocation4 + $0x194] ss:$8 sps:$4 sm:$0xff]  }
 0x1a0   :  { %2820 = vmatpush1.bf16.msra.mxu1 %v7597_v63  ;;  %2766 = vmatprep.subr.bf16.mxu0 %v7602_v7 }
 0x1a1   :  { %2821 = vmatprep.subr.bf16.mxu1 %v7605_v1 }
 0x1a3   :  { %2767 = vmatpush2.bf16.msra.mxu0 %v7600_v9 }
 0x1a4   :  { %2822 = vmatpush1.bf16.msra.mxu1 %v7603_v2  ;;  %2768 = vmatprep.subr.bf16.mxu0 %v7608_v10 }
 0x1a5   :  { %2823 = vmatprep.subr.bf16.mxu1 %v7611_v16 }
 0x1a7   :  { %2769 = vmatpush2.bf16.msra.mxu0 %v7606_v11 }
 0x1a8   :  { %2824 = vmatpush1.bf16.msra.mxu1 %v7609_v13  ;;  %2770 = vmatprep.subr.bf16.mxu0 %v7614_v21 }
 0x1a9   :  { %2825 = vmatprep.subr.bf16.mxu1 %v7617_v23 }
 0x1ab   :  { %2771 = vmatpush2.bf16.msra.mxu0 %v7612_v20 }
 0x1ac   :  { %2826 = vmatpush1.bf16.msra.mxu1 %v7615_v22  ;;  %2772 = vmatprep.subr.bf16.mxu0 %v7620_v29 }
 0x1ad   :  { %2827 = vmatprep.subr.bf16.mxu1 %v7623_v31 }
 0x1af   :  { %2773 = vmatpush2.bf16.msra.mxu0 %v7618_v25 }
 0x1b0   :  { %2828 = vmatpush2.bf16.msra.mxu1 %v7621_v30  ;;  %2774 = vmatprep.subr.bf16.mxu0 %v7626_v35 }
 0x1b1   :  { %2829 = vmatprep.subr.bf16.mxu1 %v7629_v36 }
 0x1b3   :  { %2775 = vmatpush2.bf16.msra.mxu0 %v7624_v32 }
 0x1b4   :  { %2830 = vmatpush2.bf16.msra.mxu1 %v7627_v18  ;;  %2776 = vmatprep.subr.bf16.mxu0 %v7632_v42 }
 0x1b5   :  { %2831 = vmatprep.subr.bf16.mxu1 %v7635_v44 }
 0x1b7   :  { %2777 = vmatpush2.bf16.msra.mxu0 %v7630_v39 }
 0x1b8   :  { %2832 = vmatpush2.bf16.msra.mxu1 %v7633_v43  ;;  %2778 = vmatprep.subr.bf16.mxu0 %v7638_v46 }
 0x1b9   :  { %2833 = vmatprep.subr.bf16.mxu1 %v7641_v49 }
 0x1bb   :  { %2779 = vmatpush2.bf16.msra.mxu0 %v7636_v45 }
 0x1bc   :  { %2834 = vmatpush2.bf16.msra.mxu1 %v7639_v48  ;;  %2780 = vmatprep.subr.bf16.mxu0 %v7644_v3 }
 0x1bd   :  { %2835 = vmatprep.subr.bf16.mxu1 %v7647_v38 }
 0x1bf   :  { %2781 = vmatpush2.bf16.msra.mxu0 %v7642_v50 }
 0x1c0   :  { %2836 = vmatpush2.bf16.msra.mxu1 %v7645_v33  ;;  %2872 = vmatprep.subr.bf16.mxu0 %v7650_v12 }
 0x1c1   :  { %2837 = vmatprep.subr.bf16.mxu1 %v7653_v24 }
 0x1c4   :  { %2838 = vmatpush2.bf16.msra.mxu1 %v7651_v17 }
 0x1c5   :  { %2839 = vmatprep.subr.bf16.mxu1 %v7659_v14 }
 0x1c8   :  { %2840 = vmatpush2.bf16.msra.mxu1 %v7657_v28 }
 0x1c9   :  { %2841 = vmatprep.subr.bf16.mxu1 %v7665_v15 }
 0x1cc   :  { %2842 = vmatpush2.bf16.msra.mxu1 %v7663_v19 }
 0x1cd   :  { %2933 = vmatprep.subr.bf16.mxu1 %v7671_v34 }
 0x202   :  { %v1622_v40 = vpop.f32.mrf.mxu0 }
 0x203   :  { %v1623_v58 = vadd.f32 %v1622_v40, %v941_v53 }
 0x204   :  { %v1624_v41 = vpop.f32.mrf.mxu0 }
 0x205   :  { %v1625_v61 = vadd.f32 %v1624_v41, %v945_v56 }
 0x206   :  { %v1626_v52 = vpop.f32.mrf.mxu0 }
 0x207   :  { %v1627_v44 = vadd.f32 %v1626_v52, %v941_v53 }
 0x208   :  { %v1628_v37 = vpop.f32.mrf.mxu0 }
 0x209   :  { %v1629_v49 = vadd.f32 %v1628_v37, %v945_v56 }
 0x20a   :  { %v1632_v54 = vpop.f32.mrf.mxu0 }
 0x20b   :  { %v1633_v6 = vadd.f32 %v1632_v54, %v941_v53 }
 0x20c   :  { %v1634_v57 = vpop.f32.mrf.mxu0 }
 0x20d   :  { %v1635_v10 = vadd.f32 %v1634_v57, %v945_v56 }
 0x20e   :  { %v1636_v59 = vpop.f32.mrf.mxu0 }
 0x20f   :  { %v1683_v60 = vpop.f32.mrf.mxu1  ;;  %v1637_v15 = vadd.f32 %v1636_v59, %v941_v53 }
 0x210   :  { %v1684_v55 = vadd.f32 %v1683_v60, %v1623_v58  ;;  %v1638_v62 = vpop.f32.mrf.mxu0 }
 0x211   :  { %v1685_v63 = vpop.f32.mrf.mxu1  ;;  %v1639_v19 = vadd.f32 %v1638_v62, %v945_v56 }
 0x212   :  { %v1686_v0 = vadd.f32 %v1685_v63, %v1625_v61  ;;  %v1642_v1 = vpop.f32.mrf.mxu0 }
 0x213   :  { %v1687_v47 = vpop.f32.mrf.mxu1  ;;  %v1643_v22 = vadd.f32 %v1642_v1, %v941_v53 }
 0x214   :  { %v1644_v2 = vpop.f32.mrf.mxu0  ;;  %v1688_v50 = vadd.f32 %v1687_v47, %v1627_v44 }
 0x215   :  { %v1689_v5 = vpop.f32.mrf.mxu1  ;;  %v1645_v34 = vadd.f32 %v1644_v2, %v945_v56 }
 0x216   :  { %v1646_v7 = vpop.f32.mrf.mxu0  ;;  %v1690_v17 = vadd.f32 %v1689_v5, %v1629_v49 }
 0x217   :  { %v1693_v9 = vpop.f32.mrf.mxu1 }
 0x218   :  { %v1694_v11 = vadd.f32 %v1693_v9, %v1633_v6  ;;  %v1647_v13 = vpop.f32.mrf.mxu0 }
 0x219   :  { %v1695_v16 = vpop.f32.mrf.mxu1 }
 0x21a   :  { %v1696_v20 = vadd.f32 %v1695_v16, %v1635_v10 }
 0x21b   :  { %v1697_v21 = vpop.f32.mrf.mxu1 }
 0x21c   :  { %v1698_v4 = vadd.f32 %v1697_v21, %v1637_v15 }
 0x21d   :  { %v1699_v23 = vpop.f32.mrf.mxu1 }
 0x21e   :  { %v1700_v37 = vadd.f32 %v1699_v23, %v1639_v19 }
 0x21f   :  { %v1703_v25 = vpop.f32.mrf.mxu1 }
 0x220   :  { %v1704_v29 = vadd.f32 %v1703_v25, %v1643_v22  ;;  %v7648_v25 = vld [vmem:[#allocation4 + $0x270] ss:$8 sps:$4 sm:$0xff]  }
 0x221   :  { %v1705_v30 = vpop.f32.mrf.mxu1 }
 0x222   :  { %v1706_v63 = vadd.f32 %v1705_v30, %v1645_v34 }
 0x223   :  { %v1707_v31 = vpop.f32.mrf.mxu1 }
 0x225   :  { %v1708_v32 = vpop.f32.mrf.mxu1 }
 0x242   :  { %v1744_v35 = vpop.f32.mrf.mxu0 }
 0x243   :  { %v1745_v45 = vadd.f32 %v1744_v35, %v1684_v55 }
 0x244   :  { %v1746_v18 = vpop.f32.mrf.mxu0 }
 0x245   :  { %v1747_v3 = vadd.f32 %v1746_v18, %v1686_v0 }
 0x246   :  { %v1748_v36 = vpop.f32.mrf.mxu0 }
 0x247   :  { %v1749_v24 = vadd.f32 %v1748_v36, %v1688_v50  ;;  %v7654_v50 = vld [vmem:[#allocation4 + $0x260] ss:$8 sps:$4 sm:$0xff]  }
 0x248   :  { %v1750_v39 = vpop.f32.mrf.mxu0 }
 0x249   :  { %v1751_v40 = vadd.f32 %v1750_v39, %v1690_v17 }
 0x24a   :  { %v1754_v42 = vpop.f32.mrf.mxu0 }
 0x24b   :  { %v1755_v54 = vadd.f32 %v1754_v42, %v1694_v11 }
 0x24c   :  { %v1756_v43 = vpop.f32.mrf.mxu0 }
 0x24d   :  { %v1757_v53 = vadd.f32 %v1756_v43, %v1696_v20 }
 0x24e   :  { %v1758_v46 = vpop.f32.mrf.mxu0 }
 0x24f   :  { %v1805_v48 = vpop.f32.mrf.mxu1  ;;  %v1759_v59 = vadd.f32 %v1758_v46, %v1698_v4 }
 0x250   :  { %v1806_v33 = vadd.f32 %v1805_v48, %v1745_v45  ;;  %v1760_v38 = vpop.f32.mrf.mxu0 }
 0x251   :  { %v1807_v12 = vpop.f32.mrf.mxu1  ;;  %v1761_v5 = vadd.f32 %v1760_v38, %v1700_v37  ;;  %v7660_v37 = vld [vmem:[#allocation4 + $0x250] ss:$8 sps:$4 sm:$0xff]  }
 0x252   :  { %v1808_v28 = vadd.f32 %v1807_v12, %v1747_v3  ;;  %v1764_v14 = vpop.f32.mrf.mxu0  ;;  %v1842_v8 = vmul.f32 0.2, %v1806_v33  ;;  %vm1832_vm15 = vcmp.ge.f32.partialorder %v1806_v33, 0.0 }
 0x253   :  { %v1809_v27 = vpop.f32.mrf.mxu1  ;;  %v1765_v7 = vadd.f32 %v1764_v14, %v1704_v29  ;;  %v7656_v29 = vld [vmem:[#allocation4 + $0x264] ss:$8 sps:$4 sm:$0xff]  }
 0x254   :  { %v1810_v41 = vadd.f32 %v1809_v27, %v1749_v24  ;;  %v1766_v52 = vpop.f32.mrf.mxu0  ;;  %v1843_v57 = vmul.f32 0.2, %v1808_v28  ;;  %vm1833_vm3 = vcmp.ge.f32.partialorder %v1808_v28, 0.0  ;;  %v1852_v56 = vsel %vm1832_vm15, %v1806_v33, %v1842_v8 }
 0x255   :  { %v1811_v58 = vpop.f32.mrf.mxu1  ;;  %v1767_v21 = vadd.f32 %v1766_v52, %v1706_v63 }
 0x256   :  { %vm1834_vm4 = vcmp.ge.f32.partialorder %v1810_v41, 0.0  ;;  %v1844_v60 = vmul.f32 0.2, %v1810_v41  ;;  %v1812_v61 = vadd.f32 %v1811_v58, %v1751_v40  ;;  %v1768_v55 = vpop.f32.mrf.mxu0  ;;  %v1853_v6 = vsel %vm1833_vm3, %v1808_v28, %v1843_v57  ;;  %v7662_v28 = vld [vmem:[#allocation4 + $0x254] ss:$8 sps:$4 sm:$0xff]  }
 0x257   :  { %v1815_v62 = vpop.f32.mrf.mxu1  ;;  %v7668_v55 = vld [vmem:[#allocation4 + $0x244] ss:$8 sps:$4 sm:$0xff]  }
 0x258   :  { %v1854_v0 = vsel %vm1834_vm4, %v1810_v41, %v1844_v60  ;;  %vm1835_vm5 = vcmp.ge.f32.partialorder %v1812_v61, 0.0  ;;  %v1845_v1 = vmul.f32 0.2, %v1812_v61  ;;  %v1816_v47 = vadd.f32 %v1815_v62, %v1755_v54  ;;  %v1769_v2 = vpop.f32.mrf.mxu0 }
 0x259   :  { %v8645_v9 = vpack.c.bf16 %v1854_v0, %v1852_v56  ;;  %v1817_v10 = vpop.f32.mrf.mxu1 }
 0x25a   :  { %v1855_v11 = vsel %vm1835_vm5, %v1812_v61, %v1845_v1  ;;  %vm1836_vm6 = vcmp.ge.f32.partialorder %v1816_v47, 0.0  ;;  %v1846_v13 = vmul.f32 0.2, %v1816_v47  ;;  %v1818_v16 = vadd.f32 %v1817_v10, %v1757_v53 }
 0x25b   :  { %v1871_v20 = vshll.u32 %v8645_v9, 16  ;;  %v8648_v22 = vpack.c.bf16 %v1855_v11, %v1853_v6  ;;  %v1819_v23 = vpop.f32.mrf.mxu1  ;;  %v1869_v30 = vshrl.u32 %v8645_v9, 16  ;;  %v1926_v35 = vrot.slane %v8645_v9, 1  ;;  %v7669_v11 = vld [vmem:[#allocation4 + $0x370] ss:$8 sps:$4 sm:$0xff]  }
 0x25c   :  { %vm1837_vm7 = vcmp.ge.f32.partialorder %v1818_v16, 0.0  ;;  %v1847_v31 = vmul.f32 0.2, %v1818_v16  ;;  %v1820_v32 = vadd.f32 %v1819_v23, %v1759_v59  ;;  %v1856_v18 = vsel %vm1836_vm6, %v1816_v47, %v1846_v13 }
 0x25d   :  { %v1821_v36 = vpop.f32.mrf.mxu1  ;;  %2782 = vmatprep.mubr.bf16.mxu0 %v8648_v22  ;;  %v1881_v39 = vshrl.u32 %v8648_v22, 16  ;;  %v1883_v42 = vshll.u32 %v8648_v22, 16  ;;  %v1873_v43 = vrot.slane %v1871_v20, 1  ;;  %v1929_v46 = vrot.slane %v8648_v22, 1 }
 0x25e   :  { %vm1838_vm8 = vcmp.ge.f32.partialorder %v1820_v32, 0.0  ;;  %v1848_v44 = vmul.f32 0.2, %v1820_v32  ;;  %v1822_v45 = vadd.f32 %v1821_v36, %v1761_v5  ;;  %2783 = vmatmul.mubr.bf16.vlgmr.msra.gmra.mxu0 %v8645_v9  ;;  %v1857_v48 = vsel %vm1837_vm7, %v1818_v16, %v1847_v31  ;;  %v7677_v31 = vld [vmem:[#allocation4 + $0x364] ss:$8 sps:$4 sm:$0xff]  }
 0x25f   :  { %2873 = vmatpush1.bf16.msra.mxu0 %v7648_v25  ;;  %v1825_v49 = vpop.f32.mrf.mxu1  ;;  %v1885_v3 = vrot.slane %v1883_v42, 1  ;;  %v8660_v33 = vrot.slane %v1881_v39, 1  ;;  %v8662_v38 = vrot.slane %v1883_v42, 2  ;;  %v1874_v34 = vor.u32 %v1873_v43, %v1869_v30  ;;  %v7672_v42 = vld [vmem:[#allocation4 + $0x230] ss:$8 sps:$4 sm:$0xff]  }
 0x260   :  { %v1858_v12 = vsel %vm1838_vm8, %v1820_v32, %v1848_v44  ;;  %vm1839_vm9 = vcmp.ge.f32.partialorder %v1822_v45, 0.0  ;;  %v1849_v17 = vmul.f32 0.2, %v1822_v45  ;;  %v1826_v24 = vadd.f32 %v1825_v49, %v1765_v7  ;;  %2874 = vmatprep.subr.bf16.mxu0 %v7656_v29  ;;  %v7666_v7 = vld [vmem:[#allocation4 + $0x240] ss:$8 sps:$4 sm:$0xff]  }
 0x261   :  { %v8664_v14 = vpack.c.bf16 %v1858_v12, %v1856_v18  ;;  %v1827_v15 = vpop.f32.mrf.mxu1  ;;  %v1886_v19 = vor.u32 %v1885_v3, %v1881_v39  ;;  %v1951_v8 = vor.u32 %v8662_v38, %v8660_v33  ;;  %v8673_v63 = vrot.slane %v1869_v30, 1  ;;  %v7680_v49 = vld [vmem:[#allocation4 + $0x224] ss:$8 sps:$4 sm:$0xff]   ;;  %v7686_v33 = vld [vmem:[#allocation4 + $0x214] ss:$8 sps:$4 sm:$0xff]  }
 0x262   :  { %v1859_v27 = vsel %vm1839_vm9, %v1822_v45, %v1849_v17  ;;  %vm1840_vm10 = vcmp.ge.f32.partialorder %v1826_v24, 0.0  ;;  %v1850_v40 = vmul.f32 0.2, %v1826_v24  ;;  %v1828_v41 = vadd.f32 %v1827_v15, %v1767_v21  ;;  %v7674_v21 = vld [vmem:[#allocation4 + $0x234] ss:$8 sps:$4 sm:$0xff]  }
 0x263   :  { %v8668_v52 = vpack.c.bf16 %v1859_v27, %v1857_v48  ;;  %2875 = vmatpush1.bf16.msra.mxu0 %v7654_v50  ;;  %v1829_v4 = vpop.f32.mrf.mxu1  ;;  %v1876_v54 = vshll.u32 %v8664_v14, 16  ;;  %v1892_v57 = vshrl.u32 %v8664_v14, 16  ;;  %v1927_v58 = vrot.slane %v8664_v14, 1  ;;  %v7675_v48 = vld [vmem:[#allocation4 + $0x360] ss:$8 sps:$4 sm:$0xff]  }
 0x264   :  { %v1860_v60 = vsel %vm1840_vm10, %v1826_v24, %v1850_v40  ;;  %vm1841_vm11 = vcmp.ge.f32.partialorder %v1828_v41, 0.0  ;;  %v1851_v61 = vmul.f32 0.2, %v1828_v41  ;;  %2876 = vmatprep.subr.bf16.mxu0 %v7662_v28  ;;  %v1943_v5 = vrot.slane %v1871_v20, 2  ;;  %v7683_v28 = vld [vmem:[#allocation4 + $0x354] ss:$8 sps:$4 sm:$0xff]  }
 0x265   :  { %v8675_v53 = vpack.c.bf16 %v1860_v60, %v1860_v60  ;;  %v1830_v59 = vpop.f32.mrf.mxu1  ;;  %2792 = vmatprep.mubr.bf16.mxu0 %v8668_v52  ;;  %v1888_v56 = vshll.u32 %v8668_v52, 16  ;;  %v1878_v62 = vrot.slane %v1876_v54, 1  ;;  %v1900_v0 = vshrl.u32 %v8668_v52, 16  ;;  %v7689_v38 = vld [vmem:[#allocation4 + $0x344] ss:$8 sps:$4 sm:$0xff]  }
 0x266   :  { %v1861_v1 = vsel %vm1841_vm11, %v1828_v41, %v1851_v61  ;;  %2793 = vmatmul.mubr.bf16.gmra.mxu0 %v8664_v14  ;;  %v1930_v47 = vrot.slane %v8668_v52, 1  ;;  %v8683_v2 = vsel %vm130_vm2, %v1926_v35, %v1927_v58  ;;  %v1945_v16 = vrot.slane %v1892_v57, 1  ;;  %v7678_v41 = vld [vmem:[#allocation4 + $0x220] ss:$8 sps:$4 sm:$0xff]   ;;  %v7681_v52 = vld [vmem:[#allocation4 + $0x350] ss:$8 sps:$4 sm:$0xff]  }
 0x267   :  { %v8687_v6 = vpack.c.bf16 %v1861_v1, %v1861_v1  ;;  %2877 = vmatpush1.bf16.msra.mxu0 %v7660_v37  ;;  %v1890_v10 = vrot.slane %v1888_v56, 1  ;;  %v1879_v13 = vsel %vm100_vm0, %v1874_v34, %v1878_v62  ;;  %v1896_v23 = vshll.u32 %v8675_v53, 16  ;;  %v7684_v60 = vld [vmem:[#allocation4 + $0x210] ss:$8 sps:$4 sm:$0xff]   ;;  %v7687_v61 = vld [vmem:[#allocation4 + $0x340] ss:$8 sps:$4 sm:$0xff]  }
 0x268   :  { %2878 = vmatprep.subr.bf16.mxu0 %v7668_v55  ;;  %v1931_v22 = vsel %vm130_vm2, %v1929_v46, %v1930_v47  ;;  %v1908_v25 = vshrl.u32 %v8675_v53, 16  ;;  %v1952_v30 = vrot.slane %v1900_v0, 1  ;;  %v1894_v32 = vor.u32 %v1892_v57, %v1878_v62  ;;  %v7692_v55 = vld [vmem:[#allocation4 + $0x204] ss:$8 sps:$4 sm:$0xff]   ;;  %v7690_v59 = vld [vmem:[#allocation4 + $0x200] ss:$8 sps:$4 sm:$0xff]  }
 0x269   :  { %2802 = vmatprep.mubr.bf16.mxu0 %v8687_v6  ;;  %v1891_v9 = vsel %vm100_vm0, %v1886_v19, %v1890_v10  ;;  %v1904_v20 = vshll.u32 %v8687_v6, 16  ;;  %v1911_v29 = vshrl.u32 %v8687_v6, 16  ;;  %v1902_v35 = vor.u32 %v1900_v0, %v1890_v10  ;;  %v7698_v0 = vld [vmem:[#allocation4 + $0x2f4] ss:$8 sps:$4 sm:$0xff]   ;;  %v7701_v1 = vld [vmem:[#allocation4 + $0x324] ss:$8 sps:$4 sm:$0xff]  }
 0x26a   :  { %2843 = vmatprep.mubr.bf16.mxu1 %v1891_v9  ;;  %v1898_v18 = vrot.slane %v1896_v23, 1  ;;  %v1953_v36 = vrot.slane %v1888_v56, 2  ;;  %v1934_v39 = vrot.slane %v8687_v6, 1  ;;  %v1956_v44 = vrot.slane %v1908_v25, 1  ;;  %v7693_v56 = vld [vmem:[#allocation4 + $0x330] ss:$8 sps:$4 sm:$0xff]  }
 0x26b   :  { %2879 = vmatpush1.bf16.msra.mxu0 %v7666_v7  ;;  %2844 = vmatmul.mubr.bf16.vlgmr.msra.gmra.mxu1 %v1879_v13  ;;  %v1906_v43 = vrot.slane %v1904_v20, 1  ;;  %v1932_v45 = vrot.slane %v8675_v53, 1  ;;  %v1944_v46 = vor.u32 %v1943_v5, %v8673_v63  ;;  %v1960_v3 = vrot.slane %v1911_v29, 1  ;;  %v7695_v63 = vld [vmem:[#allocation4 + $0x334] ss:$8 sps:$4 sm:$0xff]  }
 0x26c   :  { %2934 = vmatpush1.bf16.msra.mxu1 %v7669_v11  ;;  %2880 = vmatprep.subr.bf16.mxu0 %v7674_v21  ;;  %v1899_v50 = vsel %vm100_vm0, %v1894_v32, %v1898_v18  ;;  %v1954_v12 = vor.u32 %v1953_v36, %v1952_v30  ;;  %v1946_v17 = vrot.slane %v1876_v54, 2  ;;  %v8707_v14 = vsel %vm130_vm2, %v1930_v47, %v1934_v39  ;;  %v7696_v47 = vld [vmem:[#allocation4 + $0x2f0] ss:$8 sps:$4 sm:$0xff]   ;;  %v7699_v5 = vld [vmem:[#allocation4 + $0x320] ss:$8 sps:$4 sm:$0xff]  }
 0x26d   :  { %v1907_v24 = vsel %vm100_vm0, %v1902_v35, %v1906_v43  ;;  %2935 = vmatprep.subr.bf16.mxu1 %v7677_v31  ;;  %v8712_v15 = vsel %vm130_vm2, %v1927_v58, %v1932_v45  ;;  %v1961_v27 = vrot.slane %v1904_v20, 2  ;;  %v1957_v40 = vrot.slane %v1896_v23, 2  ;;  %v7704_v7 = vld [vmem:[#allocation4 + $0x2e4] ss:$8 sps:$4 sm:$0xff]   ;;  %v7707_v10 = vld [vmem:[#allocation4 + $0x314] ss:$8 sps:$4 sm:$0xff]  }
 0x26e   :  { %2803 = vmatmul.mubr.bf16.gmra.mxu0 %v8675_v53  ;;  %2853 = vmatprep.mubr.bf16.mxu1 %v1907_v24  ;;  %v1955_v19 = vsel %vm139_vm1, %v1951_v8, %v1954_v12  ;;  %v1947_v34 = vor.u32 %v1946_v17, %v1945_v16  ;;  %v1913_v8 = vor.u32 %v1911_v29, %v1906_v43  ;;  %v7702_v11 = vld [vmem:[#allocation4 + $0x2e0] ss:$8 sps:$4 sm:$0xff]   ;;  %v7705_v13 = vld [vmem:[#allocation4 + $0x310] ss:$8 sps:$4 sm:$0xff]   ;;  %v7710_v16 = vld [vmem:[#allocation4 + $0x2d4] ss:$8 sps:$4 sm:$0xff]  }
 0x26f   :  { %2881 = vmatpush1.bf16.msra.mxu0 %v7672_v42  ;;  %2904 = vmatprep.mubr.bf16.mxu0 %v1931_v22  ;;  %v8722_v37 = vor.u32 %v1961_v27, %v1960_v3  ;;  %v8724_v54 = vor.u32 %v1957_v40, %v1956_v44  ;;  %v1910_v62 = vor.u32 %v1908_v25, %v1898_v18  ;;  %v7713_v21 = vld [vmem:[#allocation4 + $0x304] ss:$8 sps:$4 sm:$0xff]   ;;  %v7708_v22 = vld [vmem:[#allocation4 + $0x2d0] ss:$8 sps:$4 sm:$0xff]   ;;  %v7711_v23 = vld [vmem:[#allocation4 + $0x300] ss:$8 sps:$4 sm:$0xff]  }
 0x270   :  { %2936 = vmatpush1.bf16.msra.mxu1 %v7675_v48  ;;  %2882 = vmatprep.subr.bf16.mxu0 %v7680_v49  ;;  %v8720_v4 = vsel %vm139_vm1, %v1944_v46, %v1947_v34  ;;  %v7716_v25 = vld [vmem:[#allocation4 + $0x2c4] ss:$8 sps:$4 sm:$0xff]   ;;  %v7719_v30 = vld [vmem:[#allocation4 + $0x3f4] ss:$8 sps:$4 sm:$0xff]   ;;  %v7714_v9 = vld [vmem:[#allocation4 + $0x2c0] ss:$8 sps:$4 sm:$0xff]  }
 0x271   :  { %2937 = vmatprep.subr.bf16.mxu1 %v7683_v28  ;;  %v8728_v57 = vsel %vm139_vm1, %v1954_v12, %v8722_v37  ;;  %v8732_v58 = vsel %vm139_vm1, %v1947_v34, %v8724_v54  ;;  %v7717_v20 = vld [vmem:[#allocation4 + $0x3f0] ss:$8 sps:$4 sm:$0xff]   ;;  %v7722_v31 = vld [vmem:[#allocation4 + $0x2b4] ss:$8 sps:$4 sm:$0xff]   ;;  %v7725_v32 = vld [vmem:[#allocation4 + $0x3e4] ss:$8 sps:$4 sm:$0xff]  }
 0x272   :  { %v7720_v29 = vld [vmem:[#allocation4 + $0x2b0] ss:$8 sps:$4 sm:$0xff]   ;;  %v7723_v35 = vld [vmem:[#allocation4 + $0x3e0] ss:$8 sps:$4 sm:$0xff]   ;;  %v7728_v18 = vld [vmem:[#allocation4 + $0x2a4] ss:$8 sps:$4 sm:$0xff]  }
 0x273   :  { %2883 = vmatpush1.bf16.msra.mxu0 %v7678_v41  ;;  %2854 = vmatmul.mubr.bf16.gmra.mxu1 %v1899_v50  ;;  %v7731_v36 = vld [vmem:[#allocation4 + $0x3d4] ss:$8 sps:$4 sm:$0xff]   ;;  %v7726_v42 = vld [vmem:[#allocation4 + $0x2a0] ss:$8 sps:$4 sm:$0xff]   ;;  %v7729_v43 = vld [vmem:[#allocation4 + $0x3d0] ss:$8 sps:$4 sm:$0xff]  }
 0x274   :  { %2938 = vmatpush1.bf16.msra.mxu1 %v7681_v52  ;;  %2863 = vmatprep.mubr.bf16.mxu1 %v1913_v8  ;;  %v7734_v44 = vld [vmem:[#allocation4 + $0x294] ss:$8 sps:$4 sm:$0xff]   ;;  %v7737_v46 = vld [vmem:[#allocation4 + $0x3c4] ss:$8 sps:$4 sm:$0xff]   ;;  %v7732_v48 = vld [vmem:[#allocation4 + $0x290] ss:$8 sps:$4 sm:$0xff]  }
 0x275   :  { %2884 = vmatprep.subr.bf16.mxu0 %v7686_v33  ;;  %2939 = vmatprep.subr.bf16.mxu1 %v7689_v38  ;;  %v7735_v49 = vld [vmem:[#allocation4 + $0x3c0] ss:$8 sps:$4 sm:$0xff]   ;;  %v7740_v50 = vld [vmem:[#allocation4 + $0x284] ss:$8 sps:$4 sm:$0xff]   ;;  %v7743_v3 = vld [vmem:[#allocation4 + $0x3b4] ss:$8 sps:$4 sm:$0xff]  }
 0x276   :  { %v7738_v12 = vld [vmem:[#allocation4 + $0x280] ss:$8 sps:$4 sm:$0xff]   ;;  %v7741_v17 = vld [vmem:[#allocation4 + $0x3b0] ss:$8 sps:$4 sm:$0xff]   ;;  %v7746_v24 = vld [vmem:[#allocation4 + $0x3a4] ss:$8 sps:$4 sm:$0xff]  }
 0x277   :  { %2885 = vmatpush1.bf16.msra.mxu0 %v7684_v60  ;;  %v7744_v28 = vld [vmem:[#allocation4 + $0x3a0] ss:$8 sps:$4 sm:$0xff]   ;;  %v7747_v34 = vld [vmem:[#allocation4 + $0x390] ss:$8 sps:$4 sm:$0xff]   ;;  %v7752_v27 = vld [vmem:[#allocation4 + $0x384] ss:$8 sps:$4 sm:$0xff]  }
 0x278   :  { %2940 = vmatpush1.bf16.msra.mxu1 %v7687_v61  ;;  %2886 = vmatprep.subr.bf16.mxu0 %v7692_v55  ;;  %v7750_v40 = vld [vmem:[#allocation4 + $0x380] ss:$8 sps:$4 sm:$0xff]   ;;  %v7761_v41 = vld [vmem:[#allocation6 + $0x54] ss:$8 sps:$4 sm:$0xff]   ;;  %v7764_v52 = vld [vmem:[#allocation6 + $0x44] ss:$8 sps:$4 sm:$0xff]  }
 0x279   :  { %2941 = vmatprep.subr.bf16.mxu1 %v7695_v63  ;;  %v7756_v6 = vld [vmem:[#allocation6 + $0x60] ss:$8 sps:$4 sm:$0xff]   ;;  %v7765_v53 = vld [vmem:[#allocation6 + $0x170] ss:$8 sps:$4 sm:$0xff]   ;;  %v7773_v33 = vld [vmem:[#allocation6 + $0x164] ss:$8 sps:$4 sm:$0xff]  }
 0x27a   :  { %v7771_v38 = vld [vmem:[#allocation6 + $0x160] ss:$8 sps:$4 sm:$0xff]   ;;  %v7768_v8 = vld [vmem:[#allocation6 + $0x30] ss:$8 sps:$4 sm:$0xff]   ;;  %v7785_v60 = vld [vmem:[#allocation6 + $0x144] ss:$8 sps:$4 sm:$0xff]  }
 0x27b   :  { %2887 = vmatpush1.bf16.msra.mxu0 %v7690_v59  ;;  %2864 = vmatmul.mubr.bf16.gmra.mxu1 %v1910_v62  ;;  %v7774_v61 = vld [vmem:[#allocation6 + $0x20] ss:$8 sps:$4 sm:$0xff]   ;;  %v7782_v55 = vld [vmem:[#allocation6 + $0x14] ss:$8 sps:$4 sm:$0xff]   ;;  %v7788_v62 = vld [vmem:[#allocation6 + $0x4] ss:$8 sps:$4 sm:$0xff]  }
 0x27c   :  { %2942 = vmatpush1.bf16.msra.mxu1 %v7693_v56  ;;  %2965 = vmatprep.mubr.bf16.mxu1 %v1955_v19  ;;  %v7749_v19 = vld [vmem:[#allocation4 + $0x394] ss:$8 sps:$4 sm:$0xff]   ;;  %v7783_v63 = vld [vmem:[#allocation6 + $0x140] ss:$8 sps:$4 sm:$0xff]   ;;  %v7780_v56 = vld [vmem:[#allocation6 + $0x10] ss:$8 sps:$4 sm:$0xff]  }
 0x27d   :  { %2888 = vmatprep.subr.bf16.mxu0 %v7698_v0  ;;  %2943 = vmatprep.subr.bf16.mxu1 %v7701_v1  ;;  %v7791_v59 = vld [vmem:[#allocation6 + $0x134] ss:$8 sps:$4 sm:$0xff]   ;;  %v7789_v0 = vld [vmem:[#allocation6 + $0x130] ss:$8 sps:$4 sm:$0xff]   ;;  %v7797_v1 = vld [vmem:[#allocation6 + $0x124] ss:$8 sps:$4 sm:$0xff]  }
 0x27f   :  { %2889 = vmatpush2.bf16.msra.mxu0 %v7696_v47  ;;  %v7786_v47 = vld [vmem:[#allocation6] ss:$8 sps:$4 sm:$0xff]  }
 0x280   :  { %2944 = vmatpush1.bf16.msra.mxu1 %v7699_v5  ;;  %2890 = vmatprep.subr.bf16.mxu0 %v7704_v7  ;;  %v7794_v5 = vld [vmem:[#allocation6 + $0xf4] ss:$8 sps:$4 sm:$0xff]   ;;  %v7795_v7 = vld [vmem:[#allocation6 + $0x120] ss:$8 sps:$4 sm:$0xff]  }
 0x281   :  { %2945 = vmatprep.subr.bf16.mxu1 %v7707_v10  ;;  %v7792_v10 = vld [vmem:[#allocation6 + $0xf0] ss:$8 sps:$4 sm:$0xff]  }
 0x283   :  { %2891 = vmatpush2.bf16.msra.mxu0 %v7702_v11  ;;  %v7800_v11 = vld [vmem:[#allocation6 + $0xe4] ss:$8 sps:$4 sm:$0xff]  }
 0x284   :  { %2946 = vmatpush1.bf16.msra.mxu1 %v7705_v13  ;;  %2892 = vmatprep.subr.bf16.mxu0 %v7710_v16  ;;  %v7798_v13 = vld [vmem:[#allocation6 + $0xe0] ss:$8 sps:$4 sm:$0xff]   ;;  %v7801_v16 = vld [vmem:[#allocation6 + $0x110] ss:$8 sps:$4 sm:$0xff]  }
 0x285   :  { %2947 = vmatprep.subr.bf16.mxu1 %v7713_v21  ;;  %v7803_v21 = vld [vmem:[#allocation6 + $0x114] ss:$8 sps:$4 sm:$0xff]  }
 0x287   :  { %2893 = vmatpush2.bf16.msra.mxu0 %v7708_v22  ;;  %v7804_v22 = vld [vmem:[#allocation6 + $0xd0] ss:$8 sps:$4 sm:$0xff]  }
 0x288   :  { %2948 = vmatpush1.bf16.msra.mxu1 %v7711_v23  ;;  %2894 = vmatprep.subr.bf16.mxu0 %v7716_v25  ;;  %v7806_v23 = vld [vmem:[#allocation6 + $0xd4] ss:$8 sps:$4 sm:$0xff]   ;;  %v7807_v25 = vld [vmem:[#allocation6 + $0x100] ss:$8 sps:$4 sm:$0xff]  }
 0x289   :  { %2949 = vmatprep.subr.bf16.mxu1 %v7719_v30  ;;  %v7809_v30 = vld [vmem:[#allocation6 + $0x104] ss:$8 sps:$4 sm:$0xff]  }
 0x28b   :  { %2895 = vmatpush2.bf16.msra.mxu0 %v7714_v9  ;;  %v7810_v9 = vld [vmem:[#allocation6 + $0xc0] ss:$8 sps:$4 sm:$0xff]  }
 0x28c   :  { %2950 = vmatpush2.bf16.msra.mxu1 %v7717_v20  ;;  %2896 = vmatprep.subr.bf16.mxu0 %v7722_v31  ;;  %v7812_v20 = vld [vmem:[#allocation6 + $0xc4] ss:$8 sps:$4 sm:$0xff]   ;;  %v7813_v31 = vld [vmem:[#allocation6 + $0x1f0] ss:$8 sps:$4 sm:$0xff]  }
 0x28d   :  { %2951 = vmatprep.subr.bf16.mxu1 %v7725_v32  ;;  %v7815_v32 = vld [vmem:[#allocation6 + $0x1f4] ss:$8 sps:$4 sm:$0xff]  }
 0x28f   :  { %2897 = vmatpush2.bf16.msra.mxu0 %v7720_v29  ;;  %v7816_v29 = vld [vmem:[#allocation6 + $0xb0] ss:$8 sps:$4 sm:$0xff]  }
 0x290   :  { %2952 = vmatpush2.bf16.msra.mxu1 %v7723_v35  ;;  %2898 = vmatprep.subr.bf16.mxu0 %v7728_v18  ;;  %v7818_v35 = vld [vmem:[#allocation6 + $0xb4] ss:$8 sps:$4 sm:$0xff]   ;;  %v7819_v18 = vld [vmem:[#allocation6 + $0x1e0] ss:$8 sps:$4 sm:$0xff]  }
 0x291   :  { %2953 = vmatprep.subr.bf16.mxu1 %v7731_v36  ;;  %v7821_v36 = vld [vmem:[#allocation6 + $0x1e4] ss:$8 sps:$4 sm:$0xff]  }
 0x293   :  { %2899 = vmatpush2.bf16.msra.mxu0 %v7726_v42  ;;  %v7822_v42 = vld [vmem:[#allocation6 + $0xa0] ss:$8 sps:$4 sm:$0xff]  }
 0x294   :  { %2954 = vmatpush2.bf16.msra.mxu1 %v7729_v43  ;;  %2900 = vmatprep.subr.bf16.mxu0 %v7734_v44  ;;  %v7824_v43 = vld [vmem:[#allocation6 + $0xa4] ss:$8 sps:$4 sm:$0xff]   ;;  %v7825_v44 = vld [vmem:[#allocation6 + $0x1d0] ss:$8 sps:$4 sm:$0xff]  }
 0x295   :  { %2955 = vmatprep.subr.bf16.mxu1 %v7737_v46  ;;  %v7827_v46 = vld [vmem:[#allocation6 + $0x1d4] ss:$8 sps:$4 sm:$0xff]  }
 0x297   :  { %2901 = vmatpush2.bf16.msra.mxu0 %v7732_v48  ;;  %v7828_v48 = vld [vmem:[#allocation6 + $0x90] ss:$8 sps:$4 sm:$0xff]  }
 0x298   :  { %2956 = vmatpush2.bf16.msra.mxu1 %v7735_v49  ;;  %2902 = vmatprep.subr.bf16.mxu0 %v7740_v50  ;;  %v7830_v49 = vld [vmem:[#allocation6 + $0x94] ss:$8 sps:$4 sm:$0xff]   ;;  %v7831_v50 = vld [vmem:[#allocation6 + $0x1c0] ss:$8 sps:$4 sm:$0xff]  }
 0x299   :  { %2957 = vmatprep.subr.bf16.mxu1 %v7743_v3  ;;  %v7833_v3 = vld [vmem:[#allocation6 + $0x1c4] ss:$8 sps:$4 sm:$0xff]  }
 0x29b   :  { %2903 = vmatpush2.bf16.msra.mxu0 %v7738_v12  ;;  %v7834_v12 = vld [vmem:[#allocation6 + $0x80] ss:$8 sps:$4 sm:$0xff]  }
 0x29c   :  { %2958 = vmatpush2.bf16.msra.mxu1 %v7741_v17  ;;  %v7836_v17 = vld [vmem:[#allocation6 + $0x84] ss:$8 sps:$4 sm:$0xff]  }
 0x29d   :  { %2959 = vmatprep.subr.bf16.mxu1 %v7746_v24  ;;  %v7837_v24 = vld [vmem:[#allocation6 + $0x1b0] ss:$8 sps:$4 sm:$0xff]  }
 0x29e   :  { %2905 = vmatmul.mubr.bf16.vlgmr.msra.gmra.mxu0 %v8683_v2  ;;  %v7753_v2 = vld [vmem:[#allocation6 + $0x70] ss:$8 sps:$4 sm:$0xff]  }
 0x29f   :  { %2914 = vmatprep.mubr.bf16.mxu0 %v8707_v14  ;;  %v7755_v14 = vld [vmem:[#allocation6 + $0x74] ss:$8 sps:$4 sm:$0xff]  }
 0x2a0   :  { %2960 = vmatpush2.bf16.msra.mxu1 %v7744_v28  ;;  %3912 = vmatprep.subr.bf16.mxu0 %v7755_v14  ;;  %v7839_v28 = vld [vmem:[#allocation6 + $0x1b4] ss:$8 sps:$4 sm:$0xff]   ;;  %v7857_v14 = vld [vmem:[#allocation6 + $0x184] ss:$8 sps:$4 sm:$0xff]  }
 0x2a1   :  { %2961 = vmatprep.subr.bf16.mxu1 %v7749_v19  ;;  %3913 = vmatpush1.bf16.msra.mxu0 %v7753_v2  ;;  %v7842_v19 = vld [vmem:[#allocation6 + $0x274] ss:$8 sps:$4 sm:$0xff]  }
 0x2a2   :  { %v7851_v2 = vld [vmem:[#allocation6 + $0x194] ss:$8 sps:$4 sm:$0xff]  }
 0x2a4   :  { %2962 = vmatpush2.bf16.msra.mxu1 %v7747_v34  ;;  %v7843_v34 = vld [vmem:[#allocation6 + $0x1a0] ss:$8 sps:$4 sm:$0xff]  }
 0x2a5   :  { %2963 = vmatprep.subr.bf16.mxu1 %v7752_v27  ;;  %v7845_v27 = vld [vmem:[#allocation6 + $0x1a4] ss:$8 sps:$4 sm:$0xff]  }
 0x2a6   :  { %2915 = vmatmul.mubr.bf16.gmra.mxu0 %v8712_v15  ;;  %v7759_v15 = vld [vmem:[#allocation6 + $0x50] ss:$8 sps:$4 sm:$0xff]  }
 0x2a7   :  { %2924 = vmatprep.mubr.bf16.mxu0 %v1934_v39  ;;  %v7758_v39 = vld [vmem:[#allocation6 + $0x64] ss:$8 sps:$4 sm:$0xff]  }
 0x2a8   :  { %2964 = vmatpush2.bf16.msra.mxu1 %v7750_v40  ;;  %3914 = vmatprep.subr.bf16.mxu0 %v7758_v39  ;;  %v7849_v40 = vld [vmem:[#allocation6 + $0x190] ss:$8 sps:$4 sm:$0xff]   ;;  %v7863_v39 = vld [vmem:[#allocation6 + $0x374] ss:$8 sps:$4 sm:$0xff]  }
 0x2a9   :  { %3915 = vmatpush1.bf16.msra.mxu0 %v7756_v6  ;;  %v7855_v6 = vld [vmem:[#allocation6 + $0x180] ss:$8 sps:$4 sm:$0xff]  }
 0x2aa   :  { %3916 = vmatprep.subr.bf16.mxu0 %v7761_v41 }
 0x2ab   :  { %2966 = vmatmul.mubr.bf16.vlgmr.msra.gmra.mxu1 %v8720_v4  ;;  %v7762_v4 = vld [vmem:[#allocation6 + $0x40] ss:$8 sps:$4 sm:$0xff]  }
 0x2ac   :  { %2975 = vmatprep.mubr.bf16.mxu1 %v8728_v57  ;;  %v7776_v57 = vld [vmem:[#allocation6 + $0x24] ss:$8 sps:$4 sm:$0xff]  }
 0x2ad   :  { %3917 = vmatpush1.bf16.msra.mxu0 %v7759_v15 }
 0x2ae   :  { %2925 = vmatmul.mubr.bf16.gmra.mxu0 %v1932_v45  ;;  %v7767_v45 = vld [vmem:[#allocation6 + $0x174] ss:$8 sps:$4 sm:$0xff]   ;;  %3918 = vmatprep.subr.bf16.mxu0 %v7764_v52 }
 0x2af   :  { %3973 = vmatprep.subr.bf16.mxu1 %v7767_v45 }
 0x2b0   :  { %3974 = vmatpush1.bf16.msra.mxu1 %v7765_v53  ;;  %v2098_v53 = vld [vmem:[%s9143_s6] sm:$0x3] }
 0x2b1   :  { %3975 = vmatprep.subr.bf16.mxu1 %v7773_v33  ;;  %3919 = vmatpush1.bf16.msra.mxu0 %v7762_v4  ;;  %v2103_v4 = vrot.slane %v2098_v53, %v8634_v51 }
 0x2b3   :  { %2976 = vmatmul.mubr.bf16.gmra.mxu1 %v8732_v58  ;;  %v7777_v58 = vld [vmem:[#allocation6 + $0x150] ss:$8 sps:$4 sm:$0xff]  }
 0x2b4   :  { %2985 = vmatprep.mubr.bf16.mxu1 %v8722_v37  ;;  %v7770_v37 = vld [vmem:[#allocation6 + $0x34] ss:$8 sps:$4 sm:$0xff]   ;;  %3976 = vmatpush1.bf16.msra.mxu1 %v7771_v38 }
 0x2b5   :  { %3920 = vmatprep.subr.bf16.mxu0 %v7770_v37  ;;  %v2107_v37 = vrot.slane %v2098_v53, %v8639_v26 }
 0x2b6   :  { %3921 = vmatpush1.bf16.msra.mxu0 %v7768_v8 }
 0x2b7   :  { %3922 = vmatprep.subr.bf16.mxu0 %v7776_v57 }
 0x2ba   :  { %3923 = vmatpush1.bf16.msra.mxu0 %v7774_v61 }
 0x2bb   :  { %2986 = vmatmul.mubr.bf16.gmra.mxu1 %v8724_v54  ;;  %v7779_v54 = vld [vmem:[#allocation6 + $0x154] ss:$8 sps:$4 sm:$0xff]   ;;  %3924 = vmatprep.subr.bf16.mxu0 %v7782_v55 }
 0x2bc   :  { %3977 = vmatprep.subr.bf16.mxu1 %v7779_v54 }
 0x2bd   :  { %3978 = vmatpush1.bf16.msra.mxu1 %v7777_v58 }
 0x2be   :  { %3979 = vmatprep.subr.bf16.mxu1 %v7785_v60  ;;  %3925 = vmatpush1.bf16.msra.mxu0 %v7780_v56 }
 0x2bf   :  { %3926 = vmatprep.subr.bf16.mxu0 %v7788_v62 }
 0x2c1   :  { %3980 = vmatpush1.bf16.msra.mxu1 %v7783_v63 }
 0x2c2   :  { %3981 = vmatprep.subr.bf16.mxu1 %v7791_v59  ;;  %3927 = vmatpush1.bf16.msra.mxu0 %v7786_v47 }
 0x2c3   :  { %3928 = vmatprep.subr.bf16.mxu0 %v7794_v5 }
 0x2c5   :  { %3982 = vmatpush1.bf16.msra.mxu1 %v7789_v0 }
 0x2c6   :  { %3983 = vmatprep.subr.bf16.mxu1 %v7797_v1  ;;  %3929 = vmatpush2.bf16.msra.mxu0 %v7792_v10 }
 0x2c7   :  { %3930 = vmatprep.subr.bf16.mxu0 %v7800_v11 }
 0x2c9   :  { %3984 = vmatpush1.bf16.msra.mxu1 %v7795_v7 }
 0x2ca   :  { %3931 = vmatpush2.bf16.msra.mxu0 %v7798_v13  ;;  %3985 = vmatprep.subr.bf16.mxu1 %v7803_v21 }
 0x2cb   :  { %3932 = vmatprep.subr.bf16.mxu0 %v7806_v23 }
 0x2cd   :  { %3986 = vmatpush1.bf16.msra.mxu1 %v7801_v16 }
 0x2ce   :  { %3933 = vmatpush2.bf16.msra.mxu0 %v7804_v22  ;;  %3987 = vmatprep.subr.bf16.mxu1 %v7809_v30 }
 0x2cf   :  { %3934 = vmatprep.subr.bf16.mxu0 %v7812_v20 }
 0x2d1   :  { %3988 = vmatpush1.bf16.msra.mxu1 %v7807_v25 }
 0x2d2   :  { %3935 = vmatpush2.bf16.msra.mxu0 %v7810_v9  ;;  %3989 = vmatprep.subr.bf16.mxu1 %v7815_v32 }
 0x2d3   :  { %3936 = vmatprep.subr.bf16.mxu0 %v7818_v35 }
 0x2d5   :  { %3990 = vmatpush2.bf16.msra.mxu1 %v7813_v31 }
 0x2d6   :  { %3937 = vmatpush2.bf16.msra.mxu0 %v7816_v29  ;;  %3991 = vmatprep.subr.bf16.mxu1 %v7821_v36 }
 0x2d7   :  { %3938 = vmatprep.subr.bf16.mxu0 %v7824_v43 }
 0x2d9   :  { %3992 = vmatpush2.bf16.msra.mxu1 %v7819_v18 }
 0x2da   :  { %3939 = vmatpush2.bf16.msra.mxu0 %v7822_v42  ;;  %3993 = vmatprep.subr.bf16.mxu1 %v7827_v46 }
 0x2db   :  { %3940 = vmatprep.subr.bf16.mxu0 %v7830_v49 }
 0x2dd   :  { %3994 = vmatpush2.bf16.msra.mxu1 %v7825_v44 }
 0x2de   :  { %3941 = vmatpush2.bf16.msra.mxu0 %v7828_v48  ;;  %3995 = vmatprep.subr.bf16.mxu1 %v7833_v3 }
 0x2df   :  { %3942 = vmatprep.subr.bf16.mxu0 %v7836_v17 }
 0x2e1   :  { %3996 = vmatpush2.bf16.msra.mxu1 %v7831_v50 }
 0x2e2   :  { %3997 = vmatprep.subr.bf16.mxu1 %v7839_v28  ;;  %3943 = vmatpush2.bf16.msra.mxu0 %v7834_v12 }
 0x2e3   :  { %4034 = vmatprep.subr.bf16.mxu0 %v7842_v19 }
 0x2e5   :  { %3998 = vmatpush2.bf16.msra.mxu1 %v7837_v24 }
 0x2e6   :  { %3999 = vmatprep.subr.bf16.mxu1 %v7845_v27 }
 0x2e9   :  { %4000 = vmatpush2.bf16.msra.mxu1 %v7843_v34 }
 0x2ea   :  { %4001 = vmatprep.subr.bf16.mxu1 %v7851_v2 }
 0x2ed   :  { %4002 = vmatpush2.bf16.msra.mxu1 %v7849_v40 }
 0x2ee   :  { %4003 = vmatprep.subr.bf16.mxu1 %v7857_v14 }
 0x2f1   :  { %4004 = vmatpush2.bf16.msra.mxu1 %v7855_v6 }
 0x2f2   :  { %4095 = vmatprep.subr.bf16.mxu1 %v7863_v39 }
 0x31e   :  { %v2784_v15 = vpop.f32.mrf.mxu0 }
 0x31f   :  { %v2785_v54 = vadd.f32 %v2784_v15, %v2103_v4 }
 0x320   :  { %v2786_v41 = vpop.f32.mrf.mxu0 }
 0x321   :  { %v2787_v58 = vadd.f32 %v2786_v41, %v2107_v37 }
 0x322   :  { %v2788_v52 = vpop.f32.mrf.mxu0 }
 0x323   :  { %v2789_v43 = vadd.f32 %v2788_v52, %v2103_v4 }
 0x324   :  { %v2790_v45 = vpop.f32.mrf.mxu0 }
 0x325   :  { %v2791_v49 = vadd.f32 %v2790_v45, %v2107_v37 }
 0x326   :  { %v2794_v33 = vpop.f32.mrf.mxu0 }
 0x327   :  { %v2795_v1 = vadd.f32 %v2794_v33, %v2103_v4 }
 0x328   :  { %v2796_v38 = vpop.f32.mrf.mxu0 }
 0x329   :  { %v2797_v7 = vadd.f32 %v2796_v38, %v2107_v37 }
 0x32a   :  { %v2798_v8 = vpop.f32.mrf.mxu0 }
 0x32b   :  { %v2845_v57 = vpop.f32.mrf.mxu1  ;;  %v2799_v40 = vadd.f32 %v2798_v8, %v2103_v4 }
 0x32c   :  { %v2846_v60 = vadd.f32 %v2845_v57, %v2785_v54  ;;  %v2800_v61 = vpop.f32.mrf.mxu0 }
 0x32d   :  { %v2847_v55 = vpop.f32.mrf.mxu1  ;;  %v2801_v2 = vadd.f32 %v2800_v61, %v2107_v37 }
 0x32e   :  { %v2848_v63 = vadd.f32 %v2847_v55, %v2787_v58  ;;  %v2804_v59 = vpop.f32.mrf.mxu0 }
 0x32f   :  { %v2849_v56 = vpop.f32.mrf.mxu1  ;;  %v2805_v23 = vadd.f32 %v2804_v59, %v2103_v4 }
 0x330   :  { %v2806_v62 = vpop.f32.mrf.mxu0  ;;  %v2850_v50 = vadd.f32 %v2849_v56, %v2789_v43 }
 0x331   :  { %v2851_v0 = vpop.f32.mrf.mxu1  ;;  %v2807_v39 = vadd.f32 %v2806_v62, %v2107_v37 }
 0x332   :  { %v2808_v47 = vpop.f32.mrf.mxu0  ;;  %v2852_v28 = vadd.f32 %v2851_v0, %v2791_v49 }
 0x333   :  { %v2855_v5 = vpop.f32.mrf.mxu1 }
 0x334   :  { %v2856_v10 = vadd.f32 %v2855_v5, %v2795_v1  ;;  %v2809_v11 = vpop.f32.mrf.mxu0 }
 0x335   :  { %v2857_v13 = vpop.f32.mrf.mxu1 }
 0x336   :  { %v2858_v16 = vadd.f32 %v2857_v13, %v2797_v7 }
 0x337   :  { %v2859_v21 = vpop.f32.mrf.mxu1 }
 0x338   :  { %v2860_v53 = vadd.f32 %v2859_v21, %v2799_v40 }
 0x339   :  { %v2861_v22 = vpop.f32.mrf.mxu1 }
 0x33a   :  { %v2862_v45 = vadd.f32 %v2861_v22, %v2801_v2 }
 0x33b   :  { %v2865_v25 = vpop.f32.mrf.mxu1 }
 0x33c   :  { %v2866_v30 = vadd.f32 %v2865_v25, %v2805_v23  ;;  %v7840_v25 = vld [vmem:[#allocation6 + $0x270] ss:$8 sps:$4 sm:$0xff]  }
 0x33d   :  { %v2867_v9 = vpop.f32.mrf.mxu1 }
 0x33e   :  { %v2868_v55 = vadd.f32 %v2867_v9, %v2807_v39 }
 0x33f   :  { %v2869_v20 = vpop.f32.mrf.mxu1 }
 0x341   :  { %v2870_v31 = vpop.f32.mrf.mxu1 }
 0x35e   :  { %v2906_v32 = vpop.f32.mrf.mxu0 }
 0x35f   :  { %v2907_v44 = vadd.f32 %v2906_v32, %v2846_v60 }
 0x360   :  { %v2908_v29 = vpop.f32.mrf.mxu0 }
 0x361   :  { %v2909_v3 = vadd.f32 %v2908_v29, %v2848_v63 }
 0x362   :  { %v2910_v35 = vpop.f32.mrf.mxu0 }
 0x363   :  { %v2911_v19 = vadd.f32 %v2910_v35, %v2850_v50  ;;  %v7846_v50 = vld [vmem:[#allocation6 + $0x260] ss:$8 sps:$4 sm:$0xff]  }
 0x364   :  { %v2912_v18 = vpop.f32.mrf.mxu0 }
 0x365   :  { %v2913_v15 = vadd.f32 %v2912_v18, %v2852_v28 }
 0x366   :  { %v2916_v36 = vpop.f32.mrf.mxu0 }
 0x367   :  { %v2917_v33 = vadd.f32 %v2916_v36, %v2856_v10 }
 0x368   :  { %v2918_v42 = vpop.f32.mrf.mxu0 }
 0x369   :  { %v2919_v4 = vadd.f32 %v2918_v42, %v2858_v16 }
 0x36a   :  { %v2920_v46 = vpop.f32.mrf.mxu0 }
 0x36b   :  { %v2967_v48 = vpop.f32.mrf.mxu1  ;;  %v2921_v8 = vadd.f32 %v2920_v46, %v2860_v53 }
 0x36c   :  { %v2968_v12 = vadd.f32 %v2967_v48, %v2907_v44  ;;  %v2922_v17 = vpop.f32.mrf.mxu0 }
 0x36d   :  { %v2969_v24 = vpop.f32.mrf.mxu1  ;;  %v2923_v0 = vadd.f32 %v2922_v17, %v2862_v45  ;;  %v7852_v45 = vld [vmem:[#allocation6 + $0x250] ss:$8 sps:$4 sm:$0xff]  }
 0x36e   :  { %v2970_v34 = vadd.f32 %v2969_v24, %v2909_v3  ;;  %v2926_v27 = vpop.f32.mrf.mxu0  ;;  %v3004_v14 = vmul.f32 0.2, %v2968_v12  ;;  %vm2994_vm12 = vcmp.ge.f32.partialorder %v2968_v12, 0.0 }
 0x36f   :  { %v2971_v6 = vpop.f32.mrf.mxu1  ;;  %v2927_v47 = vadd.f32 %v2926_v27, %v2866_v30  ;;  %v7848_v30 = vld [vmem:[#allocation6 + $0x264] ss:$8 sps:$4 sm:$0xff]  }
 0x370   :  { %v2972_v41 = vadd.f32 %v2971_v6, %v2911_v19  ;;  %v2928_v52 = vpop.f32.mrf.mxu0  ;;  %v3005_v38 = vmul.f32 0.2, %v2970_v34  ;;  %vm2995_vm13 = vcmp.ge.f32.partialorder %v2970_v34, 0.0  ;;  %v3014_v61 = vsel %vm2994_vm12, %v2968_v12, %v3004_v14 }
 0x371   :  { %v2973_v54 = vpop.f32.mrf.mxu1  ;;  %v2929_v21 = vadd.f32 %v2928_v52, %v2868_v55 }
 0x372   :  { %vm2996_vm14 = vcmp.ge.f32.partialorder %v2972_v41, 0.0  ;;  %v3006_v57 = vmul.f32 0.2, %v2972_v41  ;;  %v2974_v58 = vadd.f32 %v2973_v54, %v2913_v15  ;;  %v2930_v60 = vpop.f32.mrf.mxu0  ;;  %v3015_v1 = vsel %vm2995_vm13, %v2970_v34, %v3005_v38  ;;  %v7854_v34 = vld [vmem:[#allocation6 + $0x254] ss:$8 sps:$4 sm:$0xff]  }
 0x373   :  { %v2977_v37 = vpop.f32.mrf.mxu1  ;;  %v7860_v60 = vld [vmem:[#allocation6 + $0x244] ss:$8 sps:$4 sm:$0xff]  }
 0x374   :  { %v3016_v63 = vsel %vm2996_vm14, %v2972_v41, %v3006_v57  ;;  %vm2997_vm15 = vcmp.ge.f32.partialorder %v2974_v58, 0.0  ;;  %v3007_v59 = vmul.f32 0.2, %v2974_v58  ;;  %v2978_v56 = vadd.f32 %v2977_v37, %v2917_v33  ;;  %v2931_v62 = vpop.f32.mrf.mxu0 }
 0x375   :  { %v8755_v5 = vpack.c.bf16 %v3016_v63, %v3014_v61  ;;  %v2979_v7 = vpop.f32.mrf.mxu1 }
 0x376   :  { %v3017_v10 = vsel %vm2997_vm15, %v2974_v58, %v3007_v59  ;;  %vm2998_vm3 = vcmp.ge.f32.partialorder %v2978_v56, 0.0  ;;  %v3008_v11 = vmul.f32 0.2, %v2978_v56  ;;  %v2980_v13 = vadd.f32 %v2979_v7, %v2919_v4 }
 0x377   :  { %v3033_v16 = vshll.u32 %v8755_v5, 16  ;;  %v8758_v22 = vpack.c.bf16 %v3017_v10, %v3015_v1  ;;  %v2981_v23 = vpop.f32.mrf.mxu1  ;;  %v3031_v9 = vshrl.u32 %v8755_v5, 16  ;;  %v3088_v32 = vrot.slane %v8755_v5, 1  ;;  %v7861_v10 = vld [vmem:[#allocation6 + $0x370] ss:$8 sps:$4 sm:$0xff]  }
 0x378   :  { %vm2999_vm4 = vcmp.ge.f32.partialorder %v2980_v13, 0.0  ;;  %v3009_v20 = vmul.f32 0.2, %v2980_v13  ;;  %v2982_v31 = vadd.f32 %v2981_v23, %v2921_v8  ;;  %v3018_v29 = vsel %vm2998_vm3, %v2978_v56, %v3008_v11 }
 0x379   :  { %v2983_v35 = vpop.f32.mrf.mxu1  ;;  %3944 = vmatprep.mubr.bf16.mxu0 %v8758_v22  ;;  %v3043_v18 = vshrl.u32 %v8758_v22, 16  ;;  %v3045_v36 = vshll.u32 %v8758_v22, 16  ;;  %v3035_v42 = vrot.slane %v3033_v16, 1  ;;  %v3091_v46 = vrot.slane %v8758_v22, 1 }
 0x37a   :  { %vm3000_vm5 = vcmp.ge.f32.partialorder %v2982_v31, 0.0  ;;  %v3010_v43 = vmul.f32 0.2, %v2982_v31  ;;  %v2984_v44 = vadd.f32 %v2983_v35, %v2923_v0  ;;  %3945 = vmatmul.mubr.bf16.vlgmr.msra.gmra.mxu0 %v8755_v5  ;;  %v3019_v48 = vsel %vm2999_vm4, %v2980_v13, %v3009_v20  ;;  %v7869_v20 = vld [vmem:[#allocation6 + $0x364] ss:$8 sps:$4 sm:$0xff]  }
 0x37b   :  { %4035 = vmatpush1.bf16.msra.mxu0 %v7840_v25  ;;  %v2987_v49 = vpop.f32.mrf.mxu1  ;;  %v3047_v3 = vrot.slane %v3045_v36, 1  ;;  %v8770_v12 = vrot.slane %v3043_v18, 1  ;;  %v8772_v17 = vrot.slane %v3045_v36, 2  ;;  %v3036_v14 = vor.u32 %v3035_v42, %v3031_v9  ;;  %v7864_v36 = vld [vmem:[#allocation6 + $0x230] ss:$8 sps:$4 sm:$0xff]  }
 0x37c   :  { %v3020_v24 = vsel %vm3000_vm5, %v2982_v31, %v3010_v43  ;;  %vm3001_vm6 = vcmp.ge.f32.partialorder %v2984_v44, 0.0  ;;  %v3011_v28 = vmul.f32 0.2, %v2984_v44  ;;  %v2988_v19 = vadd.f32 %v2987_v49, %v2927_v47  ;;  %4036 = vmatprep.subr.bf16.mxu0 %v7848_v30  ;;  %v7858_v47 = vld [vmem:[#allocation6 + $0x240] ss:$8 sps:$4 sm:$0xff]  }
 0x37d   :  { %v8774_v27 = vpack.c.bf16 %v3020_v24, %v3018_v29  ;;  %v2989_v40 = vpop.f32.mrf.mxu1  ;;  %v3048_v2 = vor.u32 %v3047_v3, %v3043_v18  ;;  %v3113_v6 = vor.u32 %v8772_v17, %v8770_v12  ;;  %v8783_v55 = vrot.slane %v3031_v9, 1  ;;  %v7872_v49 = vld [vmem:[#allocation6 + $0x224] ss:$8 sps:$4 sm:$0xff]   ;;  %v7878_v12 = vld [vmem:[#allocation6 + $0x214] ss:$8 sps:$4 sm:$0xff]  }
 0x37e   :  { %v3021_v39 = vsel %vm3001_vm6, %v2984_v44, %v3011_v28  ;;  %vm3002_vm7 = vcmp.ge.f32.partialorder %v2988_v19, 0.0  ;;  %v3012_v15 = vmul.f32 0.2, %v2988_v19  ;;  %v2990_v41 = vadd.f32 %v2989_v40, %v2929_v21  ;;  %v7866_v21 = vld [vmem:[#allocation6 + $0x234] ss:$8 sps:$4 sm:$0xff]  }
 0x37f   :  { %v8778_v52 = vpack.c.bf16 %v3021_v39, %v3019_v48  ;;  %4037 = vmatpush1.bf16.msra.mxu0 %v7846_v50  ;;  %v2991_v53 = vpop.f32.mrf.mxu1  ;;  %v3038_v33 = vshll.u32 %v8774_v27, 16  ;;  %v3054_v38 = vshrl.u32 %v8774_v27, 16  ;;  %v3089_v54 = vrot.slane %v8774_v27, 1  ;;  %v7867_v48 = vld [vmem:[#allocation6 + $0x360] ss:$8 sps:$4 sm:$0xff]  }
 0x380   :  { %v3022_v57 = vsel %vm3002_vm7, %v2988_v19, %v3012_v15  ;;  %vm3003_vm8 = vcmp.ge.f32.partialorder %v2990_v41, 0.0  ;;  %v3013_v58 = vmul.f32 0.2, %v2990_v41  ;;  %4038 = vmatprep.subr.bf16.mxu0 %v7854_v34  ;;  %v3105_v0 = vrot.slane %v3033_v16, 2  ;;  %v7875_v34 = vld [vmem:[#allocation6 + $0x354] ss:$8 sps:$4 sm:$0xff]  }
 0x381   :  { %v8785_v4 = vpack.c.bf16 %v3022_v57, %v3022_v57  ;;  %v2992_v8 = vpop.f32.mrf.mxu1  ;;  %3954 = vmatprep.mubr.bf16.mxu0 %v8778_v52  ;;  %v3050_v61 = vshll.u32 %v8778_v52, 16  ;;  %v3040_v37 = vrot.slane %v3038_v33, 1  ;;  %v3062_v63 = vshrl.u32 %v8778_v52, 16  ;;  %v7881_v17 = vld [vmem:[#allocation6 + $0x344] ss:$8 sps:$4 sm:$0xff]  }
 0x382   :  { %v3023_v59 = vsel %vm3003_vm8, %v2990_v41, %v3013_v58  ;;  %3955 = vmatmul.mubr.bf16.gmra.mxu0 %v8774_v27  ;;  %v3092_v56 = vrot.slane %v8778_v52, 1  ;;  %v8793_v62 = vsel %vm130_vm2, %v3088_v32, %v3089_v54  ;;  %v3107_v13 = vrot.slane %v3054_v38, 1  ;;  %v7870_v41 = vld [vmem:[#allocation6 + $0x220] ss:$8 sps:$4 sm:$0xff]   ;;  %v7873_v52 = vld [vmem:[#allocation6 + $0x350] ss:$8 sps:$4 sm:$0xff]  }
 0x383   :  { %v8797_v1 = vpack.c.bf16 %v3023_v59, %v3023_v59  ;;  %4039 = vmatpush1.bf16.msra.mxu0 %v7852_v45  ;;  %v3052_v7 = vrot.slane %v3050_v61, 1  ;;  %v3041_v11 = vsel %vm100_vm0, %v3036_v14, %v3040_v37  ;;  %v3058_v23 = vshll.u32 %v8785_v4, 16  ;;  %v7876_v57 = vld [vmem:[#allocation6 + $0x210] ss:$8 sps:$4 sm:$0xff]   ;;  %v7879_v58 = vld [vmem:[#allocation6 + $0x340] ss:$8 sps:$4 sm:$0xff]  }
 0x384   :  { %4040 = vmatprep.subr.bf16.mxu0 %v7860_v60  ;;  %v3093_v22 = vsel %vm130_vm2, %v3091_v46, %v3092_v56  ;;  %v3070_v25 = vshrl.u32 %v8785_v4, 16  ;;  %v3114_v9 = vrot.slane %v3062_v63, 1  ;;  %v3056_v31 = vor.u32 %v3054_v38, %v3040_v37  ;;  %v7884_v60 = vld [vmem:[#allocation6 + $0x204] ss:$8 sps:$4 sm:$0xff]   ;;  %v7882_v8 = vld [vmem:[#allocation6 + $0x200] ss:$8 sps:$4 sm:$0xff]  }
 0x385   :  { %3964 = vmatprep.mubr.bf16.mxu0 %v8797_v1  ;;  %v3053_v5 = vsel %vm100_vm0, %v3048_v2, %v3052_v7  ;;  %v3066_v16 = vshll.u32 %v8797_v1, 16  ;;  %v3073_v30 = vshrl.u32 %v8797_v1, 16  ;;  %v3064_v32 = vor.u32 %v3062_v63, %v3052_v7  ;;  %v7890_v63 = vld [vmem:[#allocation6 + $0x2f4] ss:$8 sps:$4 sm:$0xff]   ;;  %v7893_v59 = vld [vmem:[#allocation6 + $0x324] ss:$8 sps:$4 sm:$0xff]  }
 0x386   :  { %4005 = vmatprep.mubr.bf16.mxu1 %v3053_v5  ;;  %v3060_v29 = vrot.slane %v3058_v23, 1  ;;  %v3115_v35 = vrot.slane %v3050_v61, 2  ;;  %v3096_v18 = vrot.slane %v8797_v1, 1  ;;  %v3118_v43 = vrot.slane %v3070_v25, 1  ;;  %v7885_v61 = vld [vmem:[#allocation6 + $0x330] ss:$8 sps:$4 sm:$0xff]  }
 0x387   :  { %4041 = vmatpush1.bf16.msra.mxu0 %v7858_v47  ;;  %4006 = vmatmul.mubr.bf16.vlgmr.msra.gmra.mxu1 %v3041_v11  ;;  %v3068_v42 = vrot.slane %v3066_v16, 1  ;;  %v3094_v44 = vrot.slane %v8785_v4, 1  ;;  %v3106_v46 = vor.u32 %v3105_v0, %v8783_v55  ;;  %v3122_v3 = vrot.slane %v3073_v30, 1  ;;  %v7887_v55 = vld [vmem:[#allocation6 + $0x334] ss:$8 sps:$4 sm:$0xff]  }
 0x388   :  { %4096 = vmatpush1.bf16.msra.mxu1 %v7861_v10  ;;  %4042 = vmatprep.subr.bf16.mxu0 %v7866_v21  ;;  %v3061_v50 = vsel %vm100_vm0, %v3056_v31, %v3060_v29  ;;  %v3116_v24 = vor.u32 %v3115_v35, %v3114_v9  ;;  %v3108_v28 = vrot.slane %v3038_v33, 2  ;;  %v8817_v27 = vsel %vm130_vm2, %v3092_v56, %v3096_v18  ;;  %v7888_v56 = vld [vmem:[#allocation6 + $0x2f0] ss:$8 sps:$4 sm:$0xff]   ;;  %v7891_v0 = vld [vmem:[#allocation6 + $0x320] ss:$8 sps:$4 sm:$0xff]  }
 0x389   :  { %v3069_v19 = vsel %vm100_vm0, %v3064_v32, %v3068_v42  ;;  %4097 = vmatprep.subr.bf16.mxu1 %v7869_v20  ;;  %v8822_v40 = vsel %vm130_vm2, %v3089_v54, %v3094_v44  ;;  %v3123_v39 = vrot.slane %v3066_v16, 2  ;;  %v3119_v15 = vrot.slane %v3058_v23, 2  ;;  %v7896_v47 = vld [vmem:[#allocation6 + $0x2e4] ss:$8 sps:$4 sm:$0xff]   ;;  %v7899_v7 = vld [vmem:[#allocation6 + $0x314] ss:$8 sps:$4 sm:$0xff]  }
 0x38a   :  { %3965 = vmatmul.mubr.bf16.gmra.mxu0 %v8785_v4  ;;  %4015 = vmatprep.mubr.bf16.mxu1 %v3069_v19  ;;  %v3117_v2 = vsel %vm139_vm1, %v3113_v6, %v3116_v24  ;;  %v3109_v14 = vor.u32 %v3108_v28, %v3107_v13  ;;  %v3075_v6 = vor.u32 %v3073_v30, %v3068_v42  ;;  %v7894_v10 = vld [vmem:[#allocation6 + $0x2e0] ss:$8 sps:$4 sm:$0xff]   ;;  %v7897_v11 = vld [vmem:[#allocation6 + $0x310] ss:$8 sps:$4 sm:$0xff]   ;;  %v7902_v13 = vld [vmem:[#allocation6 + $0x2d4] ss:$8 sps:$4 sm:$0xff]  }
 0x38b   :  { %4043 = vmatpush1.bf16.msra.mxu0 %v7864_v36  ;;  %4066 = vmatprep.mubr.bf16.mxu0 %v3093_v22  ;;  %v8832_v45 = vor.u32 %v3123_v39, %v3122_v3  ;;  %v8834_v33 = vor.u32 %v3119_v15, %v3118_v43  ;;  %v3072_v37 = vor.u32 %v3070_v25, %v3060_v29  ;;  %v7905_v21 = vld [vmem:[#allocation6 + $0x304] ss:$8 sps:$4 sm:$0xff]   ;;  %v7900_v22 = vld [vmem:[#allocation6 + $0x2d0] ss:$8 sps:$4 sm:$0xff]   ;;  %v7903_v23 = vld [vmem:[#allocation6 + $0x300] ss:$8 sps:$4 sm:$0xff]  }
 0x38c   :  { %4098 = vmatpush1.bf16.msra.mxu1 %v7867_v48  ;;  %4044 = vmatprep.subr.bf16.mxu0 %v7872_v49  ;;  %v8830_v53 = vsel %vm139_vm1, %v3106_v46, %v3109_v14  ;;  %v7908_v25 = vld [vmem:[#allocation6 + $0x2c4] ss:$8 sps:$4 sm:$0xff]   ;;  %v7911_v9 = vld [vmem:[#allocation6 + $0x3f4] ss:$8 sps:$4 sm:$0xff]   ;;  %v7906_v5 = vld [vmem:[#allocation6 + $0x2c0] ss:$8 sps:$4 sm:$0xff]  }
 0x38d   :  { %4099 = vmatprep.subr.bf16.mxu1 %v7875_v34  ;;  %v8838_v38 = vsel %vm139_vm1, %v3116_v24, %v8832_v45  ;;  %v8842_v54 = vsel %vm139_vm1, %v3109_v14, %v8834_v33  ;;  %v7909_v16 = vld [vmem:[#allocation6 + $0x3f0] ss:$8 sps:$4 sm:$0xff]   ;;  %v7914_v20 = vld [vmem:[#allocation6 + $0x2b4] ss:$8 sps:$4 sm:$0xff]   ;;  %v7917_v31 = vld [vmem:[#allocation6 + $0x3e4] ss:$8 sps:$4 sm:$0xff]  }
 0x38e   :  { %v7912_v30 = vld [vmem:[#allocation6 + $0x2b0] ss:$8 sps:$4 sm:$0xff]   ;;  %v7915_v32 = vld [vmem:[#allocation6 + $0x3e0] ss:$8 sps:$4 sm:$0xff]   ;;  %v7920_v29 = vld [vmem:[#allocation6 + $0x2a4] ss:$8 sps:$4 sm:$0xff]  }
 0x38f   :  { %4045 = vmatpush1.bf16.msra.mxu0 %v7870_v41  ;;  %4016 = vmatmul.mubr.bf16.gmra.mxu1 %v3061_v50  ;;  %v7923_v35 = vld [vmem:[#allocation6 + $0x3d4] ss:$8 sps:$4 sm:$0xff]   ;;  %v7918_v36 = vld [vmem:[#allocation6 + $0x2a0] ss:$8 sps:$4 sm:$0xff]   ;;  %v7921_v42 = vld [vmem:[#allocation6 + $0x3d0] ss:$8 sps:$4 sm:$0xff]  }
 0x390   :  { %4100 = vmatpush1.bf16.msra.mxu1 %v7873_v52  ;;  %4025 = vmatprep.mubr.bf16.mxu1 %v3075_v6  ;;  %v7926_v43 = vld [vmem:[#allocation6 + $0x294] ss:$8 sps:$4 sm:$0xff]   ;;  %v7929_v46 = vld [vmem:[#allocation6 + $0x3c4] ss:$8 sps:$4 sm:$0xff]   ;;  %v7924_v48 = vld [vmem:[#allocation6 + $0x290] ss:$8 sps:$4 sm:$0xff]  }
 0x391   :  { %4046 = vmatprep.subr.bf16.mxu0 %v7878_v12  ;;  %4101 = vmatprep.subr.bf16.mxu1 %v7881_v17  ;;  %v7927_v49 = vld [vmem:[#allocation6 + $0x3c0] ss:$8 sps:$4 sm:$0xff]   ;;  %v7932_v50 = vld [vmem:[#allocation6 + $0x284] ss:$8 sps:$4 sm:$0xff]   ;;  %v7935_v3 = vld [vmem:[#allocation6 + $0x3b4] ss:$8 sps:$4 sm:$0xff]  }
 0x392   :  { %v7930_v24 = vld [vmem:[#allocation6 + $0x280] ss:$8 sps:$4 sm:$0xff]   ;;  %v7933_v28 = vld [vmem:[#allocation6 + $0x3b0] ss:$8 sps:$4 sm:$0xff]   ;;  %v7938_v19 = vld [vmem:[#allocation6 + $0x3a4] ss:$8 sps:$4 sm:$0xff]  }
 0x393   :  { %4047 = vmatpush1.bf16.msra.mxu0 %v7876_v57  ;;  %v7936_v34 = vld [vmem:[#allocation6 + $0x3a0] ss:$8 sps:$4 sm:$0xff]   ;;  %v7939_v14 = vld [vmem:[#allocation6 + $0x390] ss:$8 sps:$4 sm:$0xff]   ;;  %v7944_v39 = vld [vmem:[#allocation6 + $0x384] ss:$8 sps:$4 sm:$0xff]  }
 0x394   :  { %4102 = vmatpush1.bf16.msra.mxu1 %v7879_v58  ;;  %4048 = vmatprep.subr.bf16.mxu0 %v7884_v60  ;;  %v7942_v15 = vld [vmem:[#allocation6 + $0x380] ss:$8 sps:$4 sm:$0xff]   ;;  %v7948_v1 = vld [vmem:[#allocation7 + $0x30] sm:$0xff]   ;;  %v7953_v52 = vld [vmem:[#allocation7 + $0xf8] sm:$0xff]   ;;  %vm4258_vm4 = vcmask 1045504   ;;  %vm4288_vm8 = vcmask 1044480  }
 0x395   :  { %4103 = vmatprep.subr.bf16.mxu1 %v7887_v55  ;;  %v7950_v41 = vld [vmem:[#allocation7 + $0x28] sm:$0xff]   ;;  %v7951_v4 = vld [vmem:[#allocation7 + $0x60] sm:$0xff]   ;;  %v7957_v12 = vld [vmem:[#allocation7 + $0xf0] sm:$0xff]   ;;  %vm4269_vm7 = vsmask.f32 5376 }
 0x396   :  { %v7958_v17 = vld [vmem:[#allocation7 + $0xb0] sm:$0xff]   ;;  %v7962_v57 = vld [vmem:[#allocation7 + $0xa8] sm:$0xff]   ;;  %v7965_v55 = vld [vmem:[#allocation7 + $0xe0] sm:$0xff]  }
 0x397   :  { %4049 = vmatpush1.bf16.msra.mxu0 %v7882_v8  ;;  %4026 = vmatmul.mubr.bf16.gmra.mxu1 %v3072_v37  ;;  %v7959_v6 = vld [vmem:[#allocation7 + $0x50] sm:$0xff]   ;;  %v7963_v58 = vld [vmem:[#allocation7 + $0x48] sm:$0xff]   ;;  %v7966_v8 = vld [vmem:[#allocation7 + $0xa0] sm:$0xff]  }
 0x398   :  { %4104 = vmatpush1.bf16.msra.mxu1 %v7885_v61  ;;  %4127 = vmatprep.mubr.bf16.mxu1 %v3117_v2  ;;  %v7941_v2 = vld [vmem:[#allocation6 + $0x394] ss:$8 sps:$4 sm:$0xff]   ;;  %v7964_v60 = vld [vmem:[#allocation7 + $0x8] sm:$0xff]   ;;  %v7967_v61 = vld [vmem:[#allocation7 + $0x40] sm:$0xff]  }
 0x399   :  { %4050 = vmatprep.subr.bf16.mxu0 %v7890_v63  ;;  %4105 = vmatprep.subr.bf16.mxu1 %v7893_v59  ;;  %v7968_v37 = vld [vmem:[#allocation7] sm:$0xff]   ;;  %v7969_v63 = vld [vmem:[#allocation7 + $0xd8] sm:$0xff]  }
 0x39a   :  { %v7970_v59 = vld [vmem:[#allocation7 + $0x98] sm:$0xff]  }
 0x39b   :  { %4051 = vmatpush2.bf16.msra.mxu0 %v7888_v56  ;;  %v7971_v56 = vld [vmem:[#allocation7 + $0x178] sm:$0xff]  }
 0x39c   :  { %4106 = vmatpush1.bf16.msra.mxu1 %v7891_v0  ;;  %4052 = vmatprep.subr.bf16.mxu0 %v7896_v47  ;;  %v7972_v0 = vld [vmem:[#allocation7 + $0xd0] sm:$0xff]  }
 0x39d   :  { %4107 = vmatprep.subr.bf16.mxu1 %v7899_v7  ;;  %v7974_v47 = vld [vmem:[#allocation7 + $0x90] sm:$0xff]   ;;  %v7976_v7 = vld [vmem:[#allocation7 + $0xc8] sm:$0xff]  }
 0x39f   :  { %4053 = vmatpush2.bf16.msra.mxu0 %v7894_v10  ;;  %v7978_v10 = vld [vmem:[#allocation7 + $0x88] sm:$0xff]  }
 0x3a0   :  { %4108 = vmatpush1.bf16.msra.mxu1 %v7897_v11  ;;  %4054 = vmatprep.subr.bf16.mxu0 %v7902_v13  ;;  %v7980_v11 = vld [vmem:[#allocation7 + $0xc0] sm:$0xff]  }
 0x3a1   :  { %4109 = vmatprep.subr.bf16.mxu1 %v7905_v21  ;;  %v7982_v13 = vld [vmem:[#allocation7 + $0x80] sm:$0xff]   ;;  %v7985_v21 = vld [vmem:[#allocation7 + $0x1f8] sm:$0xff]  }
 0x3a3   :  { %4055 = vmatpush2.bf16.msra.mxu0 %v7900_v22 }
 0x3a4   :  { %4110 = vmatpush1.bf16.msra.mxu1 %v7903_v23  ;;  %4056 = vmatprep.subr.bf16.mxu0 %v7908_v25 }
 0x3a5   :  { %4111 = vmatprep.subr.bf16.mxu1 %v7911_v9  ;;  %v3260_v9 = vld [vmem:[%s9144_s7] sm:$0x3] }
 0x3a7   :  { %4057 = vmatpush2.bf16.msra.mxu0 %v7906_v5 }
 0x3a8   :  { %4112 = vmatpush2.bf16.msra.mxu1 %v7909_v16  ;;  %4058 = vmatprep.subr.bf16.mxu0 %v7914_v20  ;;  %v3265_v16 = vrot.slane %v3260_v9, %v8634_v51 }
 0x3a9   :  { %4113 = vmatprep.subr.bf16.mxu1 %v7917_v31  ;;  %v3269_v31 = vrot.slane %v3260_v9, %v8639_v26 }
 0x3ab   :  { %4059 = vmatpush2.bf16.msra.mxu0 %v7912_v30 }
 0x3ac   :  { %4114 = vmatpush2.bf16.msra.mxu1 %v7915_v32  ;;  %4060 = vmatprep.subr.bf16.mxu0 %v7920_v29 }
 0x3ad   :  { %4115 = vmatprep.subr.bf16.mxu1 %v7923_v35 }
 0x3af   :  { %4061 = vmatpush2.bf16.msra.mxu0 %v7918_v36 }
 0x3b0   :  { %4116 = vmatpush2.bf16.msra.mxu1 %v7921_v42  ;;  %4062 = vmatprep.subr.bf16.mxu0 %v7926_v43 }
 0x3b1   :  { %4117 = vmatprep.subr.bf16.mxu1 %v7929_v46 }
 0x3b3   :  { %4063 = vmatpush2.bf16.msra.mxu0 %v7924_v48 }
 0x3b4   :  { %4118 = vmatpush2.bf16.msra.mxu1 %v7927_v49  ;;  %4064 = vmatprep.subr.bf16.mxu0 %v7932_v50 }
 0x3b5   :  { %4119 = vmatprep.subr.bf16.mxu1 %v7935_v3 }
 0x3b7   :  { %4065 = vmatpush2.bf16.msra.mxu0 %v7930_v24 }
 0x3b8   :  { %4120 = vmatpush2.bf16.msra.mxu1 %v7933_v28 }
 0x3b9   :  { %4121 = vmatprep.subr.bf16.mxu1 %v7938_v19 }
 0x3ba   :  { %4067 = vmatmul.mubr.bf16.vlgmr.msra.gmra.mxu0 %v8793_v62  ;;  %v7945_v62 = vld [vmem:[#allocation7 + $0x78] sm:$0xff]  }
 0x3bb   :  { %4076 = vmatprep.mubr.bf16.mxu0 %v8817_v27  ;;  %v7946_v27 = vld [vmem:[#allocation7 + $0x38] sm:$0xff]   ;;  %6941 = vmatprep.subr.bf16.mxu0 %v7945_v62 }
 0x3bc   :  { %4122 = vmatpush2.bf16.msra.mxu1 %v7936_v34  ;;  %6942 = vmatpush3.bf16.msra.mxu0 %v7946_v27 }
 0x3bd   :  { %4123 = vmatprep.subr.bf16.mxu1 %v7941_v2 }
 0x3c0   :  { %4124 = vmatpush2.bf16.msra.mxu1 %v7939_v14 }
 0x3c1   :  { %4125 = vmatprep.subr.bf16.mxu1 %v7944_v39 }
 0x3c2   :  { %4077 = vmatmul.mubr.bf16.gmra.mxu0 %v8822_v40  ;;  %v7947_v40 = vld [vmem:[#allocation7 + $0x70] sm:$0xff]  }
 0x3c3   :  { %4086 = vmatprep.mubr.bf16.mxu0 %v3096_v18  ;;  %6943 = vmatprep.subr.bf16.mxu0 %v7947_v40  ;;  %v7949_v18 = vld [vmem:[#allocation7 + $0x68] sm:$0xff]  }
 0x3c4   :  { %4126 = vmatpush2.bf16.msra.mxu1 %v7942_v15  ;;  %6944 = vmatpush3.bf16.msra.mxu0 %v7948_v1 }
 0x3c5   :  { %6945 = vmatprep.subr.bf16.mxu0 %v7949_v18  ;;  %6969 = vmatprep.subr.bf16.mxu1 %v7953_v52 }
 0x3c7   :  { %4128 = vmatmul.mubr.bf16.vlgmr.msra.gmra.mxu1 %v8830_v53  ;;  %v7954_v53 = vld [vmem:[#allocation7 + $0xb8] sm:$0xff]  }
 0x3c8   :  { %4137 = vmatprep.mubr.bf16.mxu1 %v8838_v38  ;;  %6946 = vmatpush3.bf16.msra.mxu0 %v7950_v41  ;;  %v7960_v38 = vld [vmem:[#allocation7 + $0x10] sm:$0xff]  }
 0x3c9   :  { %6947 = vmatprep.subr.bf16.mxu0 %v7951_v4  ;;  %6970 = vmatpush3.bf16.msra.mxu1 %v7954_v53 }
 0x3ca   :  { %4087 = vmatmul.mubr.bf16.gmra.mxu0 %v3094_v44  ;;  %v7952_v44 = vld [vmem:[#allocation7 + $0x20] sm:$0xff]   ;;  %6971 = vmatprep.subr.bf16.mxu1 %v7957_v12 }
 0x3cc   :  { %6948 = vmatpush3.bf16.msra.mxu0 %v7952_v44 }
 0x3cd   :  { %6972 = vmatpush3.bf16.msra.mxu1 %v7958_v17 }
 0x3cf   :  { %4138 = vmatmul.mubr.bf16.gmra.mxu1 %v8842_v54  ;;  %v7961_v54 = vld [vmem:[#allocation7 + $0xe8] sm:$0xff]  }
 0x3d0   :  { %4147 = vmatprep.mubr.bf16.mxu1 %v8832_v45  ;;  %v7955_v45 = vld [vmem:[#allocation7 + $0x58] sm:$0xff]   ;;  %6973 = vmatprep.subr.bf16.mxu1 %v7961_v54 }
 0x3d1   :  { %6949 = vmatprep.subr.bf16.mxu0 %v7955_v45  ;;  %6974 = vmatpush3.bf16.msra.mxu1 %v7962_v57 }
 0x3d2   :  { %6975 = vmatprep.subr.bf16.mxu1 %v7965_v55 }
 0x3d5   :  { %6976 = vmatpush3.bf16.msra.mxu1 %v7966_v8 }
 0x3d6   :  { %6977 = vmatprep.subr.bf16.mxu1 %v7969_v63 }
 0x3d7   :  { %4148 = vmatmul.mubr.bf16.gmra.mxu1 %v8834_v33  ;;  %v7956_v33 = vld [vmem:[#allocation7 + $0x18] sm:$0xff]  }
 0x3d8   :  { %6950 = vmatpush3.bf16.msra.mxu0 %v7956_v33 }
 0x3d9   :  { %6951 = vmatprep.subr.bf16.mxu0 %v7959_v6  ;;  %6978 = vmatpush3.bf16.msra.mxu1 %v7970_v59 }
 0x3da   :  { %6979 = vmatprep.subr.bf16.mxu1 %v7972_v0 }
 0x3dc   :  { %6952 = vmatpush3.bf16.msra.mxu0 %v7960_v38 }
 0x3dd   :  { %6953 = vmatprep.subr.bf16.mxu0 %v7963_v58  ;;  %6980 = vmatpush3.bf16.msra.mxu1 %v7974_v47 }
 0x3de   :  { %6981 = vmatprep.subr.bf16.mxu1 %v7976_v7 }
 0x3e0   :  { %6954 = vmatpush3.bf16.msra.mxu0 %v7964_v60 }
 0x3e1   :  { %6955 = vmatprep.subr.bf16.mxu0 %v7967_v61  ;;  %6982 = vmatpush3.bf16.msra.mxu1 %v7978_v10 }
 0x3e2   :  { %6983 = vmatprep.subr.bf16.mxu1 %v7980_v11 }
 0x3e4   :  { %6956 = vmatpush3.bf16.msra.mxu0 %v7968_v37 }
 0x3e5   :  { %6997 = vmatprep.subr.bf16.mxu0 %v7971_v56  ;;  %6984 = vmatpush3.bf16.msra.mxu1 %v7982_v13 }
 0x3e6   :  { %7025 = vmatprep.subr.bf16.mxu1 %v7985_v21 }
 0x43a   :  { %v3946_v22 = vpop.f32.mrf.mxu0 }
 0x43b   :  { %v3947_v32 = vadd.f32 %v3946_v22, %v3265_v16 }
 0x43c   :  { %v3948_v23 = vpop.f32.mrf.mxu0 }
 0x43d   :  { %v3949_v36 = vadd.f32 %v3948_v23, %v3269_v31 }
 0x43e   :  { %v3950_v25 = vpop.f32.mrf.mxu0 }
 0x43f   :  { %v3951_v38 = vadd.f32 %v3950_v25, %v3265_v16 }
 0x440   :  { %v3952_v5 = vpop.f32.mrf.mxu0 }
 0x441   :  { %v3953_v60 = vadd.f32 %v3952_v5, %v3269_v31 }
 0x442   :  { %v3956_v20 = vpop.f32.mrf.mxu0 }
 0x443   :  { %v3957_v34 = vadd.f32 %v3956_v20, %v3265_v16 }
 0x444   :  { %v3958_v30 = vpop.f32.mrf.mxu0 }
 0x445   :  { %v3959_v14 = vadd.f32 %v3958_v30, %v3269_v31 }
 0x446   :  { %v3960_v29 = vpop.f32.mrf.mxu0 }
 0x447   :  { %v4007_v35 = vpop.f32.mrf.mxu1  ;;  %v3961_v13 = vadd.f32 %v3960_v29, %v3265_v16 }
 0x448   :  { %v4008_v42 = vadd.f32 %v4007_v35, %v3947_v32  ;;  %v3962_v43 = vpop.f32.mrf.mxu0 }
 0x449   :  { %v4009_v46 = vpop.f32.mrf.mxu1  ;;  %v3963_v25 = vadd.f32 %v3962_v43, %v3269_v31 }
 0x44a   :  { %v4010_v48 = vadd.f32 %v4009_v46, %v3949_v36  ;;  %v3966_v49 = vpop.f32.mrf.mxu0 }
 0x44b   :  { %v3967_v50 = vadd.f32 %v3966_v49, %v3265_v16  ;;  %v4011_v3 = vpop.f32.mrf.mxu1 }
 0x44c   :  { %v3968_v24 = vpop.f32.mrf.mxu0  ;;  %v4012_v55 = vadd.f32 %v4011_v3, %v3951_v38 }
 0x44d   :  { %v3969_v28 = vadd.f32 %v3968_v24, %v3269_v31  ;;  %v4013_v19 = vpop.f32.mrf.mxu1 }
 0x44e   :  { %v3970_v51 = vpop.f32.mrf.mxu0  ;;  %v4014_v59 = vadd.f32 %v4013_v19, %v3953_v60 }
 0x44f   :  { %v4017_v2 = vpop.f32.mrf.mxu1 }
 0x450   :  { %v4018_v26 = vadd.f32 %v4017_v2, %v3957_v34  ;;  %v3971_v39 = vpop.f32.mrf.mxu0 }
 0x451   :  { %v4019_v15 = vpop.f32.mrf.mxu1 }
 0x452   :  { %v4020_v62 = vadd.f32 %v4019_v15, %v3959_v14  ;;  %v7973_v15 = vld [vmem:[#allocation7 + $0x138] sm:$0xff]  }
 0x453   :  { %v4021_v27 = vpop.f32.mrf.mxu1 }
 0x455   :  { %v4023_v40 = vpop.f32.mrf.mxu1 }
 0x456   :  { %v4024_v46 = vadd.f32 %v4023_v40, %v3963_v25 }
 0x457   :  { %v4027_v1 = vpop.f32.mrf.mxu1 }
 0x458   :  { %v4028_v18 = vadd.f32 %v4027_v1, %v3967_v50 }
 0x459   :  { %v4029_v41 = vpop.f32.mrf.mxu1 }
 0x45a   :  { %v4030_v4 = vadd.f32 %v4029_v41, %v3969_v28 }
 0x45b   :  { %v4031_v44 = vpop.f32.mrf.mxu1 }
 0x45d   :  { %v4032_v52 = vpop.f32.mrf.mxu1 }
 0x47a   :  { %v4068_v53 = vpop.f32.mrf.mxu0 }
 0x47b   :  { %v4069_v54 = vadd.f32 %v4068_v53, %v4008_v42  ;;  %v4022_v42 = vadd.f32 %v4021_v27, %v3961_v13 }
 0x47c   :  { %v4070_v45 = vpop.f32.mrf.mxu0 }
 0x47d   :  { %v4071_v8 = vadd.f32 %v4070_v45, %v4010_v48 }
 0x47e   :  { %v4072_v33 = vpop.f32.mrf.mxu0 }
 0x47f   :  { %v4073_v56 = vadd.f32 %v4072_v33, %v4012_v55 }
 0x480   :  { %v4074_v12 = vpop.f32.mrf.mxu0 }
 0x481   :  { %v4075_v21 = vadd.f32 %v4074_v12, %v4014_v59 }
 0x482   :  { %v4078_v17 = vpop.f32.mrf.mxu0 }
 0x483   :  { %v4079_v9 = vadd.f32 %v4078_v17, %v4018_v26 }
 0x484   :  { %v4080_v6 = vpop.f32.mrf.mxu0 }
 0x485   :  { %v4081_v48 = vadd.f32 %v4080_v6, %v4020_v62 }
 0x486   :  { %v4082_v57 = vpop.f32.mrf.mxu0 }
 0x487   :  { %v4129_v58 = vpop.f32.mrf.mxu1  ;;  %v4083_v3 = vadd.f32 %v4082_v57, %v4022_v42 }
 0x488   :  { %v4130_v61 = vadd.f32 %v4129_v58, %v4069_v54  ;;  %v4084_v37 = vpop.f32.mrf.mxu0  ;;  %v7977_v54 = vld [vmem:[#allocation7 + $0x130] sm:$0xff]  }
 0x489   :  { %v4131_v63 = vpop.f32.mrf.mxu1  ;;  %v4085_v24 = vadd.f32 %v4084_v37, %v4024_v46 }
 0x48a   :  { %v4132_v0 = vadd.f32 %v4131_v63, %v4071_v8  ;;  %v4088_v47 = vpop.f32.mrf.mxu0  ;;  %v4166_v7 = vmul.f32 0.2, %v4130_v61  ;;  %vm4156_vm9 = vcmp.ge.f32.partialorder %v4130_v61, 0.0  ;;  %v7979_v63 = vld [vmem:[#allocation7 + $0x168] sm:$0xff]  }
 0x48b   :  { %v8863_v10 = vadd.f32 %v4088_v47, %v4028_v18  ;;  %v4133_v11 = vpop.f32.mrf.mxu1 }
 0x48c   :  { %v4134_v22 = vadd.f32 %v4133_v11, %v4073_v56  ;;  %v4090_v23 = vpop.f32.mrf.mxu0  ;;  %v4167_v5 = vmul.f32 0.2, %v4132_v0  ;;  %vm4157_vm10 = vcmp.ge.f32.partialorder %v4132_v0, 0.0  ;;  %v4176_v16 = vsel %vm4156_vm9, %v4130_v61, %v4166_v7 }
 0x48d   :  { %v8865_v20 = vadd.f32 %v4090_v23, %v4030_v4  ;;  %v4135_v30 = vpop.f32.mrf.mxu1  ;;  %v7975_v4 = vld [vmem:[#allocation7 + $0x170] sm:$0xff]   ;;  %v7981_v23 = vld [vmem:[#allocation7 + $0x128] sm:$0xff]   ;;  %vm4329_vm9 = vsmask.f32 3328 }
 0x48e   :  { %vm4158_vm11 = vcmp.ge.f32.partialorder %v4134_v22, 0.0  ;;  %v4168_v32 = vmul.f32 0.2, %v4134_v22  ;;  %v4136_v35 = vadd.f32 %v4135_v30, %v4075_v21  ;;  %v4092_v36 = vpop.f32.mrf.mxu0  ;;  %v4177_v28 = vsel %vm4157_vm10, %v4132_v0, %v4167_v5 }
 0x48f   :  { %v4139_v29 = vpop.f32.mrf.mxu1 }
 0x490   :  { %v4178_v49 = vsel %vm4158_vm11, %v4134_v22, %v4168_v32  ;;  %vm4159_vm12 = vcmp.ge.f32.partialorder %v4136_v35, 0.0  ;;  %v4169_v50 = vmul.f32 0.2, %v4136_v35  ;;  %v4140_v31 = vadd.f32 %v4139_v29, %v4079_v9  ;;  %v4093_v43 = vpop.f32.mrf.mxu0 }
 0x491   :  { %v8869_v19 = vpack.c.bf16 %v4178_v49, %v4176_v16  ;;  %v4141_v34 = vpop.f32.mrf.mxu1 }
 0x492   :  { %v4179_v51 = vsel %vm4159_vm12, %v4136_v35, %v4169_v50  ;;  %vm4160_vm13 = vcmp.ge.f32.partialorder %v4140_v31, 0.0  ;;  %v4170_v2 = vmul.f32 0.2, %v4140_v31  ;;  %v4142_v14 = vadd.f32 %v4141_v34, %v4081_v48  ;;  %v7983_v35 = vld [vmem:[#allocation7 + $0x160] sm:$0xff]  }
 0x493   :  { %v8871_v26 = vpack.c.bf16 %v4179_v51, %v4177_v28  ;;  %v4143_v39 = vpop.f32.mrf.mxu1  ;;  %v8874_v62 = vshrl.u32 %v8869_v19, 16  ;;  %v8877_v27 = vshll.u32 %v8869_v19, 16  ;;  %v4230_v40 = vrot.slane %v8869_v19, 1  ;;  %v7984_v34 = vld [vmem:[#allocation7 + $0x120] sm:$0xff]  }
 0x494   :  { %v4180_v1 = vsel %vm4160_vm13, %v4140_v31, %v4170_v2  ;;  %vm4161_vm14 = vcmp.ge.f32.partialorder %v4142_v14, 0.0  ;;  %v4171_v18 = vmul.f32 0.2, %v4142_v14  ;;  %v4144_v41 = vadd.f32 %v4143_v39, %v4083_v3 }
 0x495   :  { %v4145_v44 = vpop.f32.mrf.mxu1  ;;  %5822 = vmatprep.mubr.bf16.mxu0 %v8871_v26  ;;  %v4233_v52 = vrot.slane %v8871_v26, 1  ;;  %v8883_v53 = vshrl.u32 %v8871_v26, 16  ;;  %v8886_v45 = vshll.u32 %v8871_v26, 16  ;;  %v4197_v33 = vrot.slane %v8877_v27, 1 }
 0x496   :  { %v4181_v12 = vsel %vm4161_vm14, %v4142_v14, %v4171_v18  ;;  %vm4162_vm15 = vcmp.ge.f32.partialorder %v4144_v41, 0.0  ;;  %v4172_v17 = vmul.f32 0.2, %v4144_v41  ;;  %v4146_v6 = vadd.f32 %v4145_v44, %v4085_v24  ;;  %5823 = vmatmul.mubr.bf16.vlgmr.msra.gmra.mxu0 %v8869_v19  ;;  %v7987_v14 = vld [vmem:[#allocation7 + $0x158] sm:$0xff]  }
 0x497   :  { %6998 = vmatpush3.bf16.msra.mxu0 %v7973_v15  ;;  %v4149_v38 = vpop.f32.mrf.mxu1  ;;  %v4209_v57 = vrot.slane %v8886_v45, 1  ;;  %v4198_v58 = vor.u32 %v4197_v33, %v8874_v62  ;;  %v4247_v60 = vrot.slane %v8883_v53, 1  ;;  %v4248_v55 = vrot.slane %v8886_v45, 2  ;;  %v7989_v33 = vld [vmem:[#allocation7 + $0x1f0] sm:$0xff]  }
 0x498   :  { %v4182_v8 = vsel %vm4162_vm15, %v4144_v41, %v4172_v17  ;;  %vm4163_vm3 = vcmp.ge.f32.partialorder %v4146_v6, 0.0  ;;  %v4173_v61 = vmul.f32 0.2, %v4146_v6  ;;  %v4150_v37 = vadd.f32 %v4149_v38, %v8863_v10  ;;  %6999 = vmatprep.subr.bf16.mxu0 %v7975_v4 }
 0x499   :  { %v8895_v59 = vpack.c.bf16 %v4182_v8, %v4180_v1  ;;  %v4151_v56 = vpop.f32.mrf.mxu1  ;;  %v4210_v0 = vor.u32 %v4209_v57, %v8883_v53  ;;  %v8898_v47 = vor.u32 %v4248_v55, %v4247_v60  ;;  %v4262_v7 = vrot.slane %v8871_v26, 2  ;;  %v7986_v1 = vld [vmem:[#allocation7 + $0x1b8] sm:$0xff]   ;;  %v7991_v60 = vld [vmem:[#allocation7 + $0x150] sm:$0xff]  }
 0x49a   :  { %v4183_v11 = vsel %vm4163_vm3, %v4146_v6, %v4173_v61  ;;  %vm4164_vm5 = vcmp.ge.f32.partialorder %v4150_v37, 0.0  ;;  %v4174_v13 = vmul.f32 0.2, %v4150_v37  ;;  %v4152_v21 = vadd.f32 %v4151_v56, %v8865_v20  ;;  %v7988_v6 = vld [vmem:[#allocation7 + $0x118] sm:$0xff]  }
 0x49b   :  { %v8902_v22 = vpack.c.bf16 %v4183_v11, %v4181_v12  ;;  %7000 = vmatpush3.bf16.msra.mxu0 %v7977_v54  ;;  %v4153_v10 = vpop.f32.mrf.mxu1  ;;  %v8905_v25 = vshll.u32 %v8895_v59, 16  ;;  %v8908_v9 = vshrl.u32 %v8895_v59, 16  ;;  %v4231_v5 = vrot.slane %v8895_v59, 1 }
 0x49c   :  { %v4184_v30 = vsel %vm4164_vm5, %v4150_v37, %v4174_v13  ;;  %vm4165_vm6 = vcmp.ge.f32.partialorder %v4152_v21, 0.0  ;;  %v4175_v32 = vmul.f32 0.2, %v4152_v21  ;;  %7001 = vmatprep.subr.bf16.mxu0 %v7979_v63  ;;  %v4240_v20 = vrot.slane %v8874_v62, 1  ;;  %v7990_v63 = vld [vmem:[#allocation7 + $0x1b0] sm:$0xff]   ;;  %v7993_v13 = vld [vmem:[#allocation7 + $0x1e8] sm:$0xff]  }
 0x49d   :  { %v8912_v36 = vpack.c.bf16 %v4184_v30, %v4184_v30  ;;  %v4154_v42 = vpop.f32.mrf.mxu1  ;;  %5829 = vmatprep.mubr.bf16.mxu0 %v8902_v22  ;;  %v4234_v46 = vrot.slane %v8902_v22, 1  ;;  %v8917_v48 = vshll.u32 %v8902_v22, 16  ;;  %v4202_v16 = vrot.slane %v8905_v25, 1 }
 0x49e   :  { %v4185_v29 = vsel %vm4165_vm6, %v4152_v21, %v4175_v32  ;;  %5830 = vmatmul.mubr.bf16.gmra.mxu0 %v8895_v59  ;;  %v8922_v49 = vshrl.u32 %v8902_v22, 16  ;;  %v8929_v50 = vsel %vm130_vm2, %v4230_v40, %v4231_v5  ;;  %v4263_v31 = vrot.slane %v8902_v22, 2  ;;  %v7992_v32 = vld [vmem:[#allocation7 + $0x110] sm:$0xff]  }
 0x49f   :  { %v4345_v43 = vshll.u32 %v8912_v36, 16  ;;  %v4367_v3 = vrot.slane %v8912_v36, 5  ;;  %v8934_v24 = vpack.c.bf16 %v4185_v29, %v4185_v29  ;;  %7002 = vmatpush3.bf16.msra.mxu0 %v7981_v23  ;;  %v4235_v28 = vsel %vm130_vm2, %v4233_v52, %v4234_v46  ;;  %v8012_v36 = vld [vmem:[#allocation7 + $0x1c0] sm:$0xff]  }
 0x4a0   :  { %5916 = vmatprep.mubr.bf16.mxu0 %v4235_v28  ;;  %7003 = vmatprep.subr.bf16.mxu0 %v7983_v35  ;;  %v4214_v51 = vrot.slane %v8917_v48, 1  ;;  %v4203_v2 = vsel %vm100_vm0, %v4198_v58, %v4202_v16  ;;  %v8942_v39 = vor.u32 %v8908_v9, %v4202_v16  ;;  %v4250_v15 = vrot.slane %v8922_v49, 1  ;;  %v7995_v16 = vld [vmem:[#allocation7 + $0x148] sm:$0xff]  }
 0x4a1   :  { %v8945_v40 = vrot.slane %v4345_v43, 5  ;;  %v4251_v18 = vrot.slane %v8917_v48, 2  ;;  %v8951_v41 = vsel %vm4258_vm4, %v4262_v7, %v4263_v31  ;;  %v4241_v4 = vrot.slane %v8877_v27, 2 }
 0x4a2   :  { %v4215_v44 = vsel %vm100_vm0, %v4210_v0, %v4214_v51  ;;  %v4221_v52 = vor.u32 %v8922_v49, %v4214_v51  ;;  %v4243_v12 = vrot.slane %v8908_v9, 1  ;;  %v4244_v17 = vrot.slane %v8905_v25, 2  ;;  %v7994_v51 = vld [vmem:[#allocation7 + $0x1a8] sm:$0xff]  }
 0x4a3   :  { %vm4318_vm2 = vcmask 1043456   ;;  %5869 = vmatprep.mubr.bf16.mxu1 %v4215_v44  ;;  %7004 = vmatpush3.bf16.msra.mxu0 %v7984_v34  ;;  %v8958_v38 = vor.u32 %v4251_v18, %v4250_v15  ;;  %v4242_v54 = vor.u32 %v4241_v4, %v4240_v20  ;;  %v4277_v57 = vrot.slane %v8883_v53, 2  ;;  %v7997_v18 = vld [vmem:[#allocation7 + $0x1e0] sm:$0xff]  }
 0x4a4   :  { %v4278_v58 = vrot.slane %v8886_v45, 3  ;;  %5870 = vmatmul.mubr.bf16.vlgmr.msra.gmra.mxu1 %v4203_v2  ;;  %7005 = vmatprep.subr.bf16.mxu0 %v7987_v14  ;;  %v8962_v55 = vor.u32 %v4244_v17, %v4243_v12  ;;  %v4280_v8 = vrot.slane %v8922_v49, 2  ;;  %v4281_v61 = vrot.slane %v8917_v48, 3  ;;  %v7996_v12 = vld [vmem:[#allocation7 + $0x108] sm:$0xff]  }
 0x4a5   :  { %v4259_v37 = vrot.slane %v8869_v19, 2  ;;  %vm4299_vm0 = vsmask.f32 4352  ;;  %7026 = vmatpush3.bf16.msra.mxu1 %v7986_v1  ;;  %5876 = vmatprep.mubr.bf16.mxu1 %v4221_v52  ;;  %v4253_v56 = vsel %vm139_vm1, %v8898_v47, %v8958_v38  ;;  %v4260_v7 = vrot.slane %v8895_v59, 2 }
 0x4a6   :  { %v4279_v0 = vor.u32 %v4278_v58, %v4277_v57  ;;  %v4292_v11 = vrot.slane %v8871_v26, 3  ;;  %7027 = vmatprep.subr.bf16.mxu1 %v7989_v33  ;;  %v8974_v21 = vsel %vm139_vm1, %v4242_v54, %v8962_v55  ;;  %v8976_v10 = vor.u32 %v4281_v61, %v4280_v8  ;;  %v7999_v58 = vld [vmem:[#allocation7 + $0x140] sm:$0xff]  }
 0x4a7   :  { %v4293_v23 = vrot.slane %v8902_v22, 3  ;;  %v4270_v30 = vrot.slane %v8874_v62, 2  ;;  %7006 = vmatpush3.bf16.msra.mxu0 %v7988_v6  ;;  %v8983_v47 = vsel %vm4258_vm4, %v4259_v37, %v4260_v7  ;;  %v4271_v35 = vrot.slane %v8877_v27, 3 }
 0x4a8   :  { %v4273_v20 = vrot.slane %v8908_v9, 2  ;;  %v4274_v42 = vrot.slane %v8905_v25, 3  ;;  %7007 = vmatprep.subr.bf16.mxu0 %v7991_v60  ;;  %v8990_v29 = vsel %vm4269_vm7, %v4279_v0, %v8976_v10  ;;  %v4307_v28 = vrot.slane %v8883_v53, 3 }
 0x4a9   :  { %v8995_v43 = vsel %vm4288_vm8, %v4292_v11, %v4293_v23  ;;  %v4308_v34 = vrot.slane %v8886_v45, 4  ;;  %7028 = vmatpush3.bf16.msra.mxu1 %v7990_v63  ;;  %v4272_v2 = vor.u32 %v4271_v35, %v4270_v30  ;;  %v4310_v15 = vrot.slane %v8922_v49, 3  ;;  %v7998_v63 = vld [vmem:[#allocation7 + $0x1a0] sm:$0xff]   ;;  %v8001_v30 = vld [vmem:[#allocation7 + $0x1d8] sm:$0xff]  }
 0x4aa   :  { %v8999_v14 = vor.u32 %v4274_v42, %v4273_v20  ;;  %v4311_v1 = vrot.slane %v8917_v48, 4  ;;  %vm4360_vm1 = vcmask 1042432   ;;  %7029 = vmatprep.subr.bf16.mxu1 %v7993_v13  ;;  %v4289_v44 = vrot.slane %v8869_v19, 3  ;;  %v8000_v42 = vld [vmem:[#allocation7 + $0x100] sm:$0xff]  }
 0x4ab   :  { %v4309_v4 = vor.u32 %v4308_v34, %v4307_v28  ;;  %v4290_v52 = vrot.slane %v8895_v59, 3  ;;  %v4319_v33 = vrot.slane %v8869_v19, 4  ;;  %7008 = vmatpush3.bf16.msra.mxu0 %v7992_v32  ;;  %v4320_v54 = vrot.slane %v8895_v59, 4 }
 0x4ac   :  { %v9008_v17 = vsel %vm4269_vm7, %v4272_v2, %v8999_v14  ;;  %v9010_v6 = vor.u32 %v4311_v1, %v4310_v15  ;;  %v4322_v57 = vrot.slane %v8871_v26, 4  ;;  %5877 = vmatmul.mubr.bf16.gmra.mxu1 %v8942_v39  ;;  %7009 = vmatprep.subr.bf16.mxu0 %v7995_v16  ;;  %v4323_v8 = vrot.slane %v8902_v22, 4  ;;  %v8003_v2 = vld [vmem:[#allocation7 + $0x278] sm:$0xff]  }
 0x4ad   :  { %v9018_v60 = vsel %vm4288_vm8, %v4289_v44, %v4290_v52  ;;  %v4300_v61 = vrot.slane %v8874_v62, 3  ;;  %v4301_v37 = vrot.slane %v8877_v27, 4  ;;  %7030 = vmatpush3.bf16.msra.mxu1 %v7994_v51  ;;  %5963 = vmatprep.mubr.bf16.mxu1 %v4253_v56  ;;  %v9030_v39 = vsel %vm4318_vm2, %v4319_v33, %v4320_v54  ;;  %v8004_v44 = vld [vmem:[#allocation7 + $0x1d0] sm:$0xff]  }
 0x4ae   :  { %v9025_v0 = vsel %vm4299_vm0, %v4309_v4, %v9010_v6  ;;  %v4303_v11 = vrot.slane %v8908_v9, 3  ;;  %v4304_v13 = vrot.slane %v8905_v25, 4  ;;  %7031 = vmatprep.subr.bf16.mxu1 %v7997_v18  ;;  %v9037_v56 = vsel %vm4318_vm2, %v4322_v57, %v4323_v8  ;;  %v8005_v57 = vld [vmem:[#allocation7 + $0x238] sm:$0xff]  }
 0x4af   :  { %v4302_v32 = vor.u32 %v4301_v37, %v4300_v61  ;;  %v4337_v35 = vrot.slane %v8883_v53, 4  ;;  %v4338_v20 = vrot.slane %v8886_v45, 5  ;;  %7010 = vmatpush3.bf16.msra.mxu0 %v7996_v12  ;;  %v4340_v28 = vrot.slane %v8922_v49, 4  ;;  %v8002_v45 = vld [vmem:[#allocation7 + $0x198] sm:$0xff]   ;;  %v8007_v37 = vld [vmem:[#allocation7 + $0x270] sm:$0xff]  }
 0x4b0   :  { %v9041_v16 = vor.u32 %v4304_v13, %v4303_v11  ;;  %v4341_v34 = vrot.slane %v8917_v48, 5  ;;  %v4364_v51 = vrot.slane %v8871_v26, 5  ;;  %7011 = vmatprep.subr.bf16.mxu0 %v7999_v58  ;;  %v4365_v1 = vrot.slane %v8902_v22, 5  ;;  %v8006_v13 = vld [vmem:[#allocation7 + $0x190] sm:$0xff]   ;;  %v8112_v22 = vld [vmem:[#allocation7 + $0x520] sm:$0xff]  }
 0x4b1   :  { %v4339_v15 = vor.u32 %v4338_v20, %v4337_v35  ;;  %v4330_v18 = vrot.slane %v8874_v62, 4  ;;  %v4331_v53 = vrot.slane %v8877_v27, 5  ;;  %7032 = vmatpush3.bf16.msra.mxu1 %v7998_v63  ;;  %v4333_v48 = vrot.slane %v8908_v9, 4  ;;  %v8008_v35 = vld [vmem:[#allocation7 + $0x1c8] sm:$0xff]  }
 0x4b2   :  { %v9051_v4 = vsel %vm4299_vm0, %v4302_v32, %v9041_v16  ;;  %v4342_v49 = vor.u32 %v4341_v34, %v4340_v28  ;;  %v4334_v26 = vrot.slane %v8905_v25, 5  ;;  %7033 = vmatprep.subr.bf16.mxu1 %v8001_v30  ;;  %v9056_v33 = vsel %vm4360_vm1, %v4364_v51, %v4365_v1  ;;  %v8010_v28 = vld [vmem:[#allocation7 + $0x188] sm:$0xff]   ;;  %v8014_v34 = vld [vmem:[#allocation7 + $0x180] sm:$0xff]   ;;  %v8017_v51 = vld [vmem:[#allocation7 + $0x2f8] sm:$0xff]  }
 0x4b3   :  { %v4332_v12 = vor.u32 %v4331_v53, %v4330_v18  ;;  %v4350_v62 = vshll.u32 %v8934_v24, 16  ;;  %v4369_v27 = vrot.slane %v8934_v24, 5  ;;  %7012 = vmatpush3.bf16.msra.mxu0 %v8000_v42  ;;  %v4361_v9 = vrot.slane %v8869_v19, 5  ;;  %v8011_v42 = vld [vmem:[#allocation7 + $0x268] sm:$0xff]   ;;  %v8020_v18 = vld [vmem:[#allocation7 + $0x218] sm:$0xff]   ;;  %v8023_v53 = vld [vmem:[#allocation7 + $0x250] sm:$0xff]  }
 0x4b4   :  { %v9061_v58 = vsel %vm4329_vm9, %v4339_v15, %v4342_v49  ;;  %v4335_v61 = vor.u32 %v4334_v26, %v4333_v48  ;;  %v4362_v25 = vrot.slane %v8895_v59, 5  ;;  %7053 = vmatprep.subr.bf16.mxu0 %v8003_v2  ;;  %v8019_v2 = vld [vmem:[#allocation7 + $0x258] sm:$0xff]   ;;  %v8026_v48 = vld [vmem:[#allocation7 + $0x2a8] sm:$0xff]   ;;  %v8029_v26 = vld [vmem:[#allocation7 + $0x2e0] sm:$0xff]  }
 0x4b5   :  { %v4352_v63 = vrot.slane %v4350_v62, 5  ;;  %v9066_v11 = vsel %vm4360_vm1, %v4365_v1, %v4369_v27  ;;  %7034 = vmatpush3.bf16.msra.mxu1 %v8002_v45  ;;  %v8018_v15 = vld [vmem:[#allocation7 + $0x2b8] sm:$0xff]   ;;  %v8021_v1 = vld [vmem:[#allocation7 + $0x2f0] sm:$0xff]   ;;  %v8025_v45 = vld [vmem:[#allocation7 + $0x2e8] sm:$0xff]  }
 0x4b6   :  { %v9069_v24 = vsel %vm4329_vm9, %v4332_v12, %v4335_v61  ;;  %v9073_v30 = vsel %vm4329_vm9, %v4335_v61, %v8945_v40  ;;  %v9076_v32 = vsel %vm4360_vm1, %v4361_v9, %v4362_v25  ;;  %v9081_v19 = vsel %vm4360_vm1, %v4362_v25, %v4367_v3  ;;  %5917 = vmatmul.mubr.bf16.vlgmr.msra.gmra.mxu0 %v8929_v50  ;;  %v8009_v40 = vld [vmem:[#allocation7 + $0x230] sm:$0xff]   ;;  %v8013_v3 = vld [vmem:[#allocation7 + $0x228] sm:$0xff]   ;;  %v8015_v50 = vld [vmem:[#allocation7 + $0x260] sm:$0xff]  }
 0x4b7   :  { %7035 = vmatprep.subr.bf16.mxu1 %v8004_v44  ;;  %v9085_v20 = vsel %vm4329_vm9, %v4342_v49, %v4352_v63  ;;  %5923 = vmatprep.mubr.bf16.mxu0 %v4234_v46  ;;  %v8016_v46 = vld [vmem:[#allocation7 + $0x220] sm:$0xff]   ;;  %v8027_v49 = vld [vmem:[#allocation7 + $0x248] sm:$0xff]   ;;  %v8033_v12 = vld [vmem:[#allocation7 + $0x2d8] sm:$0xff]  }
 0x4b8   :  { %7054 = vmatpush3.bf16.msra.mxu0 %v8005_v57  ;;  %v8028_v44 = vld [vmem:[#allocation7 + $0x208] sm:$0xff]   ;;  %v8032_v62 = vld [vmem:[#allocation7 + $0x200] sm:$0xff]   ;;  %v8035_v27 = vld [vmem:[#allocation7 + $0x378] sm:$0xff]  }
 0x4b9   :  { %7055 = vmatprep.subr.bf16.mxu0 %v8007_v37  ;;  %7036 = vmatpush3.bf16.msra.mxu1 %v8006_v13  ;;  %v8034_v57 = vld [vmem:[#allocation7 + $0x298] sm:$0xff]   ;;  %v8036_v61 = vld [vmem:[#allocation7 + $0x2d0] sm:$0xff]   ;;  %v8043_v63 = vld [vmem:[#allocation7 + $0x368] sm:$0xff]  }
 0x4ba   :  { %7037 = vmatprep.subr.bf16.mxu1 %v8008_v35  ;;  %v8037_v9 = vld [vmem:[#allocation7 + $0x338] sm:$0xff]   ;;  %v8038_v25 = vld [vmem:[#allocation7 + $0x290] sm:$0xff]   ;;  %v8042_v13 = vld [vmem:[#allocation7 + $0x288] sm:$0xff]  }
 0x4bb   :  { %v8041_v37 = vld [vmem:[#allocation7 + $0x330] sm:$0xff]   ;;  %v8044_v35 = vld [vmem:[#allocation7 + $0x2c0] sm:$0xff]  }
 0x4bc   :  { %7056 = vmatpush3.bf16.msra.mxu0 %v8009_v40  ;;  %v8045_v40 = vld [vmem:[#allocation7 + $0x328] sm:$0xff]   ;;  %v8116_v59 = vld [vmem:[#allocation7 + $0x510] sm:$0xff]  }
 0x4bd   :  { %7057 = vmatprep.subr.bf16.mxu0 %v8011_v42  ;;  %7038 = vmatpush3.bf16.msra.mxu1 %v8010_v28  ;;  %v8047_v42 = vld [vmem:[#allocation7 + $0x360] sm:$0xff]  }
 0x4be   :  { %5924 = vmatmul.mubr.bf16.gmra.mxu0 %v4231_v5  ;;  %7039 = vmatprep.subr.bf16.mxu1 %v8012_v36  ;;  %v8022_v5 = vld [vmem:[#allocation7 + $0x2b0] sm:$0xff]   ;;  %v8046_v28 = vld [vmem:[#allocation7 + $0x280] sm:$0xff]   ;;  %v8051_v36 = vld [vmem:[#allocation7 + $0x358] sm:$0xff]  }
 0x4bf   :  { %6010 = vmatprep.mubr.bf16.mxu0 %v8951_v41  ;;  %v8024_v41 = vld [vmem:[#allocation7 + $0x210] sm:$0xff]  }
 0x4c0   :  { %7058 = vmatpush3.bf16.msra.mxu0 %v8013_v3  ;;  %v8050_v3 = vld [vmem:[#allocation7 + $0x3b8] sm:$0xff]  }
 0x4c1   :  { %7059 = vmatprep.subr.bf16.mxu0 %v8015_v50  ;;  %7040 = vmatpush3.bf16.msra.mxu1 %v8014_v34  ;;  %v8053_v50 = vld [vmem:[#allocation7 + $0x3f0] sm:$0xff]   ;;  %v8052_v34 = vld [vmem:[#allocation7 + $0x318] sm:$0xff]  }
 0x4c2   :  { %7081 = vmatprep.subr.bf16.mxu1 %v8017_v51  ;;  %v8055_v51 = vld [vmem:[#allocation7 + $0x350] sm:$0xff]  }
 0x4c4   :  { %7060 = vmatpush3.bf16.msra.mxu0 %v8016_v46  ;;  %5964 = vmatmul.mubr.bf16.vlgmr.msra.gmra.mxu1 %v8974_v21  ;;  %v8031_v21 = vld [vmem:[#allocation7 + $0x240] sm:$0xff]   ;;  %v8057_v46 = vld [vmem:[#allocation7 + $0x3e8] sm:$0xff]  }
 0x4c5   :  { %7061 = vmatprep.subr.bf16.mxu0 %v8019_v2  ;;  %5970 = vmatprep.mubr.bf16.mxu1 %v8958_v38  ;;  %v8030_v38 = vld [vmem:[#allocation7 + $0x2a0] sm:$0xff]   ;;  %v8059_v2 = vld [vmem:[#allocation7 + $0x348] sm:$0xff]  }
 0x4c6   :  { %7082 = vmatpush3.bf16.msra.mxu1 %v8018_v15  ;;  %v8058_v15 = vld [vmem:[#allocation7 + $0x3a8] sm:$0xff]  }
 0x4c7   :  { %7083 = vmatprep.subr.bf16.mxu1 %v8021_v1  ;;  %v8061_v1 = vld [vmem:[#allocation7 + $0x3e0] sm:$0xff]  }
 0x4c8   :  { %7062 = vmatpush3.bf16.msra.mxu0 %v8020_v18  ;;  %v8060_v18 = vld [vmem:[#allocation7 + $0x308] sm:$0xff]  }
 0x4c9   :  { %7063 = vmatprep.subr.bf16.mxu0 %v8023_v53  ;;  %v8065_v53 = vld [vmem:[#allocation7 + $0x3d8] sm:$0xff]  }
 0x4ca   :  { %7084 = vmatpush3.bf16.msra.mxu1 %v8022_v5  ;;  %v8064_v5 = vld [vmem:[#allocation7 + $0x300] sm:$0xff]  }
 0x4cb   :  { %7085 = vmatprep.subr.bf16.mxu1 %v8025_v45  ;;  %v8067_v45 = vld [vmem:[#allocation7 + $0x478] sm:$0xff]  }
 0x4cc   :  { %7064 = vmatpush3.bf16.msra.mxu0 %v8024_v41  ;;  %5971 = vmatmul.mubr.bf16.gmra.mxu1 %v8962_v55  ;;  %v8039_v55 = vld [vmem:[#allocation7 + $0x370] sm:$0xff]   ;;  %v8066_v41 = vld [vmem:[#allocation7 + $0x398] sm:$0xff]  }
 0x4cd   :  { %7065 = vmatprep.subr.bf16.mxu0 %v8027_v49  ;;  %6057 = vmatprep.mubr.bf16.mxu1 %v8990_v29  ;;  %v8040_v29 = vld [vmem:[#allocation7 + $0x2c8] sm:$0xff]   ;;  %v8068_v49 = vld [vmem:[#allocation7 + $0x3d0] sm:$0xff]  }
 0x4ce   :  { %7086 = vmatpush3.bf16.msra.mxu1 %v8026_v48  ;;  %v8069_v48 = vld [vmem:[#allocation7 + $0x438] sm:$0xff]  }
 0x4cf   :  { %7087 = vmatprep.subr.bf16.mxu1 %v8029_v26  ;;  %v8070_v26 = vld [vmem:[#allocation7 + $0x390] sm:$0xff]  }
 0x4d0   :  { %7066 = vmatpush3.bf16.msra.mxu0 %v8028_v44  ;;  %v8073_v44 = vld [vmem:[#allocation7 + $0x430] sm:$0xff]  }
 0x4d1   :  { %7067 = vmatprep.subr.bf16.mxu0 %v8031_v21  ;;  %v8075_v21 = vld [vmem:[#allocation7 + $0x468] sm:$0xff]  }
 0x4d2   :  { %7088 = vmatpush3.bf16.msra.mxu1 %v8030_v38  ;;  %v8074_v38 = vld [vmem:[#allocation7 + $0x388] sm:$0xff]  }
 0x4d3   :  { %7089 = vmatprep.subr.bf16.mxu1 %v8033_v12  ;;  %v8076_v12 = vld [vmem:[#allocation7 + $0x3c0] sm:$0xff]  }
 0x4d4   :  { %7068 = vmatpush3.bf16.msra.mxu0 %v8032_v62  ;;  %v8077_v62 = vld [vmem:[#allocation7 + $0x428] sm:$0xff]  }
 0x4d5   :  { %7109 = vmatprep.subr.bf16.mxu0 %v8035_v27  ;;  %v8079_v27 = vld [vmem:[#allocation7 + $0x460] sm:$0xff]  }
 0x4d6   :  { %7090 = vmatpush3.bf16.msra.mxu1 %v8034_v57  ;;  %v8078_v57 = vld [vmem:[#allocation7 + $0x380] sm:$0xff]  }
 0x4d7   :  { %6011 = vmatmul.mubr.bf16.vlgmr.msra.gmra.mxu0 %v8983_v47  ;;  %7091 = vmatprep.subr.bf16.mxu1 %v8036_v61  ;;  %v8049_v47 = vld [vmem:[#allocation7 + $0x3f8] sm:$0xff]  }
 0x4d8   :  { %6017 = vmatprep.mubr.bf16.mxu0 %v4263_v31  ;;  %7110 = vmatpush3.bf16.msra.mxu0 %v8037_v9  ;;  %v8048_v31 = vld [vmem:[#allocation7 + $0x320] sm:$0xff]   ;;  %v8083_v61 = vld [vmem:[#allocation7 + $0x458] sm:$0xff]  }
 0x4d9   :  { %7111 = vmatprep.subr.bf16.mxu0 %v8039_v55  ;;  %v8082_v9 = vld [vmem:[#allocation7 + $0x4b8] sm:$0xff]   ;;  %v8085_v55 = vld [vmem:[#allocation7 + $0x4f0] sm:$0xff]  }
 0x4da   :  { %7092 = vmatpush3.bf16.msra.mxu1 %v8038_v25  ;;  %v8084_v25 = vld [vmem:[#allocation7 + $0x418] sm:$0xff]  }
 0x4db   :  { %7093 = vmatprep.subr.bf16.mxu1 %v8040_v29  ;;  %v8087_v29 = vld [vmem:[#allocation7 + $0x450] sm:$0xff]  }
 0x4dc   :  { %7112 = vmatpush3.bf16.msra.mxu0 %v8041_v37  ;;  %v8089_v37 = vld [vmem:[#allocation7 + $0x4e8] sm:$0xff]  }
 0x4dd   :  { %7113 = vmatprep.subr.bf16.mxu0 %v8043_v63  ;;  %v8091_v63 = vld [vmem:[#allocation7 + $0x448] sm:$0xff]  }
 0x4de   :  { %7094 = vmatpush3.bf16.msra.mxu1 %v8042_v13  ;;  %v8090_v13 = vld [vmem:[#allocation7 + $0x4a8] sm:$0xff]  }
 0x4df   :  { %6018 = vmatmul.mubr.bf16.gmra.mxu0 %v4260_v7  ;;  %7095 = vmatprep.subr.bf16.mxu1 %v8044_v35  ;;  %v8054_v7 = vld [vmem:[#allocation7 + $0x3b0] sm:$0xff]   ;;  %v8093_v35 = vld [vmem:[#allocation7 + $0x4e0] sm:$0xff]  }
 0x4e0   :  { %7114 = vmatpush3.bf16.msra.mxu0 %v8045_v40  ;;  %6104 = vmatprep.mubr.bf16.mxu0 %v8995_v43  ;;  %v8056_v43 = vld [vmem:[#allocation7 + $0x310] sm:$0xff]   ;;  %v8092_v40 = vld [vmem:[#allocation7 + $0x408] sm:$0xff]  }
 0x4e1   :  { %7115 = vmatprep.subr.bf16.mxu0 %v8047_v42  ;;  %v8097_v42 = vld [vmem:[#allocation7 + $0x4d8] sm:$0xff]  }
 0x4e2   :  { %7096 = vmatpush3.bf16.msra.mxu1 %v8046_v28  ;;  %v8096_v28 = vld [vmem:[#allocation7 + $0x400] sm:$0xff]  }
 0x4e3   :  { %7137 = vmatprep.subr.bf16.mxu1 %v8049_v47  ;;  %v8099_v47 = vld [vmem:[#allocation7 + $0x578] sm:$0xff]  }
 0x4e4   :  { %7116 = vmatpush3.bf16.msra.mxu0 %v8048_v31  ;;  %v8098_v31 = vld [vmem:[#allocation7 + $0x498] sm:$0xff]  }
 0x4e5   :  { %6058 = vmatmul.mubr.bf16.vlgmr.msra.gmra.mxu1 %v9008_v17  ;;  %7117 = vmatprep.subr.bf16.mxu0 %v8051_v36  ;;  %v8063_v17 = vld [vmem:[#allocation7 + $0x340] sm:$0xff]   ;;  %v8100_v36 = vld [vmem:[#allocation7 + $0x4d0] sm:$0xff]  }
 0x4e6   :  { %6064 = vmatprep.mubr.bf16.mxu1 %v8976_v10  ;;  %7138 = vmatpush3.bf16.msra.mxu1 %v8050_v3  ;;  %v8062_v10 = vld [vmem:[#allocation7 + $0x3a0] sm:$0xff]   ;;  %v8101_v3 = vld [vmem:[#allocation7 + $0x538] sm:$0xff]  }
 0x4e7   :  { %7139 = vmatprep.subr.bf16.mxu1 %v8053_v50  ;;  %v8102_v50 = vld [vmem:[#allocation7 + $0x490] sm:$0xff]  }
 0x4e8   :  { %7118 = vmatpush3.bf16.msra.mxu0 %v8052_v34  ;;  %v8105_v34 = vld [vmem:[#allocation7 + $0x530] sm:$0xff]  }
 0x4e9   :  { %7119 = vmatprep.subr.bf16.mxu0 %v8055_v51  ;;  %v8107_v51 = vld [vmem:[#allocation7 + $0x568] sm:$0xff]  }
 0x4ea   :  { %7140 = vmatpush3.bf16.msra.mxu1 %v8054_v7  ;;  %v8106_v7 = vld [vmem:[#allocation7 + $0x488] sm:$0xff]  }
 0x4eb   :  { %7141 = vmatprep.subr.bf16.mxu1 %v8057_v46  ;;  %v8108_v46 = vld [vmem:[#allocation7 + $0x4c0] sm:$0xff]  }
 0x4ec   :  { %7120 = vmatpush3.bf16.msra.mxu0 %v8056_v43  ;;  %v8109_v43 = vld [vmem:[#allocation7 + $0x528] sm:$0xff]  }
 0x4ed   :  { %6065 = vmatmul.mubr.bf16.gmra.mxu1 %v8999_v14  ;;  %7121 = vmatprep.subr.bf16.mxu0 %v8059_v2  ;;  %v8071_v14 = vld [vmem:[#allocation7 + $0x470] sm:$0xff]   ;;  %v8111_v2 = vld [vmem:[#allocation7 + $0x560] sm:$0xff]  }
 0x4ee   :  { %7142 = vmatpush3.bf16.msra.mxu1 %v8058_v15  ;;  %6151 = vmatprep.mubr.bf16.mxu1 %v9025_v0  ;;  %v8072_v0 = vld [vmem:[#allocation7 + $0x3c8] sm:$0xff]   ;;  %v8110_v15 = vld [vmem:[#allocation7 + $0x480] sm:$0xff]  }
 0x4ef   :  { %7143 = vmatprep.subr.bf16.mxu1 %v8061_v1  ;;  %v8115_v1 = vld [vmem:[#allocation7 + $0x550] sm:$0xff]  }
 0x4f0   :  { %7122 = vmatpush3.bf16.msra.mxu0 %v8060_v18  ;;  %v8119_v18 = vld [vmem:[#allocation7 + $0x540] sm:$0xff]  }
 0x4f1   :  { %7123 = vmatprep.subr.bf16.mxu0 %v8063_v17 }
 0x4f2   :  { %7144 = vmatpush3.bf16.msra.mxu1 %v8062_v10 }
 0x4f3   :  { %7145 = vmatprep.subr.bf16.mxu1 %v8065_v53 }
 0x4f4   :  { %7124 = vmatpush3.bf16.msra.mxu0 %v8064_v5 }
 0x4f5   :  { %7165 = vmatprep.subr.bf16.mxu0 %v8067_v45 }
 0x4f6   :  { %7146 = vmatpush3.bf16.msra.mxu1 %v8066_v41 }
 0x4f7   :  { %6105 = vmatmul.mubr.bf16.vlgmr.msra.gmra.mxu0 %v9018_v60  ;;  %7147 = vmatprep.subr.bf16.mxu1 %v8068_v49  ;;  %v8081_v60 = vld [vmem:[#allocation7 + $0x4f8] sm:$0xff]  }
 0x4f8   :  { %6111 = vmatprep.mubr.bf16.mxu0 %v4293_v23  ;;  %7166 = vmatpush3.bf16.msra.mxu0 %v8069_v48  ;;  %v8080_v23 = vld [vmem:[#allocation7 + $0x420] sm:$0xff]  }
 0x4f9   :  { %7167 = vmatprep.subr.bf16.mxu0 %v8071_v14 }
 0x4fa   :  { %7148 = vmatpush3.bf16.msra.mxu1 %v8070_v26 }
 0x4fb   :  { %7149 = vmatprep.subr.bf16.mxu1 %v8072_v0 }
 0x4fc   :  { %7168 = vmatpush3.bf16.msra.mxu0 %v8073_v44 }
 0x4fd   :  { %7169 = vmatprep.subr.bf16.mxu0 %v8075_v21 }
 0x4fe   :  { %7150 = vmatpush3.bf16.msra.mxu1 %v8074_v38 }
 0x4ff   :  { %6112 = vmatmul.mubr.bf16.gmra.mxu0 %v4290_v52  ;;  %7151 = vmatprep.subr.bf16.mxu1 %v8076_v12  ;;  %v8086_v52 = vld [vmem:[#allocation7 + $0x4b0] sm:$0xff]  }
 0x500   :  { %7170 = vmatpush3.bf16.msra.mxu0 %v8077_v62  ;;  %6198 = vmatprep.mubr.bf16.mxu0 %v9037_v56  ;;  %v8088_v56 = vld [vmem:[#allocation7 + $0x410] sm:$0xff]  }
 0x501   :  { %7171 = vmatprep.subr.bf16.mxu0 %v8079_v27 }
 0x502   :  { %7152 = vmatpush3.bf16.msra.mxu1 %v8078_v57 }
 0x503   :  { %7193 = vmatprep.subr.bf16.mxu1 %v8081_v60 }
 0x504   :  { %7172 = vmatpush3.bf16.msra.mxu0 %v8080_v23 }
 0x505   :  { %6152 = vmatmul.mubr.bf16.vlgmr.msra.gmra.mxu1 %v9051_v4  ;;  %7173 = vmatprep.subr.bf16.mxu0 %v8083_v61  ;;  %v8095_v4 = vld [vmem:[#allocation7 + $0x440] sm:$0xff]  }
 0x506   :  { %6158 = vmatprep.mubr.bf16.mxu1 %v9010_v6  ;;  %7194 = vmatpush3.bf16.msra.mxu1 %v8082_v9  ;;  %v8094_v6 = vld [vmem:[#allocation7 + $0x4a0] sm:$0xff]  }
 0x507   :  { %7195 = vmatprep.subr.bf16.mxu1 %v8085_v55 }
 0x508   :  { %7174 = vmatpush3.bf16.msra.mxu0 %v8084_v25 }
 0x509   :  { %7175 = vmatprep.subr.bf16.mxu0 %v8087_v29 }
 0x50a   :  { %7196 = vmatpush3.bf16.msra.mxu1 %v8086_v52 }
 0x50b   :  { %7197 = vmatprep.subr.bf16.mxu1 %v8089_v37 }
 0x50c   :  { %7176 = vmatpush3.bf16.msra.mxu0 %v8088_v56 }
 0x50d   :  { %6159 = vmatmul.mubr.bf16.gmra.mxu1 %v9041_v16  ;;  %7177 = vmatprep.subr.bf16.mxu0 %v8091_v63  ;;  %v8103_v16 = vld [vmem:[#allocation7 + $0x570] sm:$0xff]  }
 0x50e   :  { %7198 = vmatpush3.bf16.msra.mxu1 %v8090_v13  ;;  %6245 = vmatprep.mubr.bf16.mxu1 %v9061_v58  ;;  %v8104_v58 = vld [vmem:[#allocation7 + $0x4c8] sm:$0xff]  }
 0x50f   :  { %7199 = vmatprep.subr.bf16.mxu1 %v8093_v35 }
 0x510   :  { %7178 = vmatpush3.bf16.msra.mxu0 %v8092_v40 }
 0x511   :  { %7179 = vmatprep.subr.bf16.mxu0 %v8095_v4 }
 0x512   :  { %7200 = vmatpush3.bf16.msra.mxu1 %v8094_v6 }
 0x513   :  { %7201 = vmatprep.subr.bf16.mxu1 %v8097_v42 }
 0x514   :  { %7180 = vmatpush3.bf16.msra.mxu0 %v8096_v28 }
 0x515   :  { %7221 = vmatprep.subr.bf16.mxu0 %v8099_v47 }
 0x516   :  { %7202 = vmatpush3.bf16.msra.mxu1 %v8098_v31 }
 0x517   :  { %6199 = vmatmul.mubr.bf16.vlgmr.msra.gmra.mxu0 %v9030_v39  ;;  %7203 = vmatprep.subr.bf16.mxu1 %v8100_v36  ;;  %v8114_v39 = vld [vmem:[#allocation7 + $0x518] sm:$0xff]  }
 0x518   :  { %6205 = vmatprep.mubr.bf16.mxu0 %v4323_v8  ;;  %7222 = vmatpush3.bf16.msra.mxu0 %v8101_v3  ;;  %v8113_v8 = vld [vmem:[#allocation7 + $0x558] sm:$0xff]  }
 0x519   :  { %7223 = vmatprep.subr.bf16.mxu0 %v8103_v16 }
 0x51a   :  { %7204 = vmatpush3.bf16.msra.mxu1 %v8102_v50 }
 0x51b   :  { %7205 = vmatprep.subr.bf16.mxu1 %v8104_v58 }
 0x51c   :  { %7224 = vmatpush3.bf16.msra.mxu0 %v8105_v34 }
 0x51d   :  { %7225 = vmatprep.subr.bf16.mxu0 %v8107_v51 }
 0x51e   :  { %7206 = vmatpush3.bf16.msra.mxu1 %v8106_v7 }
 0x51f   :  { %6206 = vmatmul.mubr.bf16.gmra.mxu0 %v4320_v54  ;;  %7207 = vmatprep.subr.bf16.mxu1 %v8108_v46  ;;  %v8117_v54 = vld [vmem:[#allocation7 + $0x548] sm:$0xff]  }
 0x520   :  { %7226 = vmatpush3.bf16.msra.mxu0 %v8109_v43  ;;  %6292 = vmatprep.mubr.bf16.mxu0 %v9056_v33  ;;  %v8118_v33 = vld [vmem:[#allocation7 + $0x508] sm:$0xff]  }
 0x521   :  { %7227 = vmatprep.subr.bf16.mxu0 %v8111_v2 }
 0x522   :  { %7208 = vmatpush3.bf16.msra.mxu1 %v8110_v15 }
 0x523   :  { %7249 = vmatprep.subr.bf16.mxu1 %v8099_v47 }
 0x524   :  { %7228 = vmatpush3.bf16.msra.mxu0 %v8112_v22 }
 0x525   :  { %6246 = vmatmul.mubr.bf16.vlgmr.msra.gmra.mxu1 %v9069_v24  ;;  %7229 = vmatprep.subr.bf16.mxu0 %v8113_v8  ;;  %v8120_v24 = vld [vmem:[#allocation7 + $0x500] sm:$0xff]  }
 0x526   :  { %6252 = vmatprep.mubr.bf16.mxu1 %v9085_v20  ;;  %7257 = vmatpush3.bf16.msra.mxu1 %v8101_v3 }
 0x527   :  { %7250 = vmatprep.subr.bf16.mxu1 %v8103_v16 }
 0x528   :  { %7230 = vmatpush3.bf16.msra.mxu0 %v8114_v39 }
 0x529   :  { %7231 = vmatprep.subr.bf16.mxu0 %v8115_v1 }
 0x52a   :  { %7258 = vmatpush3.bf16.msra.mxu1 %v8105_v34 }
 0x52b   :  { %7251 = vmatprep.subr.bf16.mxu1 %v8107_v51 }
 0x52c   :  { %7232 = vmatpush3.bf16.msra.mxu0 %v8116_v59 }
 0x52d   :  { %6253 = vmatmul.mubr.bf16.gmra.mxu1 %v9073_v30  ;;  %7233 = vmatprep.subr.bf16.mxu0 %v8117_v54 }
 0x52e   :  { %7259 = vmatpush3.bf16.msra.mxu1 %v8109_v43  ;;  %6299 = vmatprep.mubr.bf16.mxu1 %v9066_v11 }
 0x52f   :  { %7252 = vmatprep.subr.bf16.mxu1 %v8111_v2 }
 0x530   :  { %7234 = vmatpush3.bf16.msra.mxu0 %v8118_v33 }
 0x531   :  { %7235 = vmatprep.subr.bf16.mxu0 %v8119_v18 }
 0x532   :  { %7260 = vmatpush3.bf16.msra.mxu1 %v8112_v22 }
 0x533   :  { %7253 = vmatprep.subr.bf16.mxu1 %v8113_v8 }
 0x534   :  { %7236 = vmatpush3.bf16.msra.mxu0 %v8120_v24 }
 0x536   :  { %7261 = vmatpush3.bf16.msra.mxu1 %v8114_v39 }
 0x537   :  { %6293 = vmatmul.mubr.bf16.vlgmr.msra.gmra.mxu0 %v9076_v32  ;;  %7254 = vmatprep.subr.bf16.mxu1 %v8115_v1  ;;  %v6764_v32 = vld [vmem:[%s9146_s9] ss:$0 sm:$0xff] }
 0x53a   :  { %7262 = vmatpush3.bf16.msra.mxu1 %v8116_v59 }
 0x53b   :  { %7255 = vmatprep.subr.bf16.mxu1 %v8117_v54 }
 0x53e   :  { %7263 = vmatpush3.bf16.msra.mxu1 %v8118_v33 }
 0x53f   :  { %7256 = vmatprep.subr.bf16.mxu1 %v8119_v18 }
 0x542   :  { %7264 = vmatpush3.bf16.msra.mxu1 %v8120_v24 }
 0x545   :  { %6300 = vmatmul.mubr.bf16.vlgmr.msra.gmra.mxu1 %v9081_v19 }
 0x556   :  { %v6957_v30 = vpop.f32.mrf.mxu0 }
 0x558   :  { %v6958_v11 = vpop.f32.mrf.mxu0 }
 0x559   :  { %v6959_v20 = vadd.f32 %v6958_v11, %v6957_v30 }
 0x55a   :  { %v6960_v17 = vpop.f32.mrf.mxu0 }
 0x55b   :  { %v5825_v26 = vadd.f32 %v6959_v20, %v6764_v32 }
 0x55c   :  { %v6961_v10 = vpop.f32.mrf.mxu0 }
 0x55e   :  { %v6963_v53 = vpop.f32.mrf.mxu0 }
 0x560   :  { %v6964_v5 = vpop.f32.mrf.mxu0 }
 0x561   :  { %v6965_v45 = vadd.f32 %v6964_v5, %v6963_v53 }
 0x562   :  { %v6966_v41 = vpop.f32.mrf.mxu0 }
 0x563   :  { %v5832_v62 = vadd.f32 %v6965_v45, %v6764_v32 }
 0x564   :  { %v6985_v49 = vpop.f32.mrf.mxu1  ;;  %v6967_v48 = vpop.f32.mrf.mxu0 }
 0x566   :  { %v6986_v14 = vpop.f32.mrf.mxu1 }
 0x567   :  { %v6987_v0 = vadd.f32 %v6986_v14, %v6985_v49 }
 0x568   :  { %v6988_v44 = vpop.f32.mrf.mxu1 }
 0x569   :  { %v5872_v19 = vadd.f32 %v6987_v0, %v5825_v26 }
 0x56a   :  { %v6989_v21 = vpop.f32.mrf.mxu1 }
 0x56c   :  { %v6991_v38 = vpop.f32.mrf.mxu1 }
 0x56e   :  { %v6992_v12 = vpop.f32.mrf.mxu1 }
 0x56f   :  { %v6993_v27 = vadd.f32 %v6992_v12, %v6991_v38 }
 0x570   :  { %v6994_v57 = vpop.f32.mrf.mxu1 }
 0x571   :  { %v5879_v60 = vadd.f32 %v6993_v27, %v5832_v62 }
 0x572   :  { %v6995_v23 = vpop.f32.mrf.mxu1 }
 0x576   :  { %v7013_v61 = vpop.f32.mrf.mxu0 }
 0x578   :  { %v7014_v9 = vpop.f32.mrf.mxu0 }
 0x579   :  { %v7015_v55 = vadd.f32 %v7014_v9, %v7013_v61 }
 0x57a   :  { %v7016_v25 = vpop.f32.mrf.mxu0 }
 0x57b   :  { %v5919_v29 = vadd.f32 %v7015_v55, %v5872_v19 }
 0x57c   :  { %v7017_v52 = vpop.f32.mrf.mxu0 }
 0x57e   :  { %v7019_v37 = vpop.f32.mrf.mxu0 }
 0x580   :  { %v7020_v56 = vpop.f32.mrf.mxu0 }
 0x581   :  { %v7021_v63 = vadd.f32 %v7020_v56, %v7019_v37 }
 0x582   :  { %v7022_v13 = vpop.f32.mrf.mxu0 }
 0x583   :  { %v5926_v35 = vadd.f32 %v7021_v63, %v5879_v60 }
 0x584   :  { %v7041_v40 = vpop.f32.mrf.mxu1  ;;  %v7023_v4 = vpop.f32.mrf.mxu0 }
 0x586   :  { %v7042_v6 = vpop.f32.mrf.mxu1 }
 0x587   :  { %v7043_v42 = vadd.f32 %v7042_v6, %v7041_v40 }
 0x588   :  { %v7044_v28 = vpop.f32.mrf.mxu1 }
 0x589   :  { %v5966_v47 = vadd.f32 %v7043_v42, %v5919_v29 }
 0x58a   :  { %v7045_v31 = vpop.f32.mrf.mxu1 }
 0x58c   :  { %v7047_v36 = vpop.f32.mrf.mxu1 }
 0x58e   :  { %v7048_v3 = vpop.f32.mrf.mxu1 }
 0x58f   :  { %v7049_v16 = vadd.f32 %v7048_v3, %v7047_v36 }
 0x590   :  { %v7050_v50 = vpop.f32.mrf.mxu1 }
 0x591   :  { %v5973_v58 = vadd.f32 %v7049_v16, %v5926_v35 }
 0x592   :  { %v7051_v34 = vpop.f32.mrf.mxu1 }
 0x597   :  { %v7069_v51 = vpop.f32.mrf.mxu0 }
 0x599   :  { %v7070_v7 = vpop.f32.mrf.mxu0 }
 0x59a   :  { %v7071_v46 = vadd.f32 %v7070_v7, %v7069_v51 }
 0x59b   :  { %v7072_v43 = vpop.f32.mrf.mxu0 }
 0x59c   :  { %v6013_v2 = vadd.f32 %v7071_v46, %v5966_v47 }
 0x59d   :  { %v7073_v15 = vpop.f32.mrf.mxu0 }
 0x59f   :  { %v7075_v22 = vpop.f32.mrf.mxu0 }
 0x5a1   :  { %v7076_v8 = vpop.f32.mrf.mxu0 }
 0x5a2   :  { %v7077_v39 = vadd.f32 %v7076_v8, %v7075_v22 }
 0x5a3   :  { %v7078_v1 = vpop.f32.mrf.mxu0 }
 0x5a4   :  { %v6020_v59 = vadd.f32 %v7077_v39, %v5973_v58 }
 0x5a5   :  { %v7097_v54 = vpop.f32.mrf.mxu1  ;;  %v7079_v33 = vpop.f32.mrf.mxu0 }
 0x5a7   :  { %v7098_v18 = vpop.f32.mrf.mxu1 }
 0x5a8   :  { %v7099_v24 = vadd.f32 %v7098_v18, %v7097_v54 }
 0x5a9   :  { %v7100_v30 = vpop.f32.mrf.mxu1 }
 0x5aa   :  { %v6060_v11 = vadd.f32 %v7099_v24, %v6013_v2 }
 0x5ab   :  { %v7101_v20 = vpop.f32.mrf.mxu1 }
 0x5ad   :  { %v7103_v17 = vpop.f32.mrf.mxu1 }
 0x5af   :  { %v7104_v10 = vpop.f32.mrf.mxu1 }
 0x5b0   :  { %v7105_v53 = vadd.f32 %v7104_v10, %v7103_v17 }
 0x5b1   :  { %v7106_v5 = vpop.f32.mrf.mxu1 }
 0x5b2   :  { %v6067_v45 = vadd.f32 %v7105_v53, %v6020_v59 }
 0x5b3   :  { %v7107_v41 = vpop.f32.mrf.mxu1 }
 0x5b7   :  { %v7125_v32 = vpop.f32.mrf.mxu0 }
 0x5b9   :  { %v7126_v49 = vpop.f32.mrf.mxu0 }
 0x5ba   :  { %v7127_v47 = vadd.f32 %v7126_v49, %v7125_v32 }
 0x5bb   :  { %v7128_v48 = vpop.f32.mrf.mxu0 }
 0x5bc   :  { %v6107_v16 = vadd.f32 %v7127_v47, %v6060_v11 }
 0x5bd   :  { %v7129_v14 = vpop.f32.mrf.mxu0 }
 0x5bf   :  { %v7131_v26 = vpop.f32.mrf.mxu0 }
 0x5c1   :  { %v7132_v0 = vpop.f32.mrf.mxu0 }
 0x5c2   :  { %v7133_v44 = vadd.f32 %v7132_v0, %v7131_v26 }
 0x5c3   :  { %v7134_v19 = vpop.f32.mrf.mxu0 }
 0x5c4   :  { %v6114_v21 = vadd.f32 %v7133_v44, %v6067_v45 }
 0x5c5   :  { %v7153_v38 = vpop.f32.mrf.mxu1  ;;  %v7135_v12 = vpop.f32.mrf.mxu0 }
 0x5c7   :  { %v7154_v62 = vpop.f32.mrf.mxu1 }
 0x5c8   :  { %v7155_v36 = vadd.f32 %v7154_v62, %v7153_v38 }
 0x5c9   :  { %v7156_v27 = vpop.f32.mrf.mxu1 }
 0x5ca   :  { %v6154_v58 = vadd.f32 %v7155_v36, %v6107_v16 }
 0x5cb   :  { %v7157_v57 = vpop.f32.mrf.mxu1 }
 0x5cd   :  { %v7159_v60 = vpop.f32.mrf.mxu1 }
 0x5cf   :  { %v7160_v23 = vpop.f32.mrf.mxu1 }
 0x5d0   :  { %v7161_v39 = vadd.f32 %v7160_v23, %v7159_v60 }
 0x5d1   :  { %v7162_v61 = vpop.f32.mrf.mxu1 }
 0x5d2   :  { %v6161_v59 = vadd.f32 %v7161_v39, %v6114_v21 }
 0x5d3   :  { %v7163_v9 = vpop.f32.mrf.mxu1 }
 0x5d7   :  { %v7181_v55 = vpop.f32.mrf.mxu0 }
 0x5d9   :  { %v7182_v25 = vpop.f32.mrf.mxu0 }
 0x5da   :  { %v7183_v50 = vadd.f32 %v7182_v25, %v7181_v55 }
 0x5db   :  { %v7184_v29 = vpop.f32.mrf.mxu0 }
 0x5dc   :  { %v6201_v7 = vadd.f32 %v7183_v50, %v6154_v58 }
 0x5dd   :  { %v7185_v52 = vpop.f32.mrf.mxu0 }
 0x5df   :  { %v7187_v37 = vpop.f32.mrf.mxu0 }
 0x5e1   :  { %v7188_v56 = vpop.f32.mrf.mxu0 }
 0x5e2   :  { %v7189_v1 = vadd.f32 %v7188_v56, %v7187_v37 }
 0x5e3   :  { %v7190_v63 = vpop.f32.mrf.mxu0 }
 0x5e4   :  { %v6208_v18 = vadd.f32 %v7189_v1, %v6161_v59 }
 0x5e5   :  { %v7209_v13 = vpop.f32.mrf.mxu1  ;;  %v7191_v35 = vpop.f32.mrf.mxu0 }
 0x5e7   :  { %v7210_v40 = vpop.f32.mrf.mxu1 }
 0x5e8   :  { %v7211_v34 = vadd.f32 %v7210_v40, %v7209_v13 }
 0x5e9   :  { %v7212_v4 = vpop.f32.mrf.mxu1 }
 0x5ea   :  { %v6248_v43 = vadd.f32 %v7211_v34, %v6201_v7 }
 0x5eb   :  { %v7213_v6 = vpop.f32.mrf.mxu1 }
 0x5ed   :  { %v7215_v42 = vpop.f32.mrf.mxu1 }
 0x5ef   :  { %v7216_v28 = vpop.f32.mrf.mxu1 }
 0x5f0   :  { %v7217_v54 = vadd.f32 %v7216_v28, %v7215_v42 }
 0x5f1   :  { %v7218_v31 = vpop.f32.mrf.mxu1 }
 0x5f2   :  { %v6255_v30 = vadd.f32 %v7217_v54, %v6208_v18 }
 0x5f3   :  { %v7219_v3 = vpop.f32.mrf.mxu1 }
 0x5f7   :  { %v7237_v51 = vpop.f32.mrf.mxu0 }
 0x5f9   :  { %v7238_v46 = vpop.f32.mrf.mxu0 }
 0x5fa   :  { %v7239_v2 = vadd.f32 %v7238_v46, %v7237_v51 }
 0x5fb   :  { %v7240_v15 = vpop.f32.mrf.mxu0 }
 0x5fc   :  { %v6295_v22 = vadd.f32 %v7239_v2, %v6248_v43 }
 0x5fd   :  { %v7241_v8 = vpop.f32.mrf.mxu0 }
 0x5fe   :  { %6307 = vst [vmem:[%s9147_s10] sm:$0x1] %v6295_v22 }
 0x605   :  { %v7243_v33 = vpop.f32.mrf.mxu1 }
 0x607   :  { %v7244_v24 = vpop.f32.mrf.mxu1 }
 0x608   :  { %v7245_v11 = vadd.f32 %v7244_v24, %v7243_v33 }
 0x609   :  { %v7246_v20 = vpop.f32.mrf.mxu1 }
 0x60a   :  { %v6302_v17 = vadd.f32 %v7245_v11, %v6255_v30 }
 0x60b   :  { %v7247_v10 = vpop.f32.mrf.mxu1 }
 0x60c   :  { %6308 = vst [vmem:[%s9147_s10 - $0x6] sm:$0x80] %v6302_v17 }
 0x60d   :  { %6313 = vsyncpa [#allocation3], 1 }
 0x60e   :  { %6314 = vsyncpa [#allocation5], 1 }
 0x60f   :  { %6315 = vsyncpa [#allocation8], 1 }

</bundles_post_ra>
